<compile_context>
chip_gen: v5e
topology: v5e:2x2
jax: 0.10.0
libtpu: 0.0.40
codegen_flags: <defaults>
</compile_context>

<pallas_src>
import functools

import jax
import jax.numpy as jnp
from jax import lax
from jax.experimental import pallas as pl
from jax.experimental.pallas import tpu as pltpu


def _round_up(x, m):
    return ((x + m - 1) // m) * m


def _vmem_limit(*block_nbytes):
    # double-buffered blocks + headroom, clamped so the config is safe on v7x (64 MiB).
    need = 2 * sum(int(b) for b in block_nbytes) + (2 << 20)
    return int(min(max(need, 32 << 20), 48 << 20))


# ---------------------------------------------------------------------------
# Shared GVPLinear tail (vector_gate=False, acts=(relu, sigmoid)) + GVPLayerNorm.
# vl / vr / vo are lists of the 3 xyz component slabs already multiplied by the
# input-side weights; s_partial already holds the scalar-input contributions.
# ---------------------------------------------------------------------------
def _gvp_tail(vl, vr, vo, s_partial, wo_w, wo_b, ws_v, ws_b, ln_g, ln_b):
    # --- LinearFullyConnectedDotProductLayer ---
    dot = vl[0] * vr[0] + vl[1] * vr[1] + vl[2] * vr[2]                  # sum over xyz
    vn = jnp.dot(dot, wo_w, preferred_element_type=jnp.float32) + wo_b   # [B, h]
    # --- scalar channel: s @ ws_s (+ agg part, pre-summed) + vn @ ws_v + b ---
    s_lin = s_partial + jnp.dot(vn, ws_v, preferred_element_type=jnp.float32) + ws_b
    # --- vector activation: v * sigmoid(||v||_xyz) ---
    sq = vo[0] * vo[0] + vo[1] * vo[1] + vo[2] * vo[2]
    gate = jax.nn.sigmoid(jnp.sqrt(jnp.maximum(sq, 1e-8)))
    vo = [x * gate for x in vo]
    # --- scalar activation: relu ---
    s_act = jnp.maximum(s_lin, 0.0)
    # --- GVPLayerNorm (rsqrt -> EUP) ---
    sq2 = jnp.maximum(vo[0] * vo[0] + vo[1] * vo[1] + vo[2] * vo[2], 1e-8)
    inv_vn = lax.rsqrt(jnp.mean(sq2, axis=-1, keepdims=True))
    vo = [x * inv_vn for x in vo]
    mu = jnp.mean(s_act, axis=-1, keepdims=True)
    var = jnp.mean(jnp.square(s_act - mu), axis=-1, keepdims=True)
    s_ln = (s_act - mu) * lax.rsqrt(var + 1e-5) * ln_g + ln_b
    return s_ln, vo


# ---------------------------------------------------------------------------
# edge (message) kernel: per-edge GVPLinear + GVPLayerNorm
#   input  v slab: [TE, 3*vi] component-major, component d = [rec_d(Vc) | send_d(Vc)]
#   output msg slab: [TE, se_out + 3*ve_out + 1] = [s | v_x | v_y | v_z | 1]
# ---------------------------------------------------------------------------
def edge_kernel(s_ref, v_ref, wl, wr, whv, wo_w, wo_b, ws_s, ws_v, ws_b, ln_g, ln_b,
                msg_ref, *, vi):
    s = s_ref[...]                                          # [TE, 2S+1]
    vflat = v_ref[...]                                      # [TE, 3*vi]
    vl, vr, vo = [], [], []
    for d in range(3):
        vd = vflat[:, d * vi:(d + 1) * vi]
        vl.append(jnp.dot(vd, wl[...], preferred_element_type=jnp.float32))
        vr.append(jnp.dot(vd, wr[...], preferred_element_type=jnp.float32))
        vo.append(jnp.dot(vd, whv[...], preferred_element_type=jnp.float32))
    s_partial = jnp.dot(s, ws_s[...], preferred_element_type=jnp.float32)
    s_ln, vo = _gvp_tail(vl, vr, vo, s_partial, wo_w[...], wo_b[...],
                         ws_v[...], ws_b[...], ln_g[...], ln_b[...])
    ones = jnp.ones((s.shape[0], 1), jnp.float32)           # count column
    msg_ref[...] = jnp.concatenate([s_ln] + vo + [ones], axis=-1)


# ---------------------------------------------------------------------------
# node (aggregate + update) kernel
#   grid = (N/tn "parallel", E/te "arbitrary" reduction)
#   one-hot adjacency is built in-register from the receiver ids (never in HBM);
#   aggregation is a single fused dot into one VMEM accumulator per step.
# ---------------------------------------------------------------------------
def node_kernel(rec_ref, msg_ref, s_ref, v_ref,
                wl_o, wl_a, wr_o, wr_a, whv_o, whv_a, wo_w, wo_b,
                ws_s_o, ws_s_a, ws_v, ws_b, ln_g, ln_b,
                s_out_ref, v_out_ref, agg,
                *, n_tile, vc, vh, se_out):
    i = pl.program_id(0)
    j = pl.program_id(1)

    @pl.when(j == 0)
    def _():
        agg[...] = jnp.zeros_like(agg)

    rec = rec_ref[...]                                                    # [1, TE] int32
    rows = i * n_tile + lax.broadcasted_iota(jnp.int32, (n_tile, 1), 0)   # [TN, 1]
    adj = (rec == rows).astype(jnp.float32)                               # [TN, TE] one-hot
    agg[...] += jnp.dot(adj, msg_ref[...], preferred_element_type=jnp.float32)

    @pl.when(j == pl.num_programs(1) - 1)
    def _():
        f_cnt = se_out + 3 * vh
        cnt = agg[:, f_cnt:f_cnt + 1]
        # rsqrt(max(cnt, 1)) guards zero-in-degree nodes (reference would NaN/Inf).
        scale = lax.rsqrt(jnp.maximum(cnt, 1.0))
        sa = agg[:, :se_out] * scale                                      # [TN, S_h]
        va = [agg[:, se_out + d * vh:se_out + (d + 1) * vh] * scale for d in range(3)]

        s_node = s_ref[...]                                               # [TN, S]
        v_node = v_ref[...]                                               # [TN, 3*Vc] xyz-major
        vl, vr, vo = [], [], []
        for d in range(3):
            vown = v_node[:, d * vc:(d + 1) * vc]
            vl.append(jnp.dot(vown, wl_o[...], preferred_element_type=jnp.float32)
                      + jnp.dot(va[d], wl_a[...], preferred_element_type=jnp.float32))
            vr.append(jnp.dot(vown, wr_o[...], preferred_element_type=jnp.float32)
                      + jnp.dot(va[d], wr_a[...], preferred_element_type=jnp.float32))
            vo.append(jnp.dot(vown, whv_o[...], preferred_element_type=jnp.float32)
                      + jnp.dot(va[d], whv_a[...], preferred_element_type=jnp.float32))
        s_partial = (jnp.dot(s_node, ws_s_o[...], preferred_element_type=jnp.float32)
                     + jnp.dot(sa, ws_s_a[...], preferred_element_type=jnp.float32))

        s_ln, vout = _gvp_tail(vl, vr, vo, s_partial, wo_w[...], wo_b[...],
                               ws_v[...], ws_b[...], ln_g[...], ln_b[...])

        s_out_ref[...] = s_ln + s_node                                    # scalar residual
        v_out_ref[...] = jnp.concatenate(                                 # vector residual
            [vout[d] + v_node[:, d * vc:(d + 1) * vc] for d in range(3)], axis=-1)


# ---------------------------------------------------------------------------
# weight preparation (plain JAX, once per call)
# ---------------------------------------------------------------------------
def _edge_weights(p):
    whv = jnp.dot(p["wh"], p["wv"])                        # [vi, vo]
    return [p["wl"], p["wr"], whv, p["wo_w"], p["wo_b"],
            p["ws_s"], p["ws_v"], p["ws_b"], p["ln_g"], p["ln_b"]]


def _node_weights(p, vc, s_dim):
    whv = jnp.dot(p["wh"], p["wv"])
    # split by input rows: [own | aggregated] so the kernel never concatenates inputs
    return [p["wl"][:vc], p["wl"][vc:], p["wr"][:vc], p["wr"][vc:],
            whv[:vc], whv[vc:], p["wo_w"], p["wo_b"],
            p["ws_s"][:s_dim], p["ws_s"][s_dim:], p["ws_v"], p["ws_b"],
            p["ln_g"], p["ln_b"]]


# ---------------------------------------------------------------------------
# wrapper
# ---------------------------------------------------------------------------
def gvp_mpnn_pallas(params, s, v, positions, edge_index, *,
                    edge_block=2048, node_block=512):
    assert edge_block % 128 == 0 and node_block % 8 == 0
    N, S = s.shape
    _, Vc, _ = v.shape
    send, rec = edge_index[0], edge_index[1]
    E = send.shape[0]

    # ---- tile sizes (edge tiles multiples of 128 so the aggregation K dim is
    #      lane/MXU aligned; node tiles multiples of 8 sublanes) ----
    e_tile = min(edge_block, _round_up(E, 128))
    E_pad = _round_up(E, e_tile)
    n_tile = min(node_block, _round_up(N, 8))
    N_pad = _round_up(N, n_tile)
    pad_e, pad_n = E_pad - E, N_pad - N

    # ---- glue: per-edge inputs.  v is flattened xyz-major ONCE per node; per-edge
    #      slabs are row gathers + lane concat (no O(E*Vc) transpose over the 3-dim) ----
    dpos = (positions[send] - positions[rec])[:, None]          # pos_i - pos_j (sender - receiver)
    s_in = jnp.concatenate([s[rec], s[send], dpos], axis=-1)    # [E, 2S+1]
    v_flat = jnp.transpose(v, (0, 2, 1)).reshape(N, 3 * Vc)     # [N, 3Vc] xyz-major
    vrec, vsend = v_flat[rec], v_flat[send]
    # component-major per-edge slab: [rec_x|send_x | rec_y|send_y | rec_z|send_z]
    v_in = jnp.concatenate(
        [jnp.concatenate([vrec[:, d * Vc:(d + 1) * Vc], vsend[:, d * Vc:(d + 1) * Vc]], -1)
         for d in range(3)], axis=-1)                           # [E, 6Vc]
    if pad_e:
        s_in = jnp.pad(s_in, ((0, pad_e), (0, 0)))
        v_in = jnp.pad(v_in, ((0, pad_e), (0, 0)))
        rec_pad = jnp.pad(rec, (0, pad_e), constant_values=-1)  # never matches a node
    else:
        rec_pad = rec
    rec2d = rec_pad.astype(jnp.int32).reshape(1, E_pad)

    ew = _edge_weights(params["edge"])
    se_out = params["edge"]["ln_g"].shape[1]
    ve_out = params["edge"]["wv"].shape[1]
    f_msg = se_out + 3 * ve_out + 1                             # [s | v_xyz | count]

    # ---- edge (message) kernel ----
    ek = functools.partial(edge_kernel, vi=2 * Vc)
    edge_vmem = _vmem_limit(e_tile * s_in.shape[1] * 4,
                            e_tile * v_in.shape[1] * 4,
                            e_tile * f_msg * 4)
    msg = pl.pallas_call(
        ek,
        grid=(E_pad // e_tile,),
        in_specs=[pl.BlockSpec((e_tile, s_in.shape[1]), lambda i: (i, 0)),
                  pl.BlockSpec((e_tile, v_in.shape[1]), lambda i: (i, 0))]
                 + [pl.BlockSpec(w.shape, lambda i: (0, 0)) for w in ew],
        out_specs=pl.BlockSpec((e_tile, f_msg), lambda i: (i, 0)),
        out_shape=jax.ShapeDtypeStruct((E_pad, f_msg), jnp.float32),
        compiler_params=pltpu.CompilerParams(
            dimension_semantics=("parallel",),
            vmem_limit_bytes=edge_vmem),
    )(s_in, v_in, *ew)

    # ---- node (aggregate + update) kernel ----
    s_node = jnp.pad(s, ((0, pad_n), (0, 0))) if pad_n else s
    v_node = jnp.pad(v_flat, ((0, pad_n), (0, 0))) if pad_n else v_flat

    nw = _node_weights(params["node"], Vc, S)
    sn_out = params["node"]["ln_g"].shape[1]
    vn_out = params["node"]["wv"].shape[1]

    nk = functools.partial(node_kernel, n_tile=n_tile, vc=Vc, vh=ve_out, se_out=se_out)
    node_vmem = _vmem_limit(e_tile * 4,                    # receiver ids
                            e_tile * f_msg * 4,            # message block
                            n_tile * S * 4, n_tile * 3 * Vc * 4,
                            n_tile * sn_out * 4, n_tile * 3 * vn_out * 4,
                            n_tile * f_msg * 4)            # accumulator
    s_out_p, v_out_p = pl.pallas_call(
        nk,
        grid=(N_pad // n_tile, E_pad // e_tile),
        in_specs=[pl.BlockSpec((1, e_tile), lambda i, j: (0, j)),
                  pl.BlockSpec((e_tile, f_msg), lambda i, j: (j, 0)),
                  pl.BlockSpec((n_tile, S), lambda i, j: (i, 0)),
                  pl.BlockSpec((n_tile, 3 * Vc), lambda i, j: (i, 0))]
                 + [pl.BlockSpec(w.shape, lambda i, j: (0, 0)) for w in nw],
        out_specs=[pl.BlockSpec((n_tile, sn_out), lambda i, j: (i, 0)),
                   pl.BlockSpec((n_tile, 3 * vn_out), lambda i, j: (i, 0))],
        out_shape=[jax.ShapeDtypeStruct((N_pad, sn_out), jnp.float32),
                   jax.ShapeDtypeStruct((N_pad, 3 * vn_out), jnp.float32)],
        scratch_shapes=[pltpu.VMEM((n_tile, f_msg), jnp.float32)],
        compiler_params=pltpu.CompilerParams(
            dimension_semantics=("parallel", "arbitrary"),
            vmem_limit_bytes=node_vmem),
    )(rec2d, msg, s_node, v_node, *nw)

    s_out = s_out_p[:N]
    v_out = jnp.transpose(v_out_p[:N].reshape(N, 3, vn_out), (0, 2, 1))   # back to [N, Vo, 3]
    return s_out, v_out


# ---------------------------------------------------------------------------
# deterministic parameter init (module __init__ shapes; weights stored [in, out])
# GVPMPNN(in_v=V, in_s=S, hidden_v=V, hidden_s=S, out_v=V, out_s=S)
# ---------------------------------------------------------------------------
def make_params(key, S, Vc):
    def gvp_params(keys, si, vi, so, vo):
        h = max(vi, vo)
        lin = lambda k, din, dout: 0.2 * jax.random.normal(k, (din, dout), jnp.float32)
        return {
            "wl": lin(keys[0], vi, h),
            "wr": lin(keys[1], vi, h),
            "wo_w": lin(keys[2], h, h),
            "wo_b": 0.1 * jax.random.normal(keys[3], (1, h), jnp.float32),
            "wh": lin(keys[4], vi, h),
            "ws_s": lin(keys[5], si, so),
            "ws_v": lin(keys[6], h, so),
            "ws_b": 0.1 * jax.random.normal(keys[7], (1, so), jnp.float32),
            "wv": lin(keys[8], h, vo),
            "ln_g": jnp.ones((1, so), jnp.float32),
            "ln_b": jnp.zeros((1, so), jnp.float32),
        }
    k_e, k_n = jax.random.split(key)
    return {
        "edge": gvp_params(jax.random.split(k_e, 9), 2 * S + 1, 2 * Vc, S, Vc),
        "node": gvp_params(jax.random.split(k_n, 9), 2 * S, 2 * Vc, S, Vc),
    }


# ---------------------------------------------------------------------------
# pure-JAX reference (mirrors the PyTorch module exactly) for validation
# ---------------------------------------------------------------------------
def gvp_mpnn_reference(params, s, v, positions, edge_index):
    def norm_no_nan(x, axis=-1, keepdims=False, eps=1e-8, sqrt=True):
        out = jnp.maximum(jnp.sum(jnp.square(x), axis=axis, keepdims=keepdims), eps)
        return jnp.sqrt(out) if sqrt else out

    def gvp_linear(p, s_in, v_in):              # v_in: [B, C, 3]
        vt = jnp.swapaxes(v_in, -1, -2)
        dot = (vt @ p["wl"] * (vt @ p["wr"])).sum(axis=1)
        vn = dot @ p["wo_w"] + p["wo_b"][0]
        s_o = s_in @ p["ws_s"] + vn @ p["ws_v"] + p["ws_b"][0]
        vo = jnp.swapaxes((vt @ p["wh"]) @ p["wv"], -1, -2)
        vo = vo * jax.nn.sigmoid(norm_no_nan(vo, axis=-1, keepdims=True))
        return jax.nn.relu(s_o), vo

    def gvp_ln(p, s_in, v_in):
        vn = norm_no_nan(v_in, axis=-1, keepdims=True, sqrt=False)
        vn = jnp.sqrt(jnp.mean(vn, axis=-2, keepdims=True))
        mu = s_in.mean(-1, keepdims=True)
        var = ((s_in - mu) ** 2).mean(-1, keepdims=True)
        return (s_in - mu) / jnp.sqrt(var + 1e-5) * p["ln_g"][0] + p["ln_b"][0], v_in / vn

    send, rec = edge_index[0], edge_index[1]
    N = s.shape[0]
    s_in = jnp.concatenate([s[rec], s[send], (positions[send] - positions[rec])[:, None]], -1)
    v_in = jnp.concatenate([v[rec], v[send]], axis=1)
    ms, mv = gvp_ln(params["edge"], *gvp_linear(params["edge"], s_in, v_in))
    counts = jax.ops.segment_sum(jnp.ones_like(rec, jnp.float32), rec, num_segments=N)[:, None]
    s_agg = jax.ops.segment_sum(ms, rec, num_segments=N) / jnp.sqrt(counts)
    v_agg = (jax.ops.segment_sum(mv.reshape(mv.shape[0], -1), rec, num_segments=N)
             / jnp.sqrt(counts)).reshape(N, -1, 3)
    in_s = jnp.concatenate([s, s_agg], -1)
    in_v = jnp.concatenate([v, v_agg], axis=1)
    os_, ov = gvp_ln(params["node"], *gvp_linear(params["node"], in_s, in_v))
    return s + os_, v + ov


if __name__ == "__main__":
    key = jax.random.PRNGKey(0)
    N, S, Vc = 8, 8, 4                                 # nodes, scalar feats, vector channels
    # each node i sends to (i+1)%N and (i+2)%N  ->  E=16, every node receives 2 messages
    send = jnp.concatenate([jnp.arange(N), jnp.arange(N)]).astype(jnp.int32)
    rec = jnp.concatenate([(jnp.arange(N) + 1) % N, (jnp.arange(N) + 2) % N]).astype(jnp.int32)
    edge_index = jnp.stack([send, rec])                # [2, 16]

    k1, k2, k3, k4 = jax.random.split(key, 4)
    s = jax.random.normal(k1, (N, S), jnp.float32)
    v = jax.random.normal(k2, (N, Vc, 3), jnp.float32)
    positions = jax.random.normal(k3, (N,), jnp.float32)
    params = make_params(k4, S, Vc)

    s_out, v_out = gvp_mpnn_pallas(params, s, v, positions, edge_index)
    jax.block_until_ready((s_out, v_out))

    s_ref, v_ref = gvp_mpnn_reference(params, s, v, positions, edge_index)
    assert s_out.shape == (N, S) and v_out.shape == (N, Vc, 3)
    assert jnp.allclose(s_out, s_ref, atol=2e-3, rtol=2e-3), "scalar output mismatch"
    assert jnp.allclose(v_out, v_ref, atol=2e-3, rtol=2e-3), "vector output mismatch"
    print("KERNEL_OK")
</pallas_src>

<mosaic_0001>
module attributes {stable_mosaic.version = 11 : i64} {
  func.func @edge_kernel(%arg0: i32, %arg1: memref<128x17xf32, #tpu.memory_space<vmem>>, %arg2: memref<128x24xf32, #tpu.memory_space<vmem>>, %arg3: memref<8x8xf32, #tpu.memory_space<vmem>>, %arg4: memref<8x8xf32, #tpu.memory_space<vmem>>, %arg5: memref<8x4xf32, #tpu.memory_space<vmem>>, %arg6: memref<8x8xf32, #tpu.memory_space<vmem>>, %arg7: memref<1x8xf32, #tpu.memory_space<vmem>>, %arg8: memref<17x8xf32, #tpu.memory_space<vmem>>, %arg9: memref<8x8xf32, #tpu.memory_space<vmem>>, %arg10: memref<1x8xf32, #tpu.memory_space<vmem>>, %arg11: memref<1x8xf32, #tpu.memory_space<vmem>>, %arg12: memref<1x8xf32, #tpu.memory_space<vmem>>, %arg13: memref<128x21xf32, #tpu.memory_space<vmem>>) attributes {dimension_semantics = [#tpu.dimension_semantics<parallel>], iteration_bounds = array<i64: 1>, scalar_prefetch = 0 : i64, scratch_operands = 0 : i64, tpu.core_type = #tpu.core_type<tc>, window_params = [{transform_indices = @transform_0, window_bounds = array<i64: 128, 17>}, {transform_indices = @transform_1, window_bounds = array<i64: 128, 24>}, {pipeline_mode = #tpu.pipeline_mode<synchronous>, transform_indices = @transform_2, window_bounds = array<i64: 8, 8>}, {pipeline_mode = #tpu.pipeline_mode<synchronous>, transform_indices = @transform_3, window_bounds = array<i64: 8, 8>}, {pipeline_mode = #tpu.pipeline_mode<synchronous>, transform_indices = @transform_4, window_bounds = array<i64: 8, 4>}, {pipeline_mode = #tpu.pipeline_mode<synchronous>, transform_indices = @transform_5, window_bounds = array<i64: 8, 8>}, {pipeline_mode = #tpu.pipeline_mode<synchronous>, transform_indices = @transform_6, window_bounds = array<i64: 1, 8>}, {pipeline_mode = #tpu.pipeline_mode<synchronous>, transform_indices = @transform_7, window_bounds = array<i64: 17, 8>}, {pipeline_mode = #tpu.pipeline_mode<synchronous>, transform_indices = @transform_8, window_bounds = array<i64: 8, 8>}, {pipeline_mode = #tpu.pipeline_mode<synchronous>, transform_indices = @transform_9, window_bounds = array<i64: 1, 8>}, {pipeline_mode = #tpu.pipeline_mode<synchronous>, transform_indices = @transform_10, window_bounds = array<i64: 1, 8>}, {pipeline_mode = #tpu.pipeline_mode<synchronous>, transform_indices = @transform_11, window_bounds = array<i64: 1, 8>}, {transform_indices = @transform_12, window_bounds = array<i64: 128, 21>}]} {
    %c0 = arith.constant 0 : index
    %c0_0 = arith.constant 0 : index
    %0 = vector.load %arg1[%c0, %c0_0] : memref<128x17xf32, #tpu.memory_space<vmem>>, vector<128x17xf32>
    %c0_1 = arith.constant 0 : index
    %c0_2 = arith.constant 0 : index
    %1 = vector.load %arg2[%c0_1, %c0_2] : memref<128x24xf32, #tpu.memory_space<vmem>>, vector<128x24xf32>
    %2 = vector.extract_strided_slice %1 {offsets = [0, 0], sizes = [128, 8], strides = [1, 1]} : vector<128x24xf32> to vector<128x8xf32>
    %c0_3 = arith.constant 0 : index
    %c0_4 = arith.constant 0 : index
    %3 = vector.load %arg3[%c0_3, %c0_4] : memref<8x8xf32, #tpu.memory_space<vmem>>, vector<8x8xf32>
    %cst = arith.constant dense<0.000000e+00> : vector<128x8xf32>
    %4 = tpu.matmul %2, %3, %cst {dimension_numbers = #tpu.dot_dimension_numbers<[1], [0], [0], [1], [0, 0, 1, 1], [], []>} : vector<128x8xf32>, vector<8x8xf32>, vector<128x8xf32> -> vector<128x8xf32>
    %c0_5 = arith.constant 0 : index
    %c0_6 = arith.constant 0 : index
    %5 = vector.load %arg4[%c0_5, %c0_6] : memref<8x8xf32, #tpu.memory_space<vmem>>, vector<8x8xf32>
    %cst_7 = arith.constant dense<0.000000e+00> : vector<128x8xf32>
    %6 = tpu.matmul %2, %5, %cst_7 {dimension_numbers = #tpu.dot_dimension_numbers<[1], [0], [0], [1], [0, 0, 1, 1], [], []>} : vector<128x8xf32>, vector<8x8xf32>, vector<128x8xf32> -> vector<128x8xf32>
    %c0_8 = arith.constant 0 : index
    %c0_9 = arith.constant 0 : index
    %7 = vector.load %arg5[%c0_8, %c0_9] : memref<8x4xf32, #tpu.memory_space<vmem>>, vector<8x4xf32>
    %cst_10 = arith.constant dense<0.000000e+00> : vector<128x4xf32>
    %8 = tpu.matmul %2, %7, %cst_10 {dimension_numbers = #tpu.dot_dimension_numbers<[1], [0], [0], [1], [0, 0, 1, 1], [], []>} : vector<128x8xf32>, vector<8x4xf32>, vector<128x4xf32> -> vector<128x4xf32>
    %9 = vector.extract_strided_slice %1 {offsets = [0, 8], sizes = [128, 8], strides = [1, 1]} : vector<128x24xf32> to vector<128x8xf32>
    %c0_11 = arith.constant 0 : index
    %c0_12 = arith.constant 0 : index
    %10 = vector.load %arg3[%c0_11, %c0_12] : memref<8x8xf32, #tpu.memory_space<vmem>>, vector<8x8xf32>
    %cst_13 = arith.constant dense<0.000000e+00> : vector<128x8xf32>
    %11 = tpu.matmul %9, %10, %cst_13 {dimension_numbers = #tpu.dot_dimension_numbers<[1], [0], [0], [1], [0, 0, 1, 1], [], []>} : vector<128x8xf32>, vector<8x8xf32>, vector<128x8xf32> -> vector<128x8xf32>
    %c0_14 = arith.constant 0 : index
    %c0_15 = arith.constant 0 : index
    %12 = vector.load %arg4[%c0_14, %c0_15] : memref<8x8xf32, #tpu.memory_space<vmem>>, vector<8x8xf32>
    %cst_16 = arith.constant dense<0.000000e+00> : vector<128x8xf32>
    %13 = tpu.matmul %9, %12, %cst_16 {dimension_numbers = #tpu.dot_dimension_numbers<[1], [0], [0], [1], [0, 0, 1, 1], [], []>} : vector<128x8xf32>, vector<8x8xf32>, vector<128x8xf32> -> vector<128x8xf32>
    %c0_17 = arith.constant 0 : index
    %c0_18 = arith.constant 0 : index
    %14 = vector.load %arg5[%c0_17, %c0_18] : memref<8x4xf32, #tpu.memory_space<vmem>>, vector<8x4xf32>
    %cst_19 = arith.constant dense<0.000000e+00> : vector<128x4xf32>
    %15 = tpu.matmul %9, %14, %cst_19 {dimension_numbers = #tpu.dot_dimension_numbers<[1], [0], [0], [1], [0, 0, 1, 1], [], []>} : vector<128x8xf32>, vector<8x4xf32>, vector<128x4xf32> -> vector<128x4xf32>
    %16 = vector.extract_strided_slice %1 {offsets = [0, 16], sizes = [128, 8], strides = [1, 1]} : vector<128x24xf32> to vector<128x8xf32>
    %c0_20 = arith.constant 0 : index
    %c0_21 = arith.constant 0 : index
    %17 = vector.load %arg3[%c0_20, %c0_21] : memref<8x8xf32, #tpu.memory_space<vmem>>, vector<8x8xf32>
    %cst_22 = arith.constant dense<0.000000e+00> : vector<128x8xf32>
    %18 = tpu.matmul %16, %17, %cst_22 {dimension_numbers = #tpu.dot_dimension_numbers<[1], [0], [0], [1], [0, 0, 1, 1], [], []>} : vector<128x8xf32>, vector<8x8xf32>, vector<128x8xf32> -> vector<128x8xf32>
    %c0_23 = arith.constant 0 : index
    %c0_24 = arith.constant 0 : index
    %19 = vector.load %arg4[%c0_23, %c0_24] : memref<8x8xf32, #tpu.memory_space<vmem>>, vector<8x8xf32>
    %cst_25 = arith.constant dense<0.000000e+00> : vector<128x8xf32>
    %20 = tpu.matmul %16, %19, %cst_25 {dimension_numbers = #tpu.dot_dimension_numbers<[1], [0], [0], [1], [0, 0, 1, 1], [], []>} : vector<128x8xf32>, vector<8x8xf32>, vector<128x8xf32> -> vector<128x8xf32>
    %c0_26 = arith.constant 0 : index
    %c0_27 = arith.constant 0 : index
    %21 = vector.load %arg5[%c0_26, %c0_27] : memref<8x4xf32, #tpu.memory_space<vmem>>, vector<8x4xf32>
    %cst_28 = arith.constant dense<0.000000e+00> : vector<128x4xf32>
    %22 = tpu.matmul %16, %21, %cst_28 {dimension_numbers = #tpu.dot_dimension_numbers<[1], [0], [0], [1], [0, 0, 1, 1], [], []>} : vector<128x8xf32>, vector<8x4xf32>, vector<128x4xf32> -> vector<128x4xf32>
    %c0_29 = arith.constant 0 : index
    %c0_30 = arith.constant 0 : index
    %23 = vector.load %arg8[%c0_29, %c0_30] : memref<17x8xf32, #tpu.memory_space<vmem>>, vector<17x8xf32>
    %cst_31 = arith.constant dense<0.000000e+00> : vector<128x8xf32>
    %24 = tpu.matmul %0, %23, %cst_31 {dimension_numbers = #tpu.dot_dimension_numbers<[1], [0], [0], [1], [0, 0, 1, 1], [], []>} : vector<128x17xf32>, vector<17x8xf32>, vector<128x8xf32> -> vector<128x8xf32>
    %c0_32 = arith.constant 0 : index
    %c0_33 = arith.constant 0 : index
    %25 = vector.load %arg6[%c0_32, %c0_33] : memref<8x8xf32, #tpu.memory_space<vmem>>, vector<8x8xf32>
    %c0_34 = arith.constant 0 : index
    %c0_35 = arith.constant 0 : index
    %26 = vector.load %arg7[%c0_34, %c0_35] : memref<1x8xf32, #tpu.memory_space<vmem>>, vector<1x8xf32>
    %c0_36 = arith.constant 0 : index
    %c0_37 = arith.constant 0 : index
    %27 = vector.load %arg9[%c0_36, %c0_37] : memref<8x8xf32, #tpu.memory_space<vmem>>, vector<8x8xf32>
    %c0_38 = arith.constant 0 : index
    %c0_39 = arith.constant 0 : index
    %28 = vector.load %arg10[%c0_38, %c0_39] : memref<1x8xf32, #tpu.memory_space<vmem>>, vector<1x8xf32>
    %c0_40 = arith.constant 0 : index
    %c0_41 = arith.constant 0 : index
    %29 = vector.load %arg11[%c0_40, %c0_41] : memref<1x8xf32, #tpu.memory_space<vmem>>, vector<1x8xf32>
    %c0_42 = arith.constant 0 : index
    %c0_43 = arith.constant 0 : index
    %30 = vector.load %arg12[%c0_42, %c0_43] : memref<1x8xf32, #tpu.memory_space<vmem>>, vector<1x8xf32>
    %31 = arith.mulf %4, %6 : vector<128x8xf32>
    %32 = arith.mulf %11, %13 : vector<128x8xf32>
    %33 = arith.addf %31, %32 : vector<128x8xf32>
    %34 = arith.mulf %18, %20 : vector<128x8xf32>
    %35 = arith.addf %33, %34 : vector<128x8xf32>
    %cst_44 = arith.constant dense<0.000000e+00> : vector<128x8xf32>
    %36 = tpu.matmul %35, %25, %cst_44 {dimension_numbers = #tpu.dot_dimension_numbers<[1], [0], [0], [1], [0, 0, 1, 1], [], []>} : vector<128x8xf32>, vector<8x8xf32>, vector<128x8xf32> -> vector<128x8xf32>
    %37 = vector.broadcast %26 : vector<1x8xf32> to vector<128x8xf32>
    %38 = arith.addf %36, %37 : vector<128x8xf32>
    %cst_45 = arith.constant dense<0.000000e+00> : vector<128x8xf32>
    %39 = tpu.matmul %38, %27, %cst_45 {dimension_numbers = #tpu.dot_dimension_numbers<[1], [0], [0], [1], [0, 0, 1, 1], [], []>} : vector<128x8xf32>, vector<8x8xf32>, vector<128x8xf32> -> vector<128x8xf32>
    %40 = arith.addf %24, %39 : vector<128x8xf32>
    %41 = vector.broadcast %28 : vector<1x8xf32> to vector<128x8xf32>
    %42 = arith.addf %40, %41 : vector<128x8xf32>
    %43 = arith.mulf %8, %8 : vector<128x4xf32>
    %44 = arith.mulf %15, %15 : vector<128x4xf32>
    %45 = arith.addf %43, %44 : vector<128x4xf32>
    %46 = arith.mulf %22, %22 : vector<128x4xf32>
    %47 = arith.addf %45, %46 : vector<128x4xf32>
    %cst_46 = arith.constant 9.99999993E-9 : f32
    %48 = vector.broadcast %cst_46 : f32 to vector<128x4xf32>
    %49 = arith.maximumf %47, %48 : vector<128x4xf32>
    %50 = math.sqrt %49 : vector<128x4xf32>
    %51 = arith.negf %50 : vector<128x4xf32>
    %52 = math.exp %51 : vector<128x4xf32>
    %cst_47 = arith.constant 1.000000e+00 : f32
    %53 = vector.broadcast %cst_47 : f32 to vector<128x4xf32>
    %54 = arith.addf %53, %52 : vector<128x4xf32>
    %55 = arith.divf %53, %54 : vector<128x4xf32>
    %56 = arith.mulf %8, %55 : vector<128x4xf32>
    %57 = arith.mulf %15, %55 : vector<128x4xf32>
    %58 = arith.mulf %22, %55 : vector<128x4xf32>
    %cst_48 = arith.constant 0.000000e+00 : f32
    %59 = vector.broadcast %cst_48 : f32 to vector<128x8xf32>
    %60 = arith.maximumf %42, %59 : vector<128x8xf32>
    %61 = arith.mulf %56, %56 : vector<128x4xf32>
    %62 = arith.mulf %57, %57 : vector<128x4xf32>
    %63 = arith.addf %61, %62 : vector<128x4xf32>
    %64 = arith.mulf %58, %58 : vector<128x4xf32>
    %65 = arith.addf %63, %64 : vector<128x4xf32>
    %cst_49 = arith.constant 9.99999993E-9 : f32
    %66 = vector.broadcast %cst_49 : f32 to vector<128x4xf32>
    %67 = arith.maximumf %65, %66 : vector<128x4xf32>
    %cst_50 = arith.constant dense<0.000000e+00> : vector<128xf32>
    %68 = vector.multi_reduction <add>, %67, %cst_50 [1] : vector<128x4xf32> to vector<128xf32>
    %69 = vector.shape_cast %68 : vector<128xf32> to vector<128x1xf32>
    %cst_51 = arith.constant 4.000000e+00 : f32
    %70 = vector.broadcast %cst_51 : f32 to vector<128x1xf32>
    %71 = arith.divf %69, %70 : vector<128x1xf32>
    %72 = math.rsqrt %71 : vector<128x1xf32>
    %73 = vector.broadcast %72 : vector<128x1xf32> to vector<128x4xf32>
    %74 = arith.mulf %56, %73 : vector<128x4xf32>
    %75 = vector.broadcast %72 : vector<128x1xf32> to vector<128x4xf32>
    %76 = arith.mulf %57, %75 : vector<128x4xf32>
    %77 = vector.broadcast %72 : vector<128x1xf32> to vector<128x4xf32>
    %78 = arith.mulf %58, %77 : vector<128x4xf32>
    %cst_52 = arith.constant dense<0.000000e+00> : vector<128xf32>
    %79 = vector.multi_reduction <add>, %60, %cst_52 [1] : vector<128x8xf32> to vector<128xf32>
    %80 = vector.shape_cast %79 : vector<128xf32> to vector<128x1xf32>
    %cst_53 = arith.constant 8.000000e+00 : f32
    %81 = vector.broadcast %cst_53 : f32 to vector<128x1xf32>
    %82 = arith.divf %80, %81 : vector<128x1xf32>
    %83 = vector.broadcast %82 : vector<128x1xf32> to vector<128x8xf32>
    %84 = arith.subf %60, %83 : vector<128x8xf32>
    %85 = arith.mulf %84, %84 : vector<128x8xf32>
    %cst_54 = arith.constant dense<0.000000e+00> : vector<128xf32>
    %86 = vector.multi_reduction <add>, %85, %cst_54 [1] : vector<128x8xf32> to vector<128xf32>
    %87 = vector.shape_cast %86 : vector<128xf32> to vector<128x1xf32>
    %cst_55 = arith.constant 8.000000e+00 : f32
    %88 = vector.broadcast %cst_55 : f32 to vector<128x1xf32>
    %89 = arith.divf %87, %88 : vector<128x1xf32>
    %90 = vector.broadcast %82 : vector<128x1xf32> to vector<128x8xf32>
    %91 = arith.subf %60, %90 : vector<128x8xf32>
    %cst_56 = arith.constant 9.99999974E-6 : f32
    %92 = vector.broadcast %cst_56 : f32 to vector<128x1xf32>
    %93 = arith.addf %89, %92 : vector<128x1xf32>
    %94 = math.rsqrt %93 : vector<128x1xf32>
    %95 = vector.broadcast %94 : vector<128x1xf32> to vector<128x8xf32>
    %96 = arith.mulf %91, %95 : vector<128x8xf32>
    %97 = vector.broadcast %29 : vector<1x8xf32> to vector<128x8xf32>
    %98 = arith.mulf %96, %97 : vector<128x8xf32>
    %99 = vector.broadcast %30 : vector<1x8xf32> to vector<128x8xf32>
    %100 = arith.addf %98, %99 : vector<128x8xf32>
    %cst_57 = arith.constant 1.000000e+00 : f32
    %101 = vector.broadcast %cst_57 : f32 to vector<128x1xf32>
    %102 = tpu.concatenate %100, %74, %76, %78, %101 in 1 : vector<128x8xf32>, vector<128x4xf32>, vector<128x4xf32>, vector<128x4xf32>, vector<128x1xf32> -> vector<128x21xf32>
    %c0_58 = arith.constant 0 : index
    %c0_59 = arith.constant 0 : index
    %103 = vector.load %arg13[%c0_58, %c0_59] : memref<128x21xf32, #tpu.memory_space<vmem>>, vector<128x21xf32>
    tpu.vector_store %arg13[%c0_58, %c0_59], %102 {strides = array<i32>} : memref<128x21xf32, #tpu.memory_space<vmem>>, vector<128x21xf32>,
    return
  }
  func.func @transform_0(%arg0: i32) -> (i32, i32) {
    %c0_i32 = arith.constant 0 : i32
    %c0_i32_0 = arith.constant 0 : i32
    return %arg0, %c0_i32 : i32, i32
  }
  func.func @transform_1(%arg0: i32) -> (i32, i32) {
    %c0_i32 = arith.constant 0 : i32
    %c0_i32_0 = arith.constant 0 : i32
    return %arg0, %c0_i32 : i32, i32
  }
  func.func @transform_2(%arg0: i32) -> (i32, i32) {
    %c0_i32 = arith.constant 0 : i32
    %c0_i32_0 = arith.constant 0 : i32
    %c0_i32_1 = arith.constant 0 : i32
    return %c0_i32, %c0_i32_0 : i32, i32
  }
  func.func @transform_3(%arg0: i32) -> (i32, i32) {
    %c0_i32 = arith.constant 0 : i32
    %c0_i32_0 = arith.constant 0 : i32
    %c0_i32_1 = arith.constant 0 : i32
    return %c0_i32, %c0_i32_0 : i32, i32
  }
  func.func @transform_4(%arg0: i32) -> (i32, i32) {
    %c0_i32 = arith.constant 0 : i32
    %c0_i32_0 = arith.constant 0 : i32
    %c0_i32_1 = arith.constant 0 : i32
    return %c0_i32, %c0_i32_0 : i32, i32
  }
  func.func @transform_5(%arg0: i32) -> (i32, i32) {
    %c0_i32 = arith.constant 0 : i32
    %c0_i32_0 = arith.constant 0 : i32
    %c0_i32_1 = arith.constant 0 : i32
    return %c0_i32, %c0_i32_0 : i32, i32
  }
  func.func @transform_6(%arg0: i32) -> (i32, i32) {
    %c0_i32 = arith.constant 0 : i32
    %c0_i32_0 = arith.constant 0 : i32
    %c0_i32_1 = arith.constant 0 : i32
    return %c0_i32, %c0_i32_0 : i32, i32
  }
  func.func @transform_7(%arg0: i32) -> (i32, i32) {
    %c0_i32 = arith.constant 0 : i32
    %c0_i32_0 = arith.constant 0 : i32
    %c0_i32_1 = arith.constant 0 : i32
    return %c0_i32, %c0_i32_0 : i32, i32
  }
  func.func @transform_8(%arg0: i32) -> (i32, i32) {
    %c0_i32 = arith.constant 0 : i32
    %c0_i32_0 = arith.constant 0 : i32
    %c0_i32_1 = arith.constant 0 : i32
    return %c0_i32, %c0_i32_0 : i32, i32
  }
  func.func @transform_9(%arg0: i32) -> (i32, i32) {
    %c0_i32 = arith.constant 0 : i32
    %c0_i32_0 = arith.constant 0 : i32
    %c0_i32_1 = arith.constant 0 : i32
    return %c0_i32, %c0_i32_0 : i32, i32
  }
  func.func @transform_10(%arg0: i32) -> (i32, i32) {
    %c0_i32 = arith.constant 0 : i32
    %c0_i32_0 = arith.constant 0 : i32
    %c0_i32_1 = arith.constant 0 : i32
    return %c0_i32, %c0_i32_0 : i32, i32
  }
  func.func @transform_11(%arg0: i32) -> (i32, i32) {
    %c0_i32 = arith.constant 0 : i32
    %c0_i32_0 = arith.constant 0 : i32
    %c0_i32_1 = arith.constant 0 : i32
    return %c0_i32, %c0_i32_0 : i32, i32
  }
  func.func @transform_12(%arg0: i32) -> (i32, i32) {
    %c0_i32 = arith.constant 0 : i32
    %c0_i32_0 = arith.constant 0 : i32
    return %arg0, %c0_i32 : i32, i32
  }
}

</mosaic_0001>

<bundles_post_ra>
// kernel: tpu_custom_call.1
= control target key start
LH: loop header
LB: loop body
LE: loop exit
PB: predicated region body
PF: predicated region fallthrough
CT: control target
= control target key end

     0   :  { %vm74_vm0 = vcmask 64512   ;;  %s3386_s29 = smov 120   ;;  %s3387_s17 = smov 112   ;;  %s6086_s2 = inlined_call_operand.vmem [shape: f32[8,8], index: 2, kind: input, shape index: {}]   ;;  %s6087_s3 = inlined_call_operand.vmem [shape: f32[8,8], index: 3, kind: input, shape index: {}]   ;;  %s6088_s1 = inlined_call_operand.vmem [shape: f32[128,24], index: 1, kind: input, shape index: {}]   ;;  %s6089_s4 = inlined_call_operand.vmem [shape: f32[8,4], index: 4, kind: input, shape index: {}]   ;;  %s6090_s5 = inlined_call_operand.vmem [shape: f32[8,8], index: 5, kind: input, shape index: {}]   ;;  %s6091_s6 = inlined_call_operand.vmem [shape: f32[1,8], index: 6, kind: input, shape index: {}]   ;;  %s6092_s8 = inlined_call_operand.vmem [shape: f32[8,8], index: 8, kind: input, shape index: {}]   ;;  %s6093_s7 = inlined_call_operand.vmem [shape: f32[17,8], index: 7, kind: input, shape index: {}]   ;;  %s6094_s0 = inlined_call_operand.vmem [shape: f32[128,17], index: 0, kind: input, shape index: {}]   ;;  %s6095_s9 = inlined_call_operand.vmem [shape: f32[1,8], index: 9, kind: input, shape index: {}]   ;;  %s6096_s10 = inlined_call_operand.vmem [shape: f32[1,8], index: 10, kind: input, shape index: {}]   ;;  %s6097_s11 = inlined_call_operand.vmem [shape: f32[1,8], index: 11, kind: input, shape index: {}]   ;;  %s6098_s12 = inlined_call_operand.vmem [shape: f32[128,21], index: 12, kind: output, shape index: {}]  }
   0x1   :  { %v3461_v0 = vld [vmem:[%s6086_s2] sm:$0xff]  ;;  %v3475_v3 = vld [vmem:[%s6088_s1 + $0x10] sm:$0xff]  ;;  %v58_v5 = vld [vmem:[%s6088_s1 + $0x8] sm:$0xff]  ;;  %s3389_s22 = smov 16   ;;  %s3390_s23 = smov 12  }
   0x2   :  { %v188_v1 = vld [vmem:[%s6087_s3] sm:$0xff]  ;;  %138 = vmatpush.msra.mxu0 %v3461_v0  ;;  %324 = vrot.lane.b32.xlu1 %v3475_v3, %s3386_s29  ;;  %v3499_v6 = vld [vmem:[%s6088_s1 + $0x18] sm:$0xff]  ;;  %v3507_v7 = vld [vmem:[%s6088_s1 + $0x28] sm:$0xff]  ;;  %s3391_s25 = smov 8  }
   0x3   :  { %v3469_v2 = vld [vmem:[%s6088_s1] sm:$0xff]  ;;  %204 = vmatpush.msra.mxu1 %v188_v1  ;;  %399 = vmatpush.msra.mxu3 %v3461_v0  ;;  %v3516_v8 = vld [vmem:[%s6088_s1 + $0x30] sm:$0xff]  ;;  %v3527_v9 = vld [vmem:[%s6088_s1 + $0x38] sm:$0xff] }
   0x4   :  { %320 = vrot.lane.b32.xlu0 %v3469_v2, %s3386_s29  ;;  %3002 = vmatmul.msk.f32.vlgmr.msra.gmra.mxu0 %vm74_vm0, %v3469_v2  ;;  %v3486_v4 = vld [vmem:[%s6088_s1 + $0x20] sm:$0xff]  ;;  %v3549_v11 = vld [vmem:[%s6088_s1 + $0x48] sm:$0xff]  ;;  %v3560_v12 = vld [vmem:[%s6088_s1 + $0x50] sm:$0xff] }
   0x5   :  { %3018 = vmatmul.msk.f32.vlgmr.msra.gmra.mxu1 %vm74_vm0, %v3469_v2  ;;  %464 = vmatpush.msrb.mxu0 %v188_v1  ;;  %v3538_v10 = vld [vmem:[%s6088_s1 + $0x40] sm:$0xff]  ;;  %v3571_v13 = vld [vmem:[%s6088_s1 + $0x58] sm:$0xff]  ;;  %v3593_v15 = vld [vmem:[%s6088_s1 + $0x68] sm:$0xff] }
   0x6   :  { %328 = vrot.lane.b32.xlu2 %v3486_v4, %s3386_s29  ;;  %723 = vmatpush.msrb.mxu3 %v188_v1  ;;  %v3582_v14 = vld [vmem:[%s6088_s1 + $0x60] sm:$0xff]  ;;  %v3604_v16 = vld [vmem:[%s6088_s1 + $0x70] sm:$0xff]  ;;  %v3622_v18 = vld [vmem:[%s6088_s1 + $0x78] sm:$0xff] }
   0x7   :  { %v254_v17 = vld [vmem:[%s6089_s4] sm:$0xff] }
   0x8   :  { %270 = vmatpush.msra.mxu2 %v254_v17  ;;  %529 = vmatpush.msrb.mxu1 %v254_v17 }
   0x9   :  { %3034 = vmatmul.msk.f32.vlgmr.msra.gmra.mxu2 %vm74_vm0, %v3469_v2  ;;  %788 = vmatpush.msra.mxu0 %v254_v17 }
   0xa   :  { %326 = vrot.lane.b32.xlu1 %v3499_v6, %s3386_s29  ;;  %658 = vmatpush.msrb.mxu2 %v3461_v0 }
   0xc   :  { %322 = vrot.lane.b32.xlu0 %v58_v5, %s3386_s29  ;;  %3003 = vmatmul.msk.f32.gmra.mxu0 %vm74_vm0, %v58_v5 }
   0xd   :  { %3019 = vmatmul.msk.f32.gmra.mxu1 %vm74_vm0, %v58_v5 }
   0xe   :  { %330 = vrot.lane.b32.xlu2 %v3507_v7, %s3386_s29 }
  0x11   :  { %3035 = vmatmul.msk.f32.gmra.mxu2 %vm74_vm0, %v58_v5 }
  0x12   :  { %334 = vrot.lane.b32.xlu1 %v3527_v9, %s3386_s29 }
  0x14   :  { %3004 = vmatmul.msk.f32.gmra.mxu0 %vm74_vm0, %v3475_v3  ;;  %332 = vrot.lane.b32.xlu0 %v3516_v8, %s3386_s29 }
  0x15   :  { %3020 = vmatmul.msk.f32.gmra.mxu1 %vm74_vm0, %v3475_v3 }
  0x16   :  { %336 = vrot.lane.b32.xlu2 %v3538_v10, %s3386_s29 }
  0x19   :  { %3036 = vmatmul.msk.f32.gmra.mxu2 %vm74_vm0, %v3475_v3 }
  0x1a   :  { %340 = vrot.lane.b32.xlu1 %v3560_v12, %s3386_s29 }
  0x1c   :  { %3005 = vmatmul.msk.f32.gmra.mxu0 %vm74_vm0, %v3499_v6  ;;  %338 = vrot.lane.b32.xlu0 %v3549_v11, %s3386_s29 }
  0x1d   :  { %3021 = vmatmul.msk.f32.gmra.mxu1 %vm74_vm0, %v3499_v6 }
  0x1e   :  { %342 = vrot.lane.b32.xlu2 %v3571_v13, %s3386_s29 }
  0x21   :  { %3037 = vmatmul.msk.f32.gmra.mxu2 %vm74_vm0, %v3499_v6 }
  0x22   :  { %346 = vrot.lane.b32.xlu1 %v3593_v15, %s3386_s29 }
  0x24   :  { %3006 = vmatmul.msk.f32.gmra.mxu0 %vm74_vm0, %v3486_v4  ;;  %344 = vrot.lane.b32.xlu0 %v3582_v14, %s3386_s29 }
  0x25   :  { %3022 = vmatmul.msk.f32.gmra.mxu1 %vm74_vm0, %v3486_v4 }
  0x26   :  { %348 = vrot.lane.b32.xlu2 %v3604_v16, %s3386_s29 }
  0x29   :  { %3038 = vmatmul.msk.f32.gmra.mxu2 %vm74_vm0, %v3486_v4 }
  0x2a   :  { %579 = vrot.lane.b32.xlu1 %v3469_v2, %s3387_s17 }
  0x2c   :  { %3007 = vmatmul.msk.f32.gmra.mxu0 %vm74_vm0, %v3507_v7  ;;  %350 = vrot.lane.b32.xlu0 %v3622_v18, %s3386_s29 }
  0x2d   :  { %3023 = vmatmul.msk.f32.gmra.mxu1 %vm74_vm0, %v3507_v7 }
  0x2e   :  { %581 = vrot.lane.b32.xlu2 %v58_v5, %s3387_s17 }
  0x31   :  { %3039 = vmatmul.msk.f32.gmra.mxu2 %vm74_vm0, %v3507_v7 }
  0x32   :  { %585 = vrot.lane.b32.xlu1 %v3499_v6, %s3387_s17 }
  0x34   :  { %3008 = vmatmul.msk.f32.gmra.mxu0 %vm74_vm0, %v3516_v8  ;;  %583 = vrot.lane.b32.xlu0 %v3475_v3, %s3387_s17 }
  0x35   :  { %3024 = vmatmul.msk.f32.gmra.mxu1 %vm74_vm0, %v3516_v8 }
  0x36   :  { %587 = vrot.lane.b32.xlu2 %v3486_v4, %s3387_s17 }
  0x39   :  { %3040 = vmatmul.msk.f32.gmra.mxu2 %vm74_vm0, %v3516_v8 }
  0x3a   :  { %591 = vrot.lane.b32.xlu1 %v3516_v8, %s3387_s17 }
  0x3c   :  { %3009 = vmatmul.msk.f32.gmra.mxu0 %vm74_vm0, %v3527_v9  ;;  %589 = vrot.lane.b32.xlu0 %v3507_v7, %s3387_s17 }
  0x3d   :  { %3025 = vmatmul.msk.f32.gmra.mxu1 %vm74_vm0, %v3527_v9 }
  0x3e   :  { %593 = vrot.lane.b32.xlu2 %v3527_v9, %s3387_s17 }
  0x41   :  { %3041 = vmatmul.msk.f32.gmra.mxu2 %vm74_vm0, %v3527_v9 }
  0x42   :  { %597 = vrot.lane.b32.xlu1 %v3549_v11, %s3387_s17 }
  0x44   :  { %3010 = vmatmul.msk.f32.gmra.mxu0 %vm74_vm0, %v3538_v10  ;;  %595 = vrot.lane.b32.xlu0 %v3538_v10, %s3387_s17 }
  0x45   :  { %3026 = vmatmul.msk.f32.gmra.mxu1 %vm74_vm0, %v3538_v10 }
  0x46   :  { %599 = vrot.lane.b32.xlu2 %v3560_v12, %s3387_s17 }
  0x49   :  { %3042 = vmatmul.msk.f32.gmra.mxu2 %vm74_vm0, %v3538_v10 }
  0x4a   :  { %603 = vrot.lane.b32.xlu1 %v3582_v14, %s3387_s17 }
  0x4c   :  { %3011 = vmatmul.msk.f32.gmra.mxu0 %vm74_vm0, %v3549_v11  ;;  %601 = vrot.lane.b32.xlu0 %v3571_v13, %s3387_s17 }
  0x4d   :  { %3027 = vmatmul.msk.f32.gmra.mxu1 %vm74_vm0, %v3549_v11 }
  0x4e   :  { %605 = vrot.lane.b32.xlu2 %v3593_v15, %s3387_s17 }
  0x51   :  { %3043 = vmatmul.msk.f32.gmra.mxu2 %vm74_vm0, %v3549_v11 }
  0x52   :  { %609 = vrot.lane.b32.xlu1 %v3622_v18, %s3387_s17 }
  0x54   :  { %3012 = vmatmul.msk.f32.gmra.mxu0 %vm74_vm0, %v3560_v12  ;;  %607 = vrot.lane.b32.xlu0 %v3604_v16, %s3387_s17 }
  0x55   :  { %3028 = vmatmul.msk.f32.gmra.mxu1 %vm74_vm0, %v3560_v12 }
  0x59   :  { %3044 = vmatmul.msk.f32.gmra.mxu2 %vm74_vm0, %v3560_v12 }
  0x5c   :  { %3013 = vmatmul.msk.f32.gmra.mxu0 %vm74_vm0, %v3571_v13 }
  0x5d   :  { %3029 = vmatmul.msk.f32.gmra.mxu1 %vm74_vm0, %v3571_v13 }
  0x60   :  { %v329_v29 = vpop.permute.xlu2 %328 }
  0x61   :  { %3045 = vmatmul.msk.f32.gmra.mxu2 %vm74_vm0, %v3571_v13 }
  0x64   :  { %3014 = vmatmul.msk.f32.gmra.mxu0 %vm74_vm0, %v3582_v14 }
  0x65   :  { %3030 = vmatmul.msk.f32.gmra.mxu1 %vm74_vm0, %v3582_v14 }
  0x68   :  { %v331_v32 = vpop.permute.xlu2 %330 }
  0x69   :  { %3046 = vmatmul.msk.f32.gmra.mxu2 %vm74_vm0, %v3582_v14 }
  0x6c   :  { %3015 = vmatmul.msk.f32.gmra.mxu0 %vm74_vm0, %v3593_v15 }
  0x6d   :  { %3031 = vmatmul.msk.f32.gmra.mxu1 %vm74_vm0, %v3593_v15 }
  0x70   :  { %v337_v40 = vpop.permute.xlu2 %336 }
  0x71   :  { %3047 = vmatmul.msk.f32.gmra.mxu2 %vm74_vm0, %v3593_v15 }
  0x74   :  { %3016 = vmatmul.msk.f32.gmra.mxu0 %vm74_vm0, %v3604_v16  ;;  %v325_v23 = vpop.permute.xlu1 %324 }
  0x75   :  { %3032 = vmatmul.msk.f32.gmra.mxu1 %vm74_vm0, %v3604_v16 }
  0x76   :  { %v321_v19 = vpop.permute.xlu0 %320 }
  0x77   :  { %3050 = vmatmul.msk.f32.vlgmr.msra.gmra.mxu3 %vm74_vm0, %v321_v19 }
  0x78   :  { %v343_v49 = vpop.permute.xlu2 %342 }
  0x79   :  { %3048 = vmatmul.msk.f32.gmra.mxu2 %vm74_vm0, %v3604_v16  ;;  %v841_v16 = vld [vmem:[%s6090_s5] sm:$0xff] }
  0x7a   :  { %993 = vmatpush.msra.mxu1 %v841_v16 }
  0x7c   :  { %3017 = vmatmul.msk.f32.gmra.mxu0 %vm74_vm0, %v3622_v18  ;;  %v327_v26 = vpop.permute.xlu1 %326 }
  0x7d   :  { %3033 = vmatmul.msk.f32.gmra.mxu1 %vm74_vm0, %v3622_v18 }
  0x7e   :  { %v323_v20 = vpop.permute.xlu0 %322 }
  0x7f   :  { %3051 = vmatmul.msk.f32.gmra.mxu3 %vm74_vm0, %v323_v20 }
  0x80   :  { %v349_v53 = vpop.permute.xlu2 %348 }
  0x81   :  { %v3687_v21 = vpop.f32.mrf.mxu0  ;;  %3049 = vmatmul.msk.f32.gmra.mxu2 %vm74_vm0, %v3622_v18 }
  0x82   :  { %v3689_v22 = vpop.f32.mrf.mxu1 }
  0x84   :  { %3066 = vmatmul.msk.f32.vlgmr.msrb.gmra.mxu0 %vm74_vm0, %v321_v19  ;;  %v335_v37 = vpop.permute.xlu1 %334 }
  0x85   :  { %3082 = vmatmul.msk.f32.vlgmr.msrb.gmra.mxu1 %vm74_vm0, %v321_v19 }
  0x86   :  { %v333_v35 = vpop.permute.xlu0 %332 }
  0x87   :  { %3052 = vmatmul.msk.f32.gmra.mxu3 %vm74_vm0, %v325_v23 }
  0x88   :  { %v582_v59 = vpop.permute.xlu2 %581 }
  0x89   :  { %v3696_v24 = vpop.f32.mrf.mxu0 }
  0x8a   :  { %v3698_v25 = vpop.f32.mrf.mxu1 }
  0x8c   :  { %3067 = vmatmul.msk.f32.gmra.mxu0 %vm74_vm0, %v323_v20  ;;  %v341_v46 = vpop.permute.xlu1 %340  ;;  %v3785_v57 = vpop.f32.mrf.mxu2 }
  0x8d   :  { %3083 = vmatmul.msk.f32.gmra.mxu1 %vm74_vm0, %v323_v20 }
  0x8e   :  { %v339_v43 = vpop.permute.xlu0 %338 }
  0x8f   :  { %3053 = vmatmul.msk.f32.gmra.mxu3 %vm74_vm0, %v327_v26 }
  0x90   :  { %v588_v7 = vpop.permute.xlu2 %587 }
  0x91   :  { %v3705_v27 = vpop.f32.mrf.mxu0 }
  0x92   :  { %v3707_v28 = vpop.f32.mrf.mxu1 }
  0x94   :  { %3068 = vmatmul.msk.f32.gmra.mxu0 %vm74_vm0, %v325_v23  ;;  %v347_v50 = vpop.permute.xlu1 %346  ;;  %v3795_v62 = vpop.f32.mrf.mxu2 }
  0x95   :  { %3084 = vmatmul.msk.f32.gmra.mxu1 %vm74_vm0, %v325_v23 }
  0x96   :  { %v345_v52 = vpop.permute.xlu0 %344 }
  0x97   :  { %3054 = vmatmul.msk.f32.gmra.mxu3 %vm74_vm0, %v329_v29 }
  0x99   :  { %v3714_v30 = vpop.f32.mrf.mxu0 }
  0x9a   :  { %v3716_v31 = vpop.f32.mrf.mxu1 }
  0x9c   :  { %3069 = vmatmul.msk.f32.gmra.mxu0 %vm74_vm0, %v327_v26  ;;  %v580_v54 = vpop.permute.xlu1 %579  ;;  %v3805_v2 = vpop.f32.mrf.mxu2 }
  0x9d   :  { %3085 = vmatmul.msk.f32.gmra.mxu1 %vm74_vm0, %v327_v26  ;;  %3098 = vmatmul.msk.f32.vlgmr.msrb.gmra.mxu2 %vm74_vm0, %v580_v54  ;;  %v594_v26 = vpop.permute.xlu2 %593 }
  0x9e   :  { %v351_v58 = vpop.permute.xlu0 %350 }
  0x9f   :  { %3055 = vmatmul.msk.f32.gmra.mxu3 %vm74_vm0, %v331_v32 }
  0xa1   :  { %v3723_v33 = vpop.f32.mrf.mxu0 }
  0xa2   :  { %v3725_v34 = vpop.f32.mrf.mxu1 }
  0xa4   :  { %3070 = vmatmul.msk.f32.gmra.mxu0 %vm74_vm0, %v329_v29  ;;  %v586_v3 = vpop.permute.xlu1 %585  ;;  %v3813_v5 = vpop.f32.mrf.mxu2 }
  0xa5   :  { %3086 = vmatmul.msk.f32.gmra.mxu1 %vm74_vm0, %v329_v29  ;;  %3099 = vmatmul.msk.f32.gmra.mxu2 %vm74_vm0, %v582_v59 }
  0xa6   :  { %v584_v63 = vpop.permute.xlu0 %583 }
  0xa7   :  { %3056 = vmatmul.msk.f32.gmra.mxu3 %vm74_vm0, %v333_v35 }
  0xa9   :  { %v3732_v36 = vpop.f32.mrf.mxu0 }
  0xaa   :  { %v3736_v38 = vpop.f32.mrf.mxu1 }
  0xac   :  { %3071 = vmatmul.msk.f32.gmra.mxu0 %vm74_vm0, %v331_v32  ;;  %v3825_v10 = vpop.f32.mrf.mxu2  ;;  %v592_v17 = vpop.permute.xlu1 %591 }
  0xad   :  { %3087 = vmatmul.msk.f32.gmra.mxu1 %vm74_vm0, %v331_v32  ;;  %3100 = vmatmul.msk.f32.gmra.mxu2 %vm74_vm0, %v584_v63  ;;  %6151 = vst [vmem:[#allocation2_spill] sm:$0xff] %v3825_v10 }
  0xae   :  { %v590_v11 = vpop.permute.xlu0 %589 }
  0xaf   :  { %3057 = vmatmul.msk.f32.gmra.mxu3 %vm74_vm0, %v335_v37 }
  0xb1   :  { %v3741_v39 = vpop.f32.mrf.mxu0 }
  0xb2   :  { %v3748_v41 = vpop.f32.mrf.mxu1 }
  0xb4   :  { %3072 = vmatmul.msk.f32.gmra.mxu0 %vm74_vm0, %v333_v35  ;;  %v3837_v15 = vpop.f32.mrf.mxu2 }
  0xb5   :  { %3088 = vmatmul.msk.f32.gmra.mxu1 %vm74_vm0, %v333_v35  ;;  %3101 = vmatmul.msk.f32.gmra.mxu2 %vm74_vm0, %v586_v3  ;;  %6152 = vst [vmem:[#allocation3_spill] sm:$0xff] %v3837_v15 }
  0xb7   :  { %3058 = vmatmul.msk.f32.gmra.mxu3 %vm74_vm0, %v337_v40 }
  0xb9   :  { %v3750_v42 = vpop.f32.mrf.mxu0 }
  0xba   :  { %v3759_v45 = vpop.f32.mrf.mxu1 }
  0xbc   :  { %3073 = vmatmul.msk.f32.gmra.mxu0 %vm74_vm0, %v335_v37  ;;  %v3851_v23 = vpop.f32.mrf.mxu2 }
  0xbd   :  { %3089 = vmatmul.msk.f32.gmra.mxu1 %vm74_vm0, %v335_v37  ;;  %3102 = vmatmul.msk.f32.gmra.mxu2 %vm74_vm0, %v588_v7  ;;  %6153 = vst [vmem:[#allocation4_spill] sm:$0xff] %v3851_v23 }
  0xbf   :  { %3059 = vmatmul.msk.f32.gmra.mxu3 %vm74_vm0, %v339_v43 }
  0xc1   :  { %v3757_v44 = vpop.f32.mrf.mxu0 }
  0xc2   :  { %v3768_v48 = vpop.f32.mrf.mxu1 }
  0xc4   :  { %3074 = vmatmul.msk.f32.gmra.mxu0 %vm74_vm0, %v337_v40  ;;  %v3862_v37 = vpop.f32.mrf.mxu2 }
  0xc5   :  { %3090 = vmatmul.msk.f32.gmra.mxu1 %vm74_vm0, %v337_v40  ;;  %3103 = vmatmul.msk.f32.gmra.mxu2 %vm74_vm0, %v590_v11  ;;  %6154 = vst [vmem:[#allocation5_spill] sm:$0xff] %v3862_v37  ;;  %v596_v40 = vpop.permute.xlu0 %595 }
  0xc7   :  { %3060 = vmatmul.msk.f32.gmra.mxu3 %vm74_vm0, %v341_v46 }
  0xc9   :  { %v3766_v47 = vpop.f32.mrf.mxu0 }
  0xca   :  { %v3779_v55 = vpop.f32.mrf.mxu1 }
  0xcc   :  { %3075 = vmatmul.msk.f32.gmra.mxu0 %vm74_vm0, %v339_v43 }
  0xcd   :  { %3091 = vmatmul.msk.f32.gmra.mxu1 %vm74_vm0, %v339_v43  ;;  %3104 = vmatmul.msk.f32.gmra.mxu2 %vm74_vm0, %v592_v17  ;;  %v602_v37 = vpop.permute.xlu0 %601 }
  0xcf   :  { %3061 = vmatmul.msk.f32.gmra.mxu3 %vm74_vm0, %v343_v49 }
  0xd1   :  { %v3775_v51 = vpop.f32.mrf.mxu0 }
  0xd2   :  { %v3791_v60 = vpop.f32.mrf.mxu1 }
  0xd4   :  { %3076 = vmatmul.msk.f32.gmra.mxu0 %vm74_vm0, %v341_v46 }
  0xd5   :  { %3092 = vmatmul.msk.f32.gmra.mxu1 %vm74_vm0, %v341_v46  ;;  %3105 = vmatmul.msk.f32.gmra.mxu2 %vm74_vm0, %v594_v26 }
  0xd7   :  { %3062 = vmatmul.msk.f32.gmra.mxu3 %vm74_vm0, %v345_v52 }
  0xd9   :  { %v3783_v56 = vpop.f32.mrf.mxu0 }
  0xda   :  { %v3803_v1 = vpop.f32.mrf.mxu1 }
  0xdc   :  { %3077 = vmatmul.msk.f32.gmra.mxu0 %vm74_vm0, %v343_v49 }
  0xdd   :  { %3093 = vmatmul.msk.f32.gmra.mxu1 %vm74_vm0, %v343_v49  ;;  %3106 = vmatmul.msk.f32.gmra.mxu2 %vm74_vm0, %v596_v40  ;;  %v3871_v49 = vpop.f32.mrf.mxu2 }
  0xde   :  { %6155 = vst [vmem:[#allocation6_spill] sm:$0xff] %v3871_v49 }
  0xdf   :  { %3063 = vmatmul.msk.f32.gmra.mxu3 %vm74_vm0, %v347_v50 }
  0xe1   :  { %v3793_v61 = vpop.f32.mrf.mxu0 }
  0xe2   :  { %v3815_v6 = vpop.f32.mrf.mxu1 }
  0xe4   :  { %3078 = vmatmul.msk.f32.gmra.mxu0 %vm74_vm0, %v345_v52 }
  0xe5   :  { %3094 = vmatmul.msk.f32.gmra.mxu1 %vm74_vm0, %v345_v52  ;;  %v598_v52 = vpop.permute.xlu1 %597 }
  0xe6   :  { %3107 = vmatmul.msk.f32.gmra.mxu2 %vm74_vm0, %v598_v52 }
  0xe7   :  { %3064 = vmatmul.msk.f32.gmra.mxu3 %vm74_vm0, %v349_v53 }
  0xe9   :  { %v3801_v0 = vpop.f32.mrf.mxu0 }
  0xea   :  { %v3829_v12 = vpop.f32.mrf.mxu1 }
  0xec   :  { %3079 = vmatmul.msk.f32.gmra.mxu0 %vm74_vm0, %v347_v50 }
  0xed   :  { %3095 = vmatmul.msk.f32.gmra.mxu1 %vm74_vm0, %v347_v50 }
  0xef   :  { %3065 = vmatmul.msk.f32.gmra.mxu3 %vm74_vm0, %v351_v58 }
  0xf1   :  { %v3811_v4 = vpop.f32.mrf.mxu0 }
  0xf2   :  { %v3845_v18 = vpop.f32.mrf.mxu1 }
  0xf4   :  { %3080 = vmatmul.msk.f32.gmra.mxu0 %vm74_vm0, %v349_v53 }
  0xf5   :  { %3096 = vmatmul.msk.f32.gmra.mxu1 %vm74_vm0, %v349_v53 }
  0xf7   :  { %3114 = vmatmul.msk.f32.vlgmr.msrb.gmra.mxu3 %vm74_vm0, %v580_v54 }
  0xf9   :  { %v3821_v8 = vpop.f32.mrf.mxu0 }
  0xfa   :  { %v3823_v9 = vpop.f32.mrf.mxu3  ;;  %v3858_v32 = vpop.f32.mrf.mxu1 }
  0xfc   :  { %3081 = vmatmul.msk.f32.gmra.mxu0 %vm74_vm0, %v351_v58 }
  0xfd   :  { %3097 = vmatmul.msk.f32.gmra.mxu1 %vm74_vm0, %v351_v58  ;;  %v3882_v58 = vpop.f32.mrf.mxu2 }
  0xfe   :  { %6157 = vst [vmem:[#allocation8_spill] sm:$0xff] %v3882_v58 }
  0xff   :  { %3115 = vmatmul.msk.f32.gmra.mxu3 %vm74_vm0, %v582_v59 }
 0x101   :  { %v3833_v13 = vpop.f32.mrf.mxu0 }
 0x102   :  { %v3835_v14 = vpop.f32.mrf.mxu3  ;;  %v3873_v50 = vpop.f32.mrf.mxu1 }
 0x104   :  { %3130 = vmatmul.msk.f32.vlgmr.msra.gmra.mxu0 %vm74_vm0, %v580_v54 }
 0x105   :  { %v3894_v49 = vpop.f32.mrf.mxu2 }
 0x106   :  { %6160 = vst [vmem:[#allocation11_spill] sm:$0xff] %v3894_v49 }
 0x107   :  { %3116 = vmatmul.msk.f32.gmra.mxu3 %vm74_vm0, %v584_v63 }
 0x109   :  { %v3847_v19 = vpop.f32.mrf.mxu0 }
 0x10a   :  { %v3849_v20 = vpop.f32.mrf.mxu3 }
 0x10c   :  { %3131 = vmatmul.msk.f32.gmra.mxu0 %vm74_vm0, %v582_v59  ;;  %v600_v59 = vpop.permute.xlu2 %599 }
 0x10d   :  { %3108 = vmatmul.msk.f32.gmra.mxu2 %vm74_vm0, %v600_v59 }
 0x10f   :  { %3117 = vmatmul.msk.f32.gmra.mxu3 %vm74_vm0, %v586_v3 }
 0x111   :  { %v3856_v29 = vpop.f32.mrf.mxu0 }
 0x112   :  { %v3860_v35 = vpop.f32.mrf.mxu3 }
 0x114   :  { %3132 = vmatmul.msk.f32.gmra.mxu0 %vm74_vm0, %v584_v63  ;;  %v3885_v63 = vpop.f32.mrf.mxu1 }
 0x115   :  { %3109 = vmatmul.msk.f32.gmra.mxu2 %vm74_vm0, %v602_v37 }
 0x117   :  { %3118 = vmatmul.msk.f32.gmra.mxu3 %vm74_vm0, %v588_v7 }
 0x119   :  { %v3867_v43 = vpop.f32.mrf.mxu0 }
 0x11a   :  { %v3869_v46 = vpop.f32.mrf.mxu3 }
 0x11c   :  { %3133 = vmatmul.msk.f32.gmra.mxu0 %vm74_vm0, %v586_v3 }
 0x11f   :  { %3119 = vmatmul.msk.f32.gmra.mxu3 %vm74_vm0, %v590_v11 }
 0x121   :  { %v3878_v53 = vpop.f32.mrf.mxu0 }
 0x122   :  { %v3880_v54 = vpop.f32.mrf.mxu3 }
 0x123   :  { %6156 = vst [vmem:[#allocation7_spill] sm:$0xff] %v3880_v54  ;;  %v3905_v54 = vpop.f32.mrf.mxu2 }
 0x124   :  { %3134 = vmatmul.msk.f32.gmra.mxu0 %vm74_vm0, %v588_v7  ;;  %v3898_v7 = vpop.f32.mrf.mxu1  ;;  %6163 = vst [vmem:[#allocation14_spill] sm:$0xff] %v3905_v54 }
 0x127   :  { %3120 = vmatmul.msk.f32.gmra.mxu3 %vm74_vm0, %v592_v17 }
 0x129   :  { %v3889_v3 = vpop.f32.mrf.mxu0 }
 0x12a   :  { %6158 = vst [vmem:[#allocation9_spill] sm:$0xff] %v3889_v3  ;;  %v3891_v16 = vpop.f32.mrf.mxu3  ;;  %v604_v3 = vpop.permute.xlu1 %603 }
 0x12b   :  { %6159 = vst [vmem:[#allocation10_spill] sm:$0xff] %v3891_v16  ;;  %3110 = vmatmul.msk.f32.gmra.mxu2 %vm74_vm0, %v604_v3 }
 0x12c   :  { %3135 = vmatmul.msk.f32.gmra.mxu0 %vm74_vm0, %v590_v11  ;;  %v3911_v49 = vpop.f32.mrf.mxu1 }
 0x12f   :  { %3121 = vmatmul.msk.f32.gmra.mxu3 %vm74_vm0, %v594_v26 }
 0x131   :  { %v3900_v58 = vpop.f32.mrf.mxu0 }
 0x132   :  { %6161 = vst [vmem:[#allocation12_spill] sm:$0xff] %v3900_v58  ;;  %v3902_v23 = vpop.f32.mrf.mxu3  ;;  %v606_v58 = vpop.permute.xlu2 %605 }
 0x133   :  { %6162 = vst [vmem:[#allocation13_spill] sm:$0xff] %v3902_v23  ;;  %3111 = vmatmul.msk.f32.gmra.mxu2 %vm74_vm0, %v606_v58 }
 0x134   :  { %3136 = vmatmul.msk.f32.gmra.mxu0 %vm74_vm0, %v592_v17  ;;  %v3918_v17 = vpop.f32.mrf.mxu2  ;;  %v3924_v15 = vpop.f32.mrf.mxu1 }
 0x135   :  { %6166 = vst [vmem:[#allocation17_spill] sm:$0xff] %v3918_v17  ;;  %v610_v17 = vpop.permute.xlu1 %609 }
 0x136   :  { %6169 = vst [vmem:[#allocation20_spill] sm:$0xff] %v3924_v15 }
 0x137   :  { %3122 = vmatmul.msk.f32.gmra.mxu3 %vm74_vm0, %v596_v40 }
 0x139   :  { %v3909_v11 = vpop.f32.mrf.mxu0 }
 0x13a   :  { %6164 = vst [vmem:[#allocation15_spill] sm:$0xff] %v3909_v11  ;;  %v3913_v16 = vpop.f32.mrf.mxu3  ;;  %v608_v11 = vpop.permute.xlu0 %607 }
 0x13b   :  { %6165 = vst [vmem:[#allocation16_spill] sm:$0xff] %v3913_v16  ;;  %3112 = vmatmul.msk.f32.gmra.mxu2 %vm74_vm0, %v608_v11 }
 0x13c   :  { %3137 = vmatmul.msk.f32.gmra.mxu0 %vm74_vm0, %v594_v26  ;;  %v3933_v10 = vpop.f32.mrf.mxu2 }
 0x13d   :  { %6172 = vst [vmem:[#allocation23_spill] sm:$0xff] %v3933_v10 }
 0x13f   :  { %3123 = vmatmul.msk.f32.gmra.mxu3 %vm74_vm0, %v598_v52 }
 0x141   :  { %v3920_v54 = vpop.f32.mrf.mxu0 }
 0x142   :  { %6167 = vst [vmem:[#allocation18_spill] sm:$0xff] %v3920_v54  ;;  %v3922_v23 = vpop.f32.mrf.mxu3  ;;  %v3936_v54 = vpop.f32.mrf.mxu1 }
 0x143   :  { %6168 = vst [vmem:[#allocation19_spill] sm:$0xff] %v3922_v23  ;;  %3113 = vmatmul.msk.f32.gmra.mxu2 %vm74_vm0, %v610_v17 }
 0x144   :  { %3138 = vmatmul.msk.f32.gmra.mxu0 %vm74_vm0, %v596_v40  ;;  %6173 = vst [vmem:[#allocation24_spill] sm:$0xff] %v3936_v54 }
 0x147   :  { %3124 = vmatmul.msk.f32.gmra.mxu3 %vm74_vm0, %v600_v59 }
 0x149   :  { %v3929_v26 = vpop.f32.mrf.mxu0 }
 0x14a   :  { %6170 = vst [vmem:[#allocation21_spill] sm:$0xff] %v3929_v26  ;;  %v3931_v16 = vpop.f32.mrf.mxu3  ;;  %v3945_v26 = vpop.f32.mrf.mxu2 }
 0x14b   :  { %6171 = vst [vmem:[#allocation22_spill] sm:$0xff] %v3931_v16  ;;  %v3948_v16 = vpop.f32.mrf.mxu1 }
 0x14c   :  { %3139 = vmatmul.msk.f32.gmra.mxu0 %vm74_vm0, %v598_v52  ;;  %6176 = vst [vmem:[#allocation27_spill] sm:$0xff] %v3945_v26 }
 0x14d   :  { %6177 = vst [vmem:[#allocation28_spill] sm:$0xff] %v3948_v16 }
 0x14f   :  { %3125 = vmatmul.msk.f32.gmra.mxu3 %vm74_vm0, %v602_v37 }
 0x151   :  { %v3940_v40 = vpop.f32.mrf.mxu0 }
 0x152   :  { %6174 = vst [vmem:[#allocation25_spill] sm:$0xff] %v3940_v40  ;;  %v3942_v23 = vpop.f32.mrf.mxu3  ;;  %v3955_v54 = vpop.f32.mrf.mxu2 }
 0x153   :  { %6175 = vst [vmem:[#allocation26_spill] sm:$0xff] %v3942_v23  ;;  %v3960_v23 = vpop.f32.mrf.mxu1 }
 0x154   :  { %3140 = vmatmul.msk.f32.gmra.mxu0 %vm74_vm0, %v600_v59  ;;  %6180 = vst [vmem:[#allocation31_spill] sm:$0xff] %v3955_v54 }
 0x155   :  { %6182 = vst [vmem:[#allocation33_spill] sm:$0xff] %v3960_v23 }
 0x157   :  { %3126 = vmatmul.msk.f32.gmra.mxu3 %vm74_vm0, %v604_v3 }
 0x159   :  { %v3950_v52 = vpop.f32.mrf.mxu0 }
 0x15a   :  { %6178 = vst [vmem:[#allocation29_spill] sm:$0xff] %v3950_v52  ;;  %v3952_v10 = vpop.f32.mrf.mxu3  ;;  %v660_v26 = vpop.f32.mrf.mxu2 }
 0x15b   :  { %6179 = vst [vmem:[#allocation30_spill] sm:$0xff] %v3952_v10 }
 0x15c   :  { %3141 = vmatmul.msk.f32.gmra.mxu0 %vm74_vm0, %v602_v37  ;;  %v3970_v37 = vpop.f32.mrf.mxu1 }
 0x15d   :  { %6186 = vst [vmem:[#allocation37_spill] sm:$0xff] %v3970_v37 }
 0x15f   :  { %3127 = vmatmul.msk.f32.gmra.mxu3 %vm74_vm0, %v606_v58 }
 0x161   :  { %v3958_v40 = vpop.f32.mrf.mxu0 }
 0x162   :  { %6181 = vst [vmem:[#allocation32_spill] sm:$0xff] %v3958_v40  ;;  %v3962_v59 = vpop.f32.mrf.mxu3 }
 0x163   :  { %6183 = vst [vmem:[#allocation34_spill] sm:$0xff] %v3962_v59  ;;  %v663_v59 = vpop.f32.mrf.mxu2 }
 0x164   :  { %3142 = vmatmul.msk.f32.gmra.mxu0 %vm74_vm0, %v604_v3  ;;  %v3979_v3 = vpop.f32.mrf.mxu1 }
 0x165   :  { %6189 = vst [vmem:[#allocation40_spill] sm:$0xff] %v3979_v3  ;;  %v1309_v3 = vmul.f32 %v3873_v50, %v3873_v50 }
 0x167   :  { %3128 = vmatmul.msk.f32.gmra.mxu3 %vm74_vm0, %v608_v11 }
 0x169   :  { %v3966_v52 = vpop.f32.mrf.mxu0 }
 0x16a   :  { %6184 = vst [vmem:[#allocation35_spill] sm:$0xff] %v3966_v52  ;;  %v3968_v10 = vpop.f32.mrf.mxu3  ;;  %v863_v52 = vmul.f32 %v3833_v13, %v3823_v9  ;;  %v864_v9 = vmul.f32 %v3847_v19, %v3835_v14  ;;  %v1294_v14 = vmul.f32 %v3795_v62, %v3795_v62  ;;  %v1310_v19 = vmul.f32 %v3885_v63, %v3885_v63 }
 0x16b   :  { %6185 = vst [vmem:[#allocation36_spill] sm:$0xff] %v3968_v10  ;;  %v847_v10 = vmul.f32 %v3689_v22, %v3687_v21  ;;  %v848_v22 = vmul.f32 %v3698_v25, %v3696_v24  ;;  %v865_v25 = vmul.f32 %v3856_v29, %v3849_v20  ;;  %v850_v20 = vmul.f32 %v3716_v31, %v3714_v30 }
 0x16c   :  { %3143 = vmatmul.msk.f32.gmra.mxu0 %vm74_vm0, %v606_v58  ;;  %v3995_v21 = vpop.f32.mrf.mxu1  ;;  %v851_v29 = vmul.f32 %v3725_v34, %v3723_v33  ;;  %v4039_v30 = vmul.f32 %v3759_v45, %v3750_v42  ;;  %v4043_v31 = vmul.f32 %v3768_v48, %v3757_v44  ;;  %v866_v33 = vmul.f32 %v3867_v43, %v3860_v35 }
 0x16d   :  { %v879_v23 = vadd.f32 %v863_v52, %v847_v10  ;;  %6190 = vst [vmem:[#allocation41_spill] sm:$0xff] %v3995_v21  ;;  %v4064_v42 = vmul.f32 %v3815_v6, %v3793_v61  ;;  %v4068_v44 = vmul.f32 %v3829_v12, %v3801_v0  ;;  %v4072_v45 = vmul.f32 %v3845_v18, %v3811_v4  ;;  %v6192_v18 = vld [vmem:[#allocation2_spill] sm:$0xff] }
 0x16e   :  { %v882_v0 = vadd.f32 %v866_v33, %v850_v20  ;;  %v4086_v12 = vmul.f32 %v3858_v32, %v3821_v8  ;;  %v1297_v35 = vmul.f32 %v6192_v18, %v6192_v18  ;;  %v1313_v43 = vmul.f32 %v3924_v15, %v3924_v15  ;;  %v6197_v8 = vld [vmem:[#allocation4_spill] sm:$0xff]  ;;  %v6199_v20 = vld [vmem:[#allocation6_spill] sm:$0xff] }
 0x16f   :  { %3129 = vmatmul.msk.f32.gmra.mxu3 %vm74_vm0, %v610_v17  ;;  %v1299_v32 = vmul.f32 %v6197_v8, %v6197_v8  ;;  %v6209_v8 = vld [vmem:[#allocation33_spill] sm:$0xff] }
 0x171   :  { %v3974_v54 = vpop.f32.mrf.mxu0 }
 0x172   :  { %6187 = vst [vmem:[#allocation38_spill] sm:$0xff] %v3974_v54  ;;  %v3976_v40 = vpop.f32.mrf.mxu3  ;;  %v666_v54 = vpop.f32.mrf.mxu2 }
 0x173   :  { %6188 = vst [vmem:[#allocation39_spill] sm:$0xff] %v3976_v40 }
 0x174   :  { %3144 = vmatmul.msk.f32.gmra.mxu0 %vm74_vm0, %v608_v11  ;;  %v1293_v11 = vmul.f32 %v3785_v57, %v3785_v57 }
 0x176   :  { %v1325_v13 = vadd.f32 %v1309_v3, %v1293_v11  ;;  %v1326_v11 = vadd.f32 %v1310_v19, %v1294_v14 }
 0x179   :  { %v3985_v37 = vpop.f32.mrf.mxu0 }
 0x17a   :  { %v725_v58 = vpop.f32.mrf.mxu3  ;;  %v669_v24 = vpop.f32.mrf.mxu2 }
 0x17b   :  { %v895_v16 = vmul.f32 %v725_v58, %v660_v26 }
 0x17c   :  { %3145 = vmatmul.msk.f32.gmra.mxu0 %vm74_vm0, %v610_v17  ;;  %v880_v17 = vadd.f32 %v864_v9, %v848_v22  ;;  %v4017_v9 = vpop.f32.mrf.mxu1 }
 0x17d   :  { %v911_v40 = vadd.f32 %v895_v16, %v879_v23  ;;  %6191 = vst [vmem:[#allocation42_spill] sm:$0xff] %v4017_v9 }
 0x17f   :  { %3146 = vmatmul.msk.f32.vlgmr.msra.gmra.mxu1 %vm74_vm0, %v911_v40 }
 0x181   :  { %v3999_v10 = vpop.f32.mrf.mxu0 }
 0x182   :  { %v728_v23 = vpop.f32.mrf.mxu3  ;;  %v1341_v16 = vmul.f32 %v3999_v10, %v3999_v10 }
 0x183   :  { %v896_v26 = vmul.f32 %v728_v23, %v663_v59  ;;  %v849_v59 = vmul.f32 %v3707_v28, %v3705_v27  ;;  %v852_v27 = vmul.f32 %v3736_v38, %v3732_v36  ;;  %v4051_v36 = vmul.f32 %v3779_v55, %v3766_v47 }
 0x184   :  { %v1357_v52 = vadd.f32 %v1341_v16, %v1325_v13  ;;  %v4055_v38 = vmul.f32 %v3791_v60, %v3775_v51  ;;  %v1296_v51 = vmul.f32 %v3813_v5, %v3813_v5  ;;  %v4092_v19 = vpop.f32.mrf.mxu1 }
 0x185   :  { %v912_v58 = vadd.f32 %v896_v26, %v880_v17  ;;  %v881_v23 = vadd.f32 %v865_v25, %v849_v59  ;;  %6193 = vst [vmem:[#allocation43_spill] sm:$0xff] %v4092_v19  ;;  %v6194_v59 = vld [vmem:[#allocation3_spill] sm:$0xff] }
 0x186   :  { %v4007_v40 = vmax.f32 %v1357_v52, 1e-08  ;;  %v4029_v52 = vmul.f32 %v3748_v41, %v3741_v39  ;;  %v4059_v39 = vmul.f32 %v3803_v1, %v3783_v56  ;;  %v672_v41 = vpop.f32.mrf.mxu2  ;;  %v1312_v56 = vmul.f32 %v3911_v49, %v3911_v49 }
 0x187   :  { %3147 = vmatmul.msk.f32.gmra.mxu1 %vm74_vm0, %v912_v58  ;;  %v1295_v58 = vmul.f32 %v3805_v2, %v3805_v2  ;;  %v867_v1 = vmul.f32 %v3878_v53, %v3869_v46  ;;  %v6196_v46 = vld [vmem:[#allocation9_spill] sm:$0xff] }
 0x188   :  { %3222 = vrsqrt.f32 %v4007_v40  ;;  %vm1396_vm1 = vcmp.eq.f32.partialorder %v4007_v40, inf  ;;  %vm1398_vm2 = vcmp.eq.f32.partialorder %v4007_v40, 0.0 }
 0x189   :  { %v4015_v3 = vpop.f32.mrf.mxu0  ;;  %v883_v33 = vadd.f32 %v867_v1, %v851_v29  ;;  %v6205_v1 = vld [vmem:[#allocation28_spill] sm:$0xff] }
 0x18a   :  { %v731_v22 = vpop.f32.mrf.mxu3  ;;  %v1342_v13 = vmul.f32 %v4015_v3, %v4015_v3 }
 0x18b   :  { %v897_v16 = vmul.f32 %v731_v22, %v666_v54  ;;  %v1311_v54 = vmul.f32 %v3898_v7, %v3898_v7  ;;  %v6195_v22 = vld [vmem:[#allocation7_spill] sm:$0xff] }
 0x18c   :  { %v1358_v17 = vadd.f32 %v1342_v13, %v1326_v11  ;;  %v1298_v11 = vmul.f32 %v6194_v59, %v6194_v59  ;;  %v868_v53 = vmul.f32 %v6196_v46, %v6195_v22  ;;  %v6203_v22 = vld [vmem:[#allocation12_spill] sm:$0xff] }
 0x18d   :  { %v913_v28 = vadd.f32 %v897_v16, %v881_v23  ;;  %v1327_v55 = vadd.f32 %v1311_v54, %v1295_v58  ;;  %v6198_v16 = vld [vmem:[#allocation5_spill] sm:$0xff]  ;;  %v1328_v54 = vadd.f32 %v1312_v56, %v1296_v51 }
 0x18e   :  { %v3223_v26 = vpop.eup %3222  ;;  %v4035_v14 = vmax.f32 %v1358_v17, 1e-08  ;;  %v1300_v17 = vmul.f32 %v6198_v16, %v6198_v16 }
 0x18f   :  { %v1390_v34 = vmul.f32 %v3223_v26, %v4007_v40  ;;  %3148 = vmatmul.msk.f32.gmra.mxu1 %vm74_vm0, %v913_v28  ;;  %v4104_v28 = vmul.f32 %v6199_v20, %v6199_v20 }
 0x190   :  { %3224 = vrsqrt.f32 %v4035_v14  ;;  %vm1408_vm3 = vcmp.eq.f32.partialorder %v4035_v14, inf  ;;  %vm1410_vm4 = vcmp.eq.f32.partialorder %v4035_v14, 0.0 }
 0x191   :  { %v1391_v47 = vmul.f32 %v3223_v26, %v1390_v34  ;;  %v4074_v48 = vpop.f32.mrf.mxu0 }
 0x192   :  { %v734_v60 = vpop.f32.mrf.mxu3  ;;  %v1343_v61 = vmul.f32 %v4074_v48, %v4074_v48 }
 0x193   :  { %v1392_v4 = vmul.f32 0.5, %v1391_v47  ;;  %v898_v6 = vmul.f32 %v734_v60, %v669_v24  ;;  %v6200_v60 = vld [vmem:[#allocation24_spill] sm:$0xff] }
 0x194   :  { %v1359_v25 = vadd.f32 %v1343_v61, %v1327_v55  ;;  %v1329_v55 = vadd.f32 %v1313_v43, %v1297_v35  ;;  %v1314_v61 = vmul.f32 %v6200_v60, %v6200_v60  ;;  %v1315_v35 = vmul.f32 %v6205_v1, %v6205_v1 }
 0x195   :  { %v1393_v24 = vsub.f32 1.5, %v1392_v4  ;;  %v914_v13 = vadd.f32 %v898_v6, %v882_v0  ;;  %v6201_v0 = vld [vmem:[#allocation8_spill] sm:$0xff]  ;;  %v884_v6 = vadd.f32 %v868_v53, %v852_v27  ;;  %v1399_v43 = vand.u32 2147483648, %v4007_v40  ;;  %v675_v27 = vpop.f32.mrf.mxu2 }
 0x196   :  { %v3225_v23 = vpop.eup %3224  ;;  %v4106_v58 = vmax.f32 %v1359_v25, 1e-08  ;;  %v4114_v4 = vmul.f32 %v6201_v0, %v6201_v0  ;;  %v6202_v25 = vld [vmem:[#allocation10_spill] sm:$0xff]  ;;  %v6208_v0 = vld [vmem:[#allocation11_spill] sm:$0xff]  ;;  %v1316_v60 = vmul.f32 %v6209_v8, %v6209_v8 }
 0x197   :  { %v1394_v34 = vmul.f32 %v3223_v26, %v1393_v24  ;;  %v1402_v47 = vmul.f32 %v3225_v23, %v4035_v14  ;;  %3149 = vmatmul.msk.f32.gmra.mxu1 %vm74_vm0, %v914_v13  ;;  %v869_v51 = vmul.f32 %v6203_v22, %v6202_v25  ;;  %v6207_v25 = vld [vmem:[#allocation15_spill] sm:$0xff]  ;;  %v4134_v20 = vmul.f32 %v6208_v0, %v6208_v0 }
 0x198   :  { %3226 = vrsqrt.f32 %v4106_v58  ;;  %vm1420_vm5 = vcmp.eq.f32.partialorder %v4106_v58, inf  ;;  %vm1422_vm6 = vcmp.eq.f32.partialorder %v4106_v58, 0.0 }
 0x199   :  { %v1395_v29 = vmul.f32 %v1394_v34, %v4007_v40  ;;  %v1403_v26 = vmul.f32 %v3225_v23, %v1402_v47  ;;  %v4120_v56 = vpop.f32.mrf.mxu0  ;;  %v6206_v47 = vld [vmem:[#allocation13_spill] sm:$0xff] }
 0x19a   :  { %6204 = vst [vmem:[#allocation7_spill] sm:$0xff] %v4120_v56  ;;  %v737_v46 = vpop.f32.mrf.mxu3  ;;  %v1344_v24 = vmul.f32 %v4120_v56, %v4120_v56  ;;  %v870_v22 = vmul.f32 %v6207_v25, %v6206_v47  ;;  %v4138_v56 = vadd.f32 %v1314_v61, %v1298_v11  ;;  %v6213_v61 = vld [vmem:[#allocation18_spill] sm:$0xff] }
 0x19b   :  { %v1397_v53 = vsel %vm1396_vm1, %v4007_v40, %v1395_v29  ;;  %v1404_v13 = vmul.f32 0.5, %v1403_v26  ;;  %v899_v34 = vmul.f32 %v737_v46, %v672_v41  ;;  %v4141_v40 = vadd.f32 %v869_v51, %v4029_v52  ;;  %v6210_v41 = vld [vmem:[#allocation14_spill] sm:$0xff]  ;;  %v4147_v46 = vpop.f32.mrf.mxu1  ;;  %v6212_v52 = vld [vmem:[#allocation16_spill] sm:$0xff] }
 0x19c   :  { %v1400_v16 = vsel %vm1398_vm2, %v1399_v43, %v1397_v53  ;;  %v1360_v1 = vadd.f32 %v1344_v24, %v1328_v54  ;;  %v4145_v26 = vmul.f32 %v6210_v41, %v6210_v41  ;;  %6211 = vst [vmem:[#allocation9_spill] sm:$0xff] %v4147_v46  ;;  %v4151_v54 = vadd.f32 %v1315_v35, %v1299_v32  ;;  %v6214_v24 = vld [vmem:[#allocation17_spill] sm:$0xff]  ;;  %v6219_v41 = vld [vmem:[#allocation23_spill] sm:$0xff] }
 0x19d   :  { %v3195_v59 = vmul.f32 -1.442695, %v1400_v16  ;;  %v1405_v15 = vsub.f32 1.5, %v1404_v13  ;;  %v915_v18 = vadd.f32 %v899_v34, %v883_v33  ;;  %v4156_v11 = vadd.f32 %v870_v22, %v4039_v30  ;;  %v6216_v30 = vld [vmem:[#allocation19_spill] sm:$0xff]  ;;  %v6217_v35 = vld [vmem:[#allocation21_spill] sm:$0xff] }
 0x19e   :  { %v3227_v29 = vpop.eup %3226  ;;  %v4149_v43 = vmax.f32 %v1360_v1, 1e-08  ;;  %v871_v51 = vmul.f32 %v6213_v61, %v6212_v52  ;;  %v4162_v53 = vmul.f32 %v6214_v24, %v6214_v24  ;;  %v4165_v32 = vadd.f32 %v1316_v60, %v1300_v17 }
 0x19f   :  { %3228 = vpow2.f32 %v3195_v59  ;;  %v1406_v16 = vmul.f32 %v3225_v23, %v1405_v15  ;;  %v1414_v33 = vmul.f32 %v3227_v29, %v4106_v58  ;;  %3150 = vmatmul.msk.f32.gmra.mxu1 %vm74_vm0, %v915_v18  ;;  %v6215_v59 = vld [vmem:[#allocation37_spill] sm:$0xff]  ;;  %v872_v13 = vmul.f32 %v6217_v35, %v6216_v30  ;;  %v678_v35 = vpop.f32.mrf.mxu2 }
 0x1a0   :  { %3230 = vrsqrt.f32 %v4149_v43  ;;  %v1317_v15 = vmul.f32 %v6215_v59, %v6215_v59  ;;  %v1411_v34 = vand.u32 2147483648, %v4035_v14  ;;  %v4187_v0 = vmul.f32 %v6219_v41, %v6219_v41 }
 0x1a1   :  { %v1407_v23 = vmul.f32 %v1406_v16, %v4035_v14  ;;  %v1415_v18 = vmul.f32 %v3227_v29, %v1414_v33  ;;  %v4170_v1 = vpop.f32.mrf.mxu0  ;;  %v4181_v16 = vadd.f32 %v871_v51, %v4043_v31  ;;  %v6218_v33 = vld [vmem:[#allocation40_spill] sm:$0xff]  ;;  %v4193_v31 = vadd.f32 %v872_v13, %v4051_v36  ;;  %v6222_v36 = vld [vmem:[#allocation25_spill] sm:$0xff] }
 0x1a2   :  { %v740_v47 = vpop.f32.mrf.mxu3  ;;  %v1345_v17 = vmul.f32 %v4170_v1, %v4170_v1  ;;  %v1318_v52 = vmul.f32 %v6218_v33, %v6218_v33  ;;  %vm1432_vm7 = vcmp.eq.f32.partialorder %v4149_v43, inf  ;;  %vm1434_vm8 = vcmp.eq.f32.partialorder %v4149_v43, 0.0 }
 0x1a3   :  { %v1409_v60 = vsel %vm1408_vm3, %v4035_v14, %v1407_v23  ;;  %v1416_v25 = vmul.f32 0.5, %v1415_v18  ;;  %v900_v22 = vmul.f32 %v740_v47, %v675_v27  ;;  %v4190_v27 = vadd.f32 %v1317_v15, %v4104_v28  ;;  %v4212_v13 = vpop.f32.mrf.mxu1 }
 0x1a4   :  { %v1412_v61 = vsel %vm1410_vm4, %v1411_v34, %v1409_v60  ;;  %v1361_v30 = vadd.f32 %v1345_v17, %v1329_v55  ;;  %v6220_v55 = vld [vmem:[#allocation27_spill] sm:$0xff]  ;;  %v4206_v28 = vadd.f32 %v1318_v52, %v4114_v4  ;;  %6223 = vst [vmem:[#allocation10_spill] sm:$0xff] %v4212_v13  ;;  %v6224_v60 = vld [vmem:[#allocation26_spill] sm:$0xff]  ;;  %v1320_v4 = vmul.f32 %v4017_v9, %v4017_v9 }
 0x1a5   :  { %v3229_v24 = vpop.eup %3228  ;;  %v3196_v59 = vmul.f32 -1.442695, %v1412_v61  ;;  %v1417_v23 = vsub.f32 1.5, %v1416_v25  ;;  %v916_v8 = vadd.f32 %v900_v22, %v884_v6  ;;  %v4201_v34 = vmul.f32 %v6220_v55, %v6220_v55  ;;  %v6221_v6 = vld [vmem:[#allocation22_spill] sm:$0xff] }
 0x1a6   :  { %v3231_v14 = vpop.eup %3230  ;;  %v4195_v51 = vadd.f32 1.0, %v3229_v24  ;;  %v4197_v18 = vmax.f32 %v1361_v30, 1e-08  ;;  %v873_v15 = vmul.f32 %v6222_v36, %v6221_v6  ;;  %v1319_v24 = vmul.f32 %v3995_v21, %v3995_v21  ;;  %v6226_v36 = vld [vmem:[#allocation30_spill] sm:$0xff] }
 0x1a7   :  { %3232 = vpow2.f32 %v3196_v59  ;;  %v1418_v47 = vmul.f32 %v3227_v29, %v1417_v23  ;;  %v1426_v17 = vmul.f32 %v3231_v14, %v4149_v43  ;;  %3151 = vmatmul.msk.f32.gmra.mxu1 %vm74_vm0, %v916_v8  ;;  %v6225_v59 = vld [vmem:[#allocation29_spill] sm:$0xff]  ;;  %v1423_v52 = vand.u32 2147483648, %v4106_v58 }
 0x1a8   :  { %3234 = vrcp.f32 %v4195_v51  ;;  %v874_v29 = vmul.f32 %v6225_v59, %v6224_v60  ;;  %v6227_v60 = vld [vmem:[#allocation32_spill] sm:$0xff]  ;;  %v1321_v55 = vmul.f32 %v4092_v19, %v4092_v19  ;;  %vm1650_vm10 = vweird.f32 %v4195_v51 }
 0x1a9   :  { %v1419_v25 = vmul.f32 %v1418_v47, %v4106_v58  ;;  %v1427_v22 = vmul.f32 %v3231_v14, %v1426_v17  ;;  %3236 = vrsqrt.f32 %v4197_v18  ;;  %v4219_v8 = vpop.f32.mrf.mxu0  ;;  %v4230_v17 = vadd.f32 %v873_v15, %v4055_v38  ;;  %v6228_v15 = vld [vmem:[#allocation31_spill] sm:$0xff] }
 0x1aa   :  { %v743_v61 = vpop.f32.mrf.mxu3  ;;  %v1346_v47 = vmul.f32 %v4219_v8, %v4219_v8  ;;  %v875_v59 = vmul.f32 %v6227_v60, %v6226_v36  ;;  %v4244_v38 = vadd.f32 %v874_v29, %v4059_v39  ;;  %v6230_v29 = vld [vmem:[#allocation35_spill] sm:$0xff]  ;;  %vm1444_vm12 = vcmp.eq.f32.partialorder %v4197_v18, inf }
 0x1ab   :  { %v1421_v30 = vsel %vm1420_vm5, %v4106_v58, %v1419_v25  ;;  %v1428_v23 = vmul.f32 0.5, %v1427_v22  ;;  %v901_v6 = vmul.f32 %v743_v61, %v678_v35  ;;  %v4241_v22 = vadd.f32 %v1319_v24, %v4134_v20 }
 0x1ac   :  { %v1424_v41 = vsel %vm1422_vm6, %v1423_v52, %v1421_v30  ;;  %v1362_v35 = vadd.f32 %v1346_v47, %v4138_v56  ;;  %v1308_v61 = vmul.f32 %v6228_v15, %v6228_v15  ;;  %v681_v52 = vpop.f32.mrf.mxu2  ;;  %v4259_v39 = vadd.f32 %v875_v59, %v4064_v42  ;;  %v6232_v59 = vld [vmem:[#allocation36_spill] sm:$0xff] }
 0x1ad   :  { %v3233_v9 = vpop.eup %3232  ;;  %v3197_v21 = vmul.f32 -1.442695, %v1424_v41  ;;  %v1429_v33 = vsub.f32 1.5, %v1428_v23  ;;  %v917_v58 = vadd.f32 %v901_v6, %v4141_v40  ;;  %v4253_v40 = vadd.f32 %v1320_v4, %v4145_v26 }
 0x1ae   :  { %v4238_v25 = vpop.eup %3234  ;;  %v4248_v36 = vadd.f32 1.0, %v3233_v9  ;;  %v4262_v24 = vadd.f32 %v1321_v55, %v4162_v53  ;;  %v6229_v9 = vld [vmem:[#allocation34_spill] sm:$0xff]  ;;  %v1322_v42 = vmul.f32 %v4147_v46, %v4147_v46  ;;  %v4276_v53 = vpop.f32.mrf.mxu1  ;;  %v1435_v55 = vand.u32 2147483648, %v4149_v43 }
 0x1af   :  { %v4250_v41 = vpop.eup %3236  ;;  %v1646_v56 = vmul.f32 %v4238_v25, %v4195_v51  ;;  %3238 = vpow2.f32 %v3197_v21  ;;  %v1430_v20 = vmul.f32 %v3231_v14, %v1429_v33  ;;  %3152 = vmatmul.msk.f32.gmra.mxu1 %vm74_vm0, %v917_v58  ;;  %v876_v30 = vmul.f32 %v6230_v29, %v6229_v9  ;;  %6231 = vst [vmem:[#allocation12_spill] sm:$0xff] %v4276_v53  ;;  %v6233_v58 = vld [vmem:[#allocation38_spill] sm:$0xff] }
 0x1b0   :  { %3240 = vrcp.f32 %v4248_v36  ;;  %v1438_v21 = vmul.f32 %v4250_v41, %v4197_v18  ;;  %v4270_v33 = vmax.f32 %v1362_v35, 1e-08  ;;  %v877_v35 = vmul.f32 %v6233_v58, %v6232_v59 }
 0x1b1   :  { %v1647_v26 = vsub.f32 1.0, %v1646_v56  ;;  %v1431_v4 = vmul.f32 %v1430_v20, %v4149_v43  ;;  %v4272_v14 = vpop.f32.mrf.mxu0  ;;  %v1323_v56 = vmul.f32 %v4212_v13, %v4212_v13  ;;  %v6234_v20 = vld [vmem:[#allocation39_spill] sm:$0xff]  ;;  %v4301_v59 = vadd.f32 %v1322_v42, %v4187_v0 }
 0x1b2   :  { %v746_v23 = vpop.f32.mrf.mxu3  ;;  %v1439_v47 = vmul.f32 %v4250_v41, %v1438_v21  ;;  %3242 = vrsqrt.f32 %v4270_v33  ;;  %v1347_v60 = vmul.f32 %v4272_v14, %v4272_v14  ;;  %v878_v9 = vmul.f32 %v3985_v37, %v6234_v20 }
 0x1b3   :  { %v1433_v6 = vsel %vm1432_vm7, %v4149_v43, %v1431_v4  ;;  %v4293_v43 = vadd.f32 %v876_v30, %v4068_v44  ;;  %v1324_v4 = vmul.f32 %v4276_v53, %v4276_v53  ;;  %v1648_v21 = vmul.f32 %v4238_v25, %v1647_v26 }
 0x1b4   :  { %v1436_v29 = vsel %vm1434_vm8, %v1435_v55, %v1433_v6  ;;  %v1654_v58 = vand.u32 2147483647, %v4195_v51  ;;  %v1440_v37 = vmul.f32 0.5, %v1439_v47  ;;  %v902_v30 = vmul.f32 %v746_v23, %v681_v52 }
 0x1b5   :  { %v3239_v15 = vpop.eup %3238  ;;  %v3198_v46 = vmul.f32 -1.442695, %v1436_v29  ;;  %v1363_v55 = vadd.f32 %v1347_v60, %v4151_v54  ;;  %v4310_v26 = vadd.f32 %v877_v35, %v4072_v45  ;;  %v4313_v6 = vadd.f32 %v1323_v56, %v4201_v34 }
 0x1b6   :  { %v4298_v19 = vpop.eup %3240  ;;  %v4304_v13 = vadd.f32 1.0, %v3239_v15  ;;  %v4316_v0 = vadd.f32 %v878_v9, %v4086_v12  ;;  %v684_v15 = vpop.f32.mrf.mxu2  ;;  %v4321_v47 = vadd.f32 %v1324_v4, %v1308_v61  ;;  %vm1651_vm9 = vweird.f32 %v4238_v25 }
 0x1b7   :  { %v1661_v44 = vmul.f32 %v4298_v19, %v4248_v36  ;;  %3244 = vpow2.f32 %v3198_v46  ;;  %v1649_v46 = vadd.f32 %v4238_v25, %v1648_v21  ;;  %v1656_v45 = vand.u32 2147483648, %v4195_v51  ;;  %vm4339_vm13 = vmor %vm1650_vm10, %vm1651_vm9 }
 0x1b8   :  { %3246 = vrcp.f32 %v4304_v13  ;;  %v4319_v42 = vpop.eup %3242  ;;  %v1441_v34 = vsub.f32 1.5, %v1440_v37  ;;  %vm4329_vm11 = vcmp.eq.f32.partialorder %v1654_v58, 8.507059e+37  ;;  %v918_v61 = vadd.f32 %v902_v30, %v4156_v11 }
 0x1b9   :  { %v1662_v54 = vsub.f32 1.0, %v1661_v44  ;;  %v1450_v12 = vmul.f32 %v4319_v42, %v4270_v33  ;;  %v4335_v60 = vmax.f32 %v1363_v55, 1e-08  ;;  %v4337_v35 = vpop.f32.mrf.mxu0  ;;  %v1669_v56 = vand.u32 2147483647, %v4248_v36 }
 0x1ba   :  { %v749_v52 = vpop.f32.mrf.mxu3  ;;  %v1671_v20 = vand.u32 2147483648, %v4248_v36  ;;  %v1442_v9 = vmul.f32 %v4250_v41, %v1441_v34  ;;  %v1653_v11 = vsel %vm4339_vm13, %v4238_v25, %v1649_v46  ;;  %v1657_v21 = vor.u32 1.1754944e-38, %v1656_v45  ;;  %3153 = vmatmul.msk.f32.gmra.mxu1 %vm74_vm0, %v918_v61 }
 0x1bb   :  { %v1451_v29 = vmul.f32 %v4319_v42, %v1450_v12  ;;  %3248 = vrsqrt.f32 %v4335_v60  ;;  %v903_v58 = vmul.f32 %v749_v52, %v684_v15  ;;  %v1663_v44 = vmul.f32 %v4298_v19, %v1662_v54 }
 0x1bc   :  { %v1443_v41 = vmul.f32 %v1442_v9, %v4197_v18  ;;  %vm1446_vm14 = vcmp.eq.f32.partialorder %v4197_v18, 0.0  ;;  %vm1665_vm15 = vweird.f32 %v4248_v36  ;;  %v1447_v55 = vand.u32 2147483648, %v4197_v18 }
 0x1bd   :  { %v3245_v4 = vpop.eup %3244  ;;  %v1452_v46 = vmul.f32 0.5, %v1451_v29  ;;  %v1658_v15 = vsel %vm4329_vm11, %v1657_v21, %v1653_v11  ;;  %vm4365_vm1 = vcmp.eq.f32.partialorder %v1669_v56, 8.507059e+37  ;;  %v1672_v54 = vor.u32 1.1754944e-38, %v1671_v20  ;;  %v843_v56 = vld [vmem:[%s6092_s8] sm:$0xff]  ;;  %v840_v20 = vld [vmem:[%s6093_s7 + $0x10] sm:$0x1] }
 0x1be   :  { %v4352_v37 = vpop.eup %3246  ;;  %v4355_v30 = vadd.f32 1.0, %v3245_v4  ;;  %vm1666_vm2 = vweird.f32 %v4298_v19  ;;  %vm1456_vm3 = vcmp.eq.f32.partialorder %v4270_v33, inf  ;;  %v1459_v12 = vand.u32 2147483648, %v4270_v33  ;;  %1106 = vmatpush.msra.mxu2 %v843_v56 }
 0x1bf   :  { %v1676_v25 = vmul.f32 %v4352_v37, %v4304_v13  ;;  %v919_v52 = vadd.f32 %v903_v58, %v4181_v16  ;;  %v1664_v61 = vadd.f32 %v4298_v19, %v1663_v44  ;;  %vm1680_vm4 = vweird.f32 %v4304_v13  ;;  %v687_v16 = vpop.f32.mrf.mxu2  ;;  %vm4406_vm7 = vmor %vm1665_vm15, %vm1666_vm2 }
 0x1c0   :  { %3250 = vrcp.f32 %v4355_v30  ;;  %v1684_v23 = vand.u32 2147483647, %v4304_v13  ;;  %v1445_v51 = vsel %vm1444_vm12, %v4197_v18, %v1443_v41  ;;  %vm1205_vm5 = vcmask 1040384  }
 0x1c1   :  { %v1677_v34 = vsub.f32 1.0, %v1676_v25  ;;  %vm1458_vm6 = vcmp.eq.f32.partialorder %v4270_v33, 0.0  ;;  %v3249_v29 = vpop.eup %3248  ;;  %v4388_v4 = vmul.f32 %v1658_v15, %v3785_v57  ;;  %v4391_v11 = vmul.f32 %v1658_v15, %v3873_v50  ;;  %3178 = vmatpush.msk.msra.mxu3 %vm1205_vm5, %v840_v20 }
 0x1c2   :  { %v752_v9 = vpop.f32.mrf.mxu3  ;;  %v1448_v21 = vsel %vm1446_vm14, %v1447_v55, %v1445_v51  ;;  %v1453_v58 = vsub.f32 1.5, %v1452_v46  ;;  %v1462_v25 = vmul.f32 %v3249_v29, %v4335_v60  ;;  %v1348_v53 = vmul.f32 %v4337_v35, %v4337_v35  ;;  %3154 = vmatmul.msk.f32.gmra.mxu1 %vm74_vm0, %v919_v52 }
 0x1c3   :  { %v1678_v44 = vmul.f32 %v4352_v37, %v1677_v34  ;;  %v3199_v41 = vmul.f32 -1.442695, %v1448_v21  ;;  %v4400_v57 = vmul.f32 %v1658_v15, %v3999_v10  ;;  %v1686_v18 = vand.u32 2147483648, %v4304_v13  ;;  %v4413_v34 = vpop.f32.mrf.mxu0 }
 0x1c4   :  { %v1454_v55 = vmul.f32 %v4319_v42, %v1453_v58  ;;  %v904_v46 = vmul.f32 %v752_v9, %v687_v16  ;;  %v1668_v10 = vsel %vm4406_vm7, %v4298_v19, %v1664_v61  ;;  %v1463_v36 = vmul.f32 %v3249_v29, %v1462_v25 }
 0x1c5   :  { %3252 = vpow2.f32 %v3199_v41  ;;  %v1364_v15 = vadd.f32 %v1348_v53, %v4165_v32  ;;  %vm1681_vm8 = vweird.f32 %v4352_v37  ;;  %vm4422_vm9 = vcmp.eq.f32.partialorder %v1684_v23, 8.507059e+37 }
 0x1c6   :  { %v4415_v51 = vpop.eup %3250  ;;  %v1455_v52 = vmul.f32 %v1454_v55, %v4270_v33  ;;  %v1679_v20 = vadd.f32 %v4352_v37, %v1678_v44  ;;  %v1464_v16 = vmul.f32 0.5, %v1463_v36  ;;  %v1349_v19 = vmul.f32 %v4413_v34, %v4413_v34  ;;  %vm4449_vm10 = vmor %vm1680_vm4, %vm1681_vm8 }
 0x1c7   :  { %v1691_v42 = vmul.f32 %v4415_v51, %v4355_v30  ;;  %v4430_v9 = vmax.f32 %v1364_v15, 1e-08  ;;  %v4436_v32 = vmul.f32 %v4400_v57, %v4400_v57  ;;  %v1673_v53 = vsel %vm4365_vm1, %v1672_v54, %v1668_v10 }
 0x1c8   :  { %v1687_v61 = vor.u32 1.1754944e-38, %v1686_v18  ;;  %v920_v23 = vadd.f32 %v904_v46, %v4193_v31  ;;  %v1457_v58 = vsel %vm1456_vm3, %v4270_v33, %v1455_v52  ;;  %v1465_v44 = vsub.f32 1.5, %v1464_v16  ;;  %v690_v46 = vpop.f32.mrf.mxu2 }
 0x1c9   :  { %v1692_v21 = vsub.f32 1.0, %v1691_v42  ;;  %3254 = vrsqrt.f32 %v4430_v9  ;;  %v1460_v45 = vsel %vm1458_vm6, %v1459_v12, %v1457_v58  ;;  %vm1468_vm11 = vcmp.eq.f32.partialorder %v4335_v60, inf }
 0x1ca   :  { %vm1470_vm12 = vcmp.eq.f32.partialorder %v4335_v60, 0.0  ;;  %v1471_v31 = vand.u32 2147483648, %v4335_v60  ;;  %v1683_v25 = vsel %vm4449_vm10, %v4352_v37, %v1679_v20  ;;  %v3200_v50 = vmul.f32 -1.442695, %v1460_v45  ;;  %3155 = vmatmul.msk.f32.gmra.mxu1 %vm74_vm0, %v920_v23  ;;  %v755_v10 = vpop.f32.mrf.mxu3 }
 0x1cb   :  { %v3253_v54 = vpop.eup %3252  ;;  %v1466_v13 = vmul.f32 %v3249_v29, %v1465_v44  ;;  %v1365_v18 = vadd.f32 %v1349_v19, %v4190_v27  ;;  %v4463_v55 = vmul.f32 %v1673_v53, %v4015_v3  ;;  %vm1695_vm13 = vweird.f32 %v4355_v30 }
 0x1cc   :  { %v1699_v33 = vand.u32 2147483647, %v4355_v30  ;;  %v4467_v12 = vadd.f32 1.0, %v3253_v54  ;;  %v1693_v36 = vmul.f32 %v4415_v51, %v1692_v21  ;;  %3256 = vpow2.f32 %v3200_v50  ;;  %v4500_v21 = vpop.f32.mrf.mxu0 }
 0x1cd   :  { %v1467_v37 = vmul.f32 %v1466_v13, %v4335_v60  ;;  %v4472_v29 = vmax.f32 %v1365_v18, 1e-08  ;;  %v1688_v3 = vsel %vm4422_vm9, %v1687_v61, %v1683_v25  ;;  %v1701_v27 = vand.u32 2147483648, %v4355_v30 }
 0x1ce   :  { %3258 = vrcp.f32 %v4467_v12  ;;  %v1949_v15 = vmul.f32 %v4388_v4, %v4388_v4  ;;  %v1965_v20 = vmul.f32 %v4391_v11, %v4391_v11  ;;  %v905_v16 = vmul.f32 %v755_v10, %v690_v46 }
 0x1cf   :  { %v3255_v42 = vpop.eup %3254  ;;  %v1469_v52 = vsel %vm1468_vm11, %v4335_v60, %v1467_v37  ;;  %3260 = vrsqrt.f32 %v4472_v29  ;;  %v4487_v56 = vmul.f32 %v1673_v53, %v3795_v62  ;;  %v4490_v19 = vmul.f32 %v1673_v53, %v3885_v63 }
 0x1d0   :  { %v4494_v61 = vmul.f32 %v4463_v55, %v4463_v55  ;;  %vm4496_vm14 = vcmp.eq.f32.partialorder %v1699_v33, 8.507059e+37  ;;  %v1694_v58 = vadd.f32 %v4415_v51, %v1693_v36  ;;  %vm1696_vm15 = vweird.f32 %v4415_v51 }
 0x1d1   :  { %v1472_v62 = vsel %vm1470_vm12, %v1471_v31, %v1469_v52  ;;  %v1474_v63 = vmul.f32 %v3255_v42, %v4430_v9  ;;  %v4508_v53 = vmul.f32 %v1688_v3, %v3805_v2  ;;  %v4511_v44 = vmul.f32 %v1688_v3, %v4074_v48  ;;  %vm4520_vm1 = vmor %vm1695_vm13, %vm1696_vm15  ;;  %v6252_v2 = vld [vmem:[#allocation7_spill] sm:$0xff] }
 0x1d2   :  { %v1702_v41 = vor.u32 1.1754944e-38, %v1701_v27  ;;  %v3201_v45 = vmul.f32 -1.442695, %v1472_v62  ;;  %v3257_v54 = vpop.eup %3256  ;;  %v1981_v50 = vadd.f32 %v1965_v20, %v1949_v15  ;;  %v921_v13 = vadd.f32 %v905_v16, %v4230_v17  ;;  %v758_v62 = vpop.f32.mrf.mxu3 }
 0x1d3   :  { %6249 = vst [vmem:[#allocation13_spill] sm:$0xff] %v4511_v44  ;;  %v1475_v25 = vmul.f32 %v3255_v42, %v1474_v63  ;;  %v1350_v18 = vmul.f32 %v4500_v21, %v4500_v21  ;;  %v4524_v48 = vadd.f32 1.0, %v3257_v54  ;;  %v1950_v31 = vmul.f32 %v4487_v56, %v4487_v56 }
 0x1d4   :  { %v4516_v60 = vpop.eup %3258  ;;  %3262 = vpow2.f32 %v3201_v45  ;;  %v1966_v17 = vmul.f32 %v4490_v19, %v4490_v19  ;;  %v1698_v46 = vsel %vm4520_vm1, %v4415_v51, %v1694_v58  ;;  %v2013_v36 = vadd.f32 %v4436_v32, %v1981_v50  ;;  %3156 = vmatmul.msk.f32.gmra.mxu1 %vm74_vm0, %v921_v13  ;;  %v693_v58 = vpop.f32.mrf.mxu2 }
 0x1d5   :  { %v4530_v33 = vpop.eup %3260  ;;  %v1706_v30 = vmul.f32 %v4516_v60, %v4467_v12  ;;  %v1476_v10 = vmul.f32 0.5, %v1475_v25  ;;  %v4540_v37 = vmul.f32 %v1688_v3, %v3898_v7  ;;  %v4544_v27 = vmul.f32 %v4511_v44, %v4511_v44 }
 0x1d6   :  { %3264 = vrcp.f32 %v4524_v48  ;;  %vm2045_vm2 = vcmask 31744   ;;  %vm1480_vm3 = vcmp.eq.f32.partialorder %v4430_v9, inf  ;;  %v1486_v52 = vmul.f32 %v4530_v33, %v4472_v29 }
 0x1d7   :  { %v1707_v15 = vsub.f32 1.0, %v1706_v30  ;;  %v1477_v51 = vsub.f32 1.5, %v1476_v10  ;;  %v2029_v32 = vmax.f32 %v2013_v36, 1e-08  ;;  %v1703_v20 = vsel %vm4496_vm14, %v1702_v41, %v1698_v46 }
 0x1d8   :  { %v1714_v7 = vand.u32 2147483647, %v4467_v12  ;;  %vm1482_vm4 = vcmp.eq.f32.partialorder %v4430_v9, 0.0  ;;  %v1366_v3 = vadd.f32 %v1350_v18, %v4206_v28  ;;  %v1982_v16 = vadd.f32 %v1966_v17, %v1950_v31  ;;  %v4563_v28 = vpop.f32.mrf.mxu0 }
 0x1d9   :  { %v1708_v63 = vmul.f32 %v4516_v60, %v1707_v15  ;;  %v1478_v45 = vmul.f32 %v3255_v42, %v1477_v51  ;;  %v1487_v54 = vmul.f32 %v4530_v33, %v1486_v52  ;;  %v2046_v25 = vsel %vm2045_vm2, %v2029_v32, 0.0 }
 0x1da   :  { %v3263_v50 = vpop.eup %3262  ;;  %vm1710_vm5 = vweird.f32 %v4467_v12  ;;  %v1716_v23 = vand.u32 2147483648, %v4467_v12  ;;  %v1483_v41 = vand.u32 2147483648, %v4430_v9  ;;  %2047 = vadd.xlane.f32.xlu2 %v2046_v25  ;;  %v4561_v13 = vmax.f32 %v1366_v3, 1e-08 }
 0x1db   :  { %v4566_v18 = vmul.f32 %v1703_v20, %v3813_v5  ;;  %v4569_v42 = vmul.f32 %v1703_v20, %v3911_v49  ;;  %v4572_v31 = vmul.f32 %v1703_v20, %v6252_v2  ;;  %v4574_v17 = vadd.f32 1.0, %v3263_v50 }
 0x1dc   :  { %v4576_v46 = vpop.eup %3264  ;;  %vm1711_vm6 = vweird.f32 %v4516_v60  ;;  %vm4579_vm7 = vcmp.eq.f32.partialorder %v1714_v7, 8.507059e+37  ;;  %v1479_v10 = vmul.f32 %v1478_v45, %v4430_v9  ;;  %v1488_v5 = vmul.f32 0.5, %v1487_v54 }
 0x1dd   :  { %6253 = vst [vmem:[#allocation15_spill] sm:$0xff] %v4572_v31  ;;  %3266 = vrsqrt.f32 %v4561_v13  ;;  %v1709_v49 = vadd.f32 %v4516_v60, %v1708_v63  ;;  %v1721_v36 = vmul.f32 %v4576_v46, %v4524_v48  ;;  %v2014_v15 = vadd.f32 %v4494_v61, %v1982_v16  ;;  %vm4603_vm10 = vmor %vm1710_vm5, %vm1711_vm6 }
 0x1de   :  { %3268 = vrcp.f32 %v4574_v17  ;;  %v1717_v51 = vor.u32 1.1754944e-38, %v1716_v23  ;;  %vm1492_vm8 = vcmp.eq.f32.partialorder %v4472_v29, inf  ;;  %v906_v52 = vmul.f32 %v758_v62, %v693_v58 }
 0x1df   :  { %v1351_v32 = vmul.f32 %v4563_v28, %v4563_v28  ;;  %v4595_v20 = vmul.f32 %v4572_v31, %v4572_v31  ;;  %v1722_v7 = vsub.f32 1.0, %v1721_v36  ;;  %vm1494_vm9 = vcmp.eq.f32.partialorder %v4472_v29, 0.0 }
 0x1e0   :  { %v1495_v3 = vand.u32 2147483648, %v4472_v29  ;;  %v1729_v16 = vand.u32 2147483647, %v4524_v48  ;;  %v1731_v58 = vand.u32 2147483648, %v4524_v48  ;;  %v1481_v62 = vsel %vm1480_vm3, %v4430_v9, %v1479_v10  ;;  %v696_v10 = vpop.f32.mrf.mxu2 }
 0x1e1   :  { %v1489_v63 = vsub.f32 1.5, %v1488_v5  ;;  %v1713_v45 = vsel %vm4603_vm10, %v4516_v60, %v1709_v49  ;;  %v1723_v54 = vmul.f32 %v4576_v46, %v1722_v7  ;;  %v1484_v12 = vsel %vm1482_vm4, %v1483_v41, %v1481_v62  ;;  %v761_v5 = vpop.f32.mrf.mxu3 }
 0x1e2   :  { %v2030_v25 = vmax.f32 %v2014_v15, 1e-08  ;;  %v3202_v23 = vmul.f32 -1.442695, %v1484_v12  ;;  %v922_v36 = vadd.f32 %v906_v52, %v4244_v38  ;;  %v1367_v44 = vadd.f32 %v1351_v32, %v4241_v22  ;;  %v4632_v38 = vpop.f32.mrf.mxu0 }
 0x1e3   :  { %v3267_v50 = vpop.eup %3266  ;;  %v1490_v2 = vmul.f32 %v4530_v33, %v1489_v63  ;;  %v1724_v60 = vadd.f32 %v4576_v46, %v1723_v54  ;;  %vm1726_vm11 = vweird.f32 %v4576_v46  ;;  %vm1725_vm12 = vweird.f32 %v4524_v48 }
 0x1e4   :  { %v4621_v31 = vpop.eup %3268  ;;  %v1498_v9 = vmul.f32 %v3267_v50, %v4561_v13  ;;  %v2049_v41 = vsel %vm2045_vm2, %v2030_v25, 0.0  ;;  %3270 = vpow2.f32 %v3202_v23  ;;  %3157 = vmatmul.msk.f32.gmra.mxu1 %vm74_vm0, %v922_v36  ;;  %v1718_v49 = vsel %vm4579_vm7, %v1717_v51, %v1713_v45  ;;  %vm4642_vm14 = vmor %vm1725_vm12, %vm1726_vm11 }
 0x1e5   :  { %v1736_v33 = vmul.f32 %v4621_v31, %v4574_v17  ;;  %v1491_v22 = vmul.f32 %v1490_v2, %v4472_v29  ;;  %2050 = vadd.xlane.f32.xlu0 %v2049_v41  ;;  %vm4636_vm13 = vcmp.eq.f32.partialorder %v1729_v16, 8.507059e+37  ;;  %v4640_v48 = vmax.f32 %v1367_v44, 1e-08 }
 0x1e6   :  { %v1499_v52 = vmul.f32 %v3267_v50, %v1498_v9  ;;  %v1951_v30 = vmul.f32 %v4508_v53, %v4508_v53  ;;  %v1967_v51 = vmul.f32 %v4540_v37, %v4540_v37  ;;  %v1728_v44 = vsel %vm4642_vm14, %v4576_v46, %v1724_v60 }
 0x1e7   :  { %v1737_v7 = vsub.f32 1.0, %v1736_v33  ;;  %v1493_v61 = vsel %vm1492_vm8, %v4472_v29, %v1491_v22  ;;  %v1732_v16 = vor.u32 1.1754944e-38, %v1731_v58  ;;  %v907_v63 = vmul.f32 %v761_v5, %v696_v10 }
 0x1e8   :  { %v1496_v62 = vsel %vm1494_vm9, %v1495_v3, %v1493_v61  ;;  %v1500_v12 = vmul.f32 0.5, %v1499_v52  ;;  %vm1504_vm15 = vcmp.eq.f32.partialorder %v4561_v13, inf  ;;  %3272 = vrsqrt.f32 %v4640_v48  ;;  %v699_v22 = vpop.f32.mrf.mxu2  ;;  %v6262_v52 = vld [vmem:[#allocation2_spill] sm:$0xff] }
 0x1e9   :  { %v1738_v45 = vmul.f32 %v4621_v31, %v1737_v7  ;;  %v3203_v54 = vmul.f32 -1.442695, %v1496_v62  ;;  %v4662_v25 = vmul.f32 %v1718_v49, %v4170_v1  ;;  %vm1741_vm1 = vweird.f32 %v4621_v31  ;;  %v764_v15 = vpop.f32.mrf.mxu3 }
 0x1ea   :  { %v1744_v46 = vand.u32 2147483647, %v4574_v17  ;;  %v1746_v58 = vand.u32 2147483648, %v4574_v17  ;;  %vm1506_vm3 = vcmp.eq.f32.partialorder %v4561_v13, 0.0  ;;  %v3271_v29 = vpop.eup %3270  ;;  %v1733_v3 = vsel %vm4636_vm13, %v1732_v16, %v1728_v44  ;;  %v4698_v44 = vpop.f32.mrf.mxu0 }
 0x1eb   :  { %3274 = vpow2.f32 %v3203_v54  ;;  %v1501_v23 = vsub.f32 1.5, %v1500_v12  ;;  %v1983_v2 = vadd.f32 %v1967_v51, %v1951_v30  ;;  %v1739_v36 = vadd.f32 %v4621_v31, %v1738_v45  ;;  %v6268_v45 = vld [vmem:[#allocation3_spill] sm:$0xff] }
 0x1ec   :  { %v4671_v10 = vadd.f32 1.0, %v3271_v29  ;;  %v923_v1 = vadd.f32 %v907_v63, %v4259_v39  ;;  %v1352_v5 = vmul.f32 %v4632_v38, %v4632_v38  ;;  %v1952_v41 = vmul.f32 %v4566_v18, %v4566_v18 }
 0x1ed   :  { %v1502_v60 = vmul.f32 %v3267_v50, %v1501_v23  ;;  %v2015_v9 = vadd.f32 %v4544_v27, %v1983_v2  ;;  %v1968_v33 = vmul.f32 %v4569_v42, %v4569_v42  ;;  %v4682_v32 = vmul.f32 %v1718_v49, %v6262_v52  ;;  %v6263_v50 = vld [vmem:[#allocation20_spill] sm:$0xff] }
 0x1ee   :  { %vm1740_vm4 = vweird.f32 %v4574_v17  ;;  %3276 = vrcp.f32 %v4671_v10  ;;  %v1507_v39 = vand.u32 2147483648, %v4561_v13  ;;  %3158 = vmatmul.msk.f32.gmra.mxu1 %vm74_vm0, %v923_v1  ;;  %v3273_v27 = vpop.eup %3272  ;;  %v4689_v7 = vmul.f32 %v1718_v49, %v6263_v50 }
 0x1ef   :  { %v4692_v61 = vmul.f32 %v1733_v3, %v4219_v8  ;;  %vm4694_vm5 = vcmp.eq.f32.partialorder %v1744_v46, 8.507059e+37  ;;  %v1747_v51 = vor.u32 1.1754944e-38, %v1746_v58  ;;  %v4702_v17 = vmul.f32 %v4662_v25, %v4662_v25  ;;  %vm4706_vm6 = vmor %vm1740_vm4, %vm1741_vm1 }
 0x1f0   :  { %v1503_v8 = vmul.f32 %v1502_v60, %v4561_v13  ;;  %v1510_v49 = vmul.f32 %v3273_v27, %v4640_v48  ;;  %v2031_v62 = vmax.f32 %v2015_v9, 1e-08  ;;  %v4713_v54 = vmul.f32 %v1733_v3, %v6268_v45  ;;  %v6269_v60 = vld [vmem:[#allocation24_spill] sm:$0xff] }
 0x1f1   :  { %v3275_v63 = vpop.eup %3274  ;;  %v1743_v12 = vsel %vm4706_vm6, %v4621_v31, %v1739_v36  ;;  %v1368_v46 = vadd.f32 %v1352_v5, %v4253_v40  ;;  %v1984_v58 = vadd.f32 %v1968_v33, %v1952_v41  ;;  %v4726_v9 = vmul.f32 %v1733_v3, %v6269_v60  ;;  %v839_v31 = vld [vmem:[%s6093_s7 + $0x8] sm:$0xff]  ;;  %v767_v30 = vpop.f32.mrf.mxu3 }
 0x1f2   :  { %v4719_v29 = vadd.f32 1.0, %v3275_v63  ;;  %v1505_v23 = vsel %vm1504_vm15, %v4561_v13, %v1503_v8  ;;  %v1511_v2 = vmul.f32 %v3273_v27, %v1510_v49  ;;  %v2052_v1 = vsel %vm2045_vm2, %v2031_v62, 0.0  ;;  %1223 = vmatpush.msra.mxu3 %v839_v31 }
 0x1f3   :  { %v4730_v52 = vmul.f32 %v4692_v61, %v4692_v61  ;;  %v1508_v40 = vsel %vm1506_vm3, %v1507_v39, %v1505_v23  ;;  %2053 = vadd.xlane.f32.xlu1 %v2052_v1  ;;  %v4737_v36 = vmax.f32 %v1368_v46, 1e-08  ;;  %vm1516_vm7 = vcmp.eq.f32.partialorder %v4640_v48, inf  ;;  %v4762_v23 = vpop.f32.mrf.mxu0 }
 0x1f4   :  { %v4739_v5 = vpop.eup %3276  ;;  %3278 = vrcp.f32 %v4719_v29  ;;  %v2016_v3 = vadd.f32 %v4595_v20, %v1984_v58  ;;  %v908_v41 = vmul.f32 %v764_v15, %v699_v22  ;;  %v1748_v13 = vsel %vm4694_vm5, %v1747_v51, %v1743_v12  ;;  %v702_v15 = vpop.f32.mrf.mxu2 }
 0x1f5   :  { %v1751_v33 = vmul.f32 %v4739_v5, %v4671_v10  ;;  %v3204_v39 = vmul.f32 -1.442695, %v1508_v40  ;;  %v1512_v50 = vmul.f32 0.5, %v1511_v2  ;;  %vm1755_vm8 = vweird.f32 %v4671_v10 }
 0x1f6   :  { %vm1518_vm9 = vcmp.eq.f32.partialorder %v4640_v48, 0.0  ;;  %v1519_v16 = vand.u32 2147483648, %v4640_v48  ;;  %3280 = vrsqrt.f32 %v4737_v36  ;;  %v1759_v20 = vand.u32 2147483647, %v4671_v10 }
 0x1f7   :  { %v1752_v8 = vsub.f32 1.0, %v1751_v33  ;;  %3282 = vpow2.f32 %v3204_v39  ;;  %v1513_v22 = vsub.f32 1.5, %v1512_v50  ;;  %v4754_v51 = vmul.f32 %v1748_v13, %v4272_v14 }
 0x1f8   :  { %v2032_v49 = vmax.f32 %v2016_v3, 1e-08  ;;  %v924_v62 = vadd.f32 %v908_v41, %v4293_v43  ;;  %v1353_v63 = vmul.f32 %v4698_v44, %v4698_v44  ;;  %v1761_v12 = vand.u32 2147483648, %v4671_v10 }
 0x1f9   :  { %6270 = vst [vmem:[#allocation16_spill] sm:$0xff] %v4754_v51  ;;  %v1753_v45 = vmul.f32 %v4739_v5, %v1752_v8  ;;  %v1774_v46 = vand.u32 2147483647, %v4719_v29  ;;  %v1514_v58 = vmul.f32 %v3273_v27, %v1513_v22  ;;  %vm1756_vm10 = vweird.f32 %v4739_v5 }
 0x1fa   :  { %v4764_v2 = vpop.eup %3278  ;;  %v2055_v14 = vsel %vm2045_vm2, %v2032_v49, 0.0  ;;  %v1369_v43 = vadd.f32 %v1353_v63, %v4262_v24  ;;  %3159 = vmatmul.msk.f32.gmra.mxu1 %vm74_vm0, %v924_v62  ;;  %v909_v1 = vmul.f32 %v767_v30, %v702_v15  ;;  %v1776_v27 = vand.u32 2147483648, %v4719_v29  ;;  %vm4787_vm11 = vmor %vm1755_vm8, %vm1756_vm10 }
 0x1fb   :  { %v1754_v60 = vadd.f32 %v4739_v5, %v1753_v45  ;;  %v1766_v40 = vmul.f32 %v4764_v2, %v4719_v29  ;;  %v1515_v31 = vmul.f32 %v1514_v58, %v4640_v48  ;;  %2056 = vadd.xlane.f32.xlu2 %v2055_v14  ;;  %v1953_v33 = vmul.f32 %v4682_v32, %v4682_v32  ;;  %v6273_v45 = vld [vmem:[#allocation4_spill] sm:$0xff] }
 0x1fc   :  { %v3281_v3 = vpop.eup %3280  ;;  %v4775_v41 = vmax.f32 %v1369_v43, 1e-08  ;;  %v1969_v24 = vmul.f32 %v4689_v7, %v4689_v7  ;;  %v1354_v39 = vmul.f32 %v4762_v23, %v4762_v23  ;;  %v925_v49 = vadd.f32 %v909_v1, %v4310_v26  ;;  %v6274_v14 = vld [vmem:[#allocation28_spill] sm:$0xff]  ;;  %v4837_v8 = vpop.f32.mrf.mxu1 }
 0x1fd   :  { %v3283_v50 = vpop.eup %3282  ;;  %v1767_v22 = vsub.f32 1.0, %v1766_v40  ;;  %v1517_v15 = vsel %vm1516_vm7, %v4640_v48, %v1515_v31  ;;  %v1522_v30 = vmul.f32 %v3281_v3, %v4737_v36  ;;  %v1758_v62 = vsel %vm4787_vm11, %v4739_v5, %v1754_v60 }
 0x1fe   :  { %v4799_v63 = vadd.f32 1.0, %v3283_v50  ;;  %v1520_v10 = vsel %vm1518_vm9, %v1519_v16, %v1517_v15  ;;  %3284 = vrsqrt.f32 %v4775_v41  ;;  %v4805_v58 = vmul.f32 %v1748_v13, %v6273_v45 }
 0x1ff   :  { %v4808_v43 = vmul.f32 %v1748_v13, %v6274_v14  ;;  %v1762_v40 = vor.u32 1.1754944e-38, %v1761_v12  ;;  %v1768_v26 = vmul.f32 %v4764_v2, %v1767_v22  ;;  %vm1760_vm12 = vcmp.eq.f32.partialorder %v1759_v20, 8.507059e+37  ;;  %v6278_v22 = vld [vmem:[#allocation5_spill] sm:$0xff] }
 0x200   :  { %3286 = vrcp.f32 %v4799_v63  ;;  %v1985_v5 = vadd.f32 %v1969_v24, %v1953_v33  ;;  %v1370_v1 = vadd.f32 %v1354_v39, %v4301_v59  ;;  %v4815_v48 = vmul.f32 %v4754_v51, %v4754_v51  ;;  %v838_v33 = vld [vmem:[%s6093_s7] sm:$0xff] }
 0x201   :  { %v1763_v16 = vsel %vm1760_vm12, %v1762_v40, %v1758_v62  ;;  %v3205_v60 = vmul.f32 -1.442695, %v1520_v10  ;;  %v1523_v31 = vmul.f32 %v3281_v3, %v1522_v30  ;;  %vm1770_vm13 = vweird.f32 %v4719_v29  ;;  %1224 = vmatpush.msra.mxu3 %v838_v33  ;;  %v6279_v30 = vld [vmem:[#allocation33_spill] sm:$0xff] }
 0x202   :  { %vm4818_vm14 = vcmp.eq.f32.partialorder %v1774_v46, 8.507059e+37  ;;  %v1777_v12 = vor.u32 1.1754944e-38, %v1776_v27  ;;  %vm1528_vm15 = vcmp.eq.f32.partialorder %v4737_v36, inf  ;;  %3160 = vmatmul.msk.f32.gmra.mxu1 %vm74_vm0, %v925_v49  ;;  %v1769_v59 = vadd.f32 %v4764_v2, %v1768_v26  ;;  %v705_v26 = vpop.f32.mrf.mxu2 }
 0x203   :  { %vm1771_vm1 = vweird.f32 %v4764_v2  ;;  %3288 = vpow2.f32 %v3205_v60  ;;  %v1524_v20 = vmul.f32 0.5, %v1523_v31  ;;  %v4830_v46 = vmul.f32 %v1763_v16, %v4337_v35  ;;  %v4867_v31 = vpop.f32.mrf.mxu0 }
 0x204   :  { %v3285_v24 = vpop.eup %3284  ;;  %v1791_v27 = vand.u32 2147483648, %v4799_v63  ;;  %vm1530_vm3 = vcmp.eq.f32.partialorder %v4737_v36, 0.0  ;;  %v2017_v39 = vadd.f32 %v4702_v17, %v1985_v5  ;;  %v4835_v50 = vmax.f32 %v1370_v1, 1e-08  ;;  %vm4852_vm4 = vmor %vm1770_vm13, %vm1771_vm1  ;;  %v770_v5 = vpop.f32.mrf.mxu3 }
 0x205   :  { %6277 = vst [vmem:[#allocation18_spill] sm:$0xff] %v4830_v46  ;;  %v4840_v15 = vmul.f32 %v1763_v16, %v6278_v22  ;;  %v4843_v49 = vmul.f32 %v1763_v16, %v6279_v30  ;;  %v1525_v62 = vsub.f32 1.5, %v1524_v20  ;;  %v1531_v35 = vand.u32 2147483648, %v4737_v36 }
 0x206   :  { %v4846_v10 = vpop.eup %3286  ;;  %v1789_v45 = vand.u32 2147483647, %v4799_v63  ;;  %v1534_v14 = vmul.f32 %v3285_v24, %v4775_v41  ;;  %v2033_v40 = vmax.f32 %v2017_v39, 1e-08  ;;  %3290 = vrsqrt.f32 %v4835_v50 }
 0x207   :  { %v1773_v1 = vsel %vm4852_vm4, %v4764_v2, %v1769_v59  ;;  %v1781_v29 = vmul.f32 %v4846_v10, %v4799_v63  ;;  %vm1785_vm5 = vweird.f32 %v4799_v63  ;;  %v1526_v16 = vmul.f32 %v3281_v3, %v1525_v62 }
 0x208   :  { %v1954_v60 = vmul.f32 %v4713_v54, %v4713_v54  ;;  %v4871_v20 = vmul.f32 %v4830_v46, %v4830_v46  ;;  %v4873_v33 = vor.u32 1.1754944e-38, %v1791_v27  ;;  %v1535_v39 = vmul.f32 %v3285_v24, %v1534_v14 }
 0x209   :  { %v2058_v2 = vsel %vm2045_vm2, %v2033_v40, 0.0  ;;  %v3289_v59 = vpop.eup %3288  ;;  %v1782_v22 = vsub.f32 1.0, %v1781_v29  ;;  %v1527_v30 = vmul.f32 %v1526_v16, %v4737_v36  ;;  %v1970_v3 = vmul.f32 %v4726_v9, %v4726_v9 }
 0x20a   :  { %2059 = vadd.xlane.f32.xlu2 %v2058_v2  ;;  %v910_v62 = vmul.f32 %v770_v5, %v705_v26  ;;  %v1778_v17 = vsel %vm4818_vm14, %v1777_v12, %v1773_v1  ;;  %v4881_v51 = vadd.f32 1.0, %v3289_v59  ;;  %v1536_v46 = vmul.f32 0.5, %v1535_v39 }
 0x20b   :  { %vm1540_vm6 = vcmp.eq.f32.partialorder %v4775_v41, inf  ;;  %v1355_v27 = vmul.f32 %v4867_v31, %v4867_v31  ;;  %v1783_v14 = vmul.f32 %v4846_v10, %v1782_v22  ;;  %v1529_v40 = vsel %vm1528_vm15, %v4737_v36, %v1527_v30  ;;  %v4910_v30 = vpop.f32.mrf.mxu1 }
 0x20c   :  { %v1986_v29 = vadd.f32 %v1970_v3, %v1954_v60  ;;  %v926_v26 = vadd.f32 %v910_v62, %v4316_v0  ;;  %v3291_v5 = vpop.eup %3290  ;;  %vm1786_vm7 = vweird.f32 %v4846_v10  ;;  %vm4892_vm8 = vcmp.eq.f32.partialorder %v1789_v45, 8.507059e+37  ;;  %v6284_v45 = vld [vmem:[#allocation6_spill] sm:$0xff]  ;;  %v6286_v3 = vld [vmem:[#allocation37_spill] sm:$0xff] }
 0x20d   :  { %3292 = vrcp.f32 %v4881_v51  ;;  %vm1542_vm9 = vcmp.eq.f32.partialorder %v4775_v41, 0.0  ;;  %v1543_v12 = vand.u32 2147483648, %v4775_v41  ;;  %v1784_v1 = vadd.f32 %v4846_v10, %v1783_v14  ;;  %vm4923_vm10 = vmor %vm1785_vm5, %vm1786_vm7 }
 0x20e   :  { %v1532_v16 = vsel %vm1530_vm3, %v1531_v35, %v1529_v40  ;;  %v1537_v60 = vsub.f32 1.5, %v1536_v46  ;;  %v1546_v0 = vmul.f32 %v3291_v5, %v4835_v50  ;;  %3161 = vmatmul.msk.f32.gmra.mxu1 %vm74_vm0, %v926_v26  ;;  %v4905_v39 = vmul.f32 %v1778_v17, %v6284_v45  ;;  %v4950_v45 = vpop.f32.mrf.mxu0 }
 0x20f   :  { %v3206_v2 = vmul.f32 -1.442695, %v1532_v16  ;;  %v2018_v59 = vadd.f32 %v4730_v52, %v1986_v29  ;;  %v1955_v22 = vmul.f32 %v4805_v58, %v4805_v58  ;;  %v4913_v62 = vmul.f32 %v1778_v17, %v6286_v3 }
 0x210   :  { %6285 = vst [vmem:[#allocation19_spill] sm:$0xff] %v4905_v39  ;;  %v1538_v36 = vmul.f32 %v3285_v24, %v1537_v60  ;;  %v1547_v46 = vmul.f32 %v3291_v5, %v1546_v0  ;;  %v1371_v35 = vadd.f32 %v1355_v27, %v4313_v6  ;;  %v4917_v14 = vmul.f32 %v1778_v17, %v4413_v34  ;;  %v4942_v60 = vld [vmem:[%s6091_s6] ss:$0 sm:$0xff] }
 0x211   :  { %3294 = vpow2.f32 %v3206_v2  ;;  %v2034_v40 = vmax.f32 %v2018_v59, 1e-08  ;;  %v1971_v29 = vmul.f32 %v4808_v43, %v4808_v43  ;;  %v1788_v6 = vsel %vm4923_vm10, %v4846_v10, %v1784_v1 }
 0x212   :  { %6287 = vst [vmem:[#allocation21_spill] sm:$0xff] %v4917_v14  ;;  %v1804_v34 = vand.u32 2147483647, %v4881_v51  ;;  %v1539_v24 = vmul.f32 %v1538_v36, %v4775_v41  ;;  %vm1552_vm11 = vcmp.eq.f32.partialorder %v4835_v50, inf  ;;  %v1548_v17 = vmul.f32 0.5, %v1547_v46 }
 0x213   :  { %v3293_v63 = vpop.eup %3292  ;;  %vm1554_vm12 = vcmp.eq.f32.partialorder %v4835_v50, 0.0  ;;  %v2061_v27 = vsel %vm2045_vm2, %v2034_v40, 0.0  ;;  %v4937_v26 = vmax.f32 %v1371_v35, 1e-08  ;;  %v1987_v16 = vadd.f32 %v1971_v29, %v1955_v22 }
 0x214   :  { %v1796_v10 = vmul.f32 %v3293_v63, %v4881_v51  ;;  %vm1800_vm13 = vweird.f32 %v4881_v51  ;;  %v1541_v1 = vsel %vm1540_vm6, %v4775_v41, %v1539_v24  ;;  %v1555_v0 = vand.u32 2147483648, %v4835_v50  ;;  %2062 = vadd.xlane.f32.xlu0 %v2061_v27 }
 0x215   :  { %v1806_v2 = vand.u32 2147483648, %v4881_v51  ;;  %v1544_v59 = vsel %vm1542_vm9, %v1543_v12, %v1541_v1  ;;  %v1549_v22 = vsub.f32 1.5, %v1548_v17  ;;  %3296 = vrsqrt.f32 %v4937_v26 }
 0x216   :  { %v1793_v3 = vsel %vm4892_vm8, %v4873_v33, %v1788_v6  ;;  %v1797_v36 = vsub.f32 1.0, %v1796_v10  ;;  %vm4959_vm14 = vcmp.eq.f32.partialorder %v1804_v34, 8.507059e+37  ;;  %v3207_v35 = vmul.f32 -1.442695, %v1544_v59 }
 0x217   :  { %v3295_v52 = vpop.eup %3294  ;;  %v1550_v40 = vmul.f32 %v3291_v5, %v1549_v22  ;;  %v2019_v29 = vadd.f32 %v4815_v48, %v1987_v16  ;;  %v1356_v41 = vmul.f32 %v4950_v45, %v4950_v45  ;;  %v996_v12 = vadd.f32 %v4942_v60, %v4837_v8  ;;  %v4973_v48 = vpop.f32.mrf.mxu1 }
 0x218   :  { %v1798_v24 = vmul.f32 %v3293_v63, %v1797_v36  ;;  %vm1801_vm15 = vweird.f32 %v3293_v63  ;;  %v4968_v13 = vadd.f32 1.0, %v3295_v52  ;;  %3298 = vpow2.f32 %v3207_v35 }
 0x219   :  { %v1807_v33 = vor.u32 1.1754944e-38, %v1806_v2  ;;  %v1551_v6 = vmul.f32 %v1550_v40, %v4835_v50  ;;  %v2035_v34 = vmax.f32 %v2019_v29, 1e-08  ;;  %v1372_v17 = vadd.f32 %v1356_v41, %v4321_v47  ;;  %3162 = vmatmul.msk.f32.vlgmr.msra.gmra.mxu2 %vm74_vm0, %v996_v12  ;;  %vm1802_vm1 = vmor %vm1800_vm13, %vm1801_vm15  ;;  %v6293_v29 = vld [vmem:[#allocation8_spill] sm:$0xff] }
 0x21a   :  { %v4976_v5 = vmul.f32 %v1793_v3, %v4500_v21  ;;  %v1799_v27 = vadd.f32 %v3293_v63, %v1798_v24  ;;  %3300 = vrcp.f32 %v4968_v13  ;;  %v1956_v8 = vmul.f32 %v4840_v15, %v4840_v15 }
 0x21b   :  { %v3297_v16 = vpop.eup %3296  ;;  %v1553_v47 = vsel %vm1552_vm11, %v4835_v50, %v1551_v6  ;;  %v2064_v10 = vsel %vm2045_vm2, %v2035_v34, 0.0  ;;  %v4987_v1 = vmax.f32 %v1372_v17, 1e-08  ;;  %v1972_v21 = vmul.f32 %v4843_v49, %v4843_v49  ;;  %v6295_v50 = vld [vmem:[#allocation40_spill] sm:$0xff] }
 0x21c   :  { %6292 = vst [vmem:[#allocation22_spill] sm:$0xff] %v4976_v5  ;;  %v1803_v2 = vsel %vm1802_vm1, %v3293_v63, %v1799_v27  ;;  %v1819_v59 = vand.u32 2147483647, %v4968_v13  ;;  %v1556_v22 = vsel %vm1554_vm12, %v1555_v0, %v1553_v47  ;;  %v1558_v51 = vmul.f32 %v3297_v16, %v4937_v26  ;;  %2065 = vadd.xlane.f32.xlu1 %v2064_v10  ;;  %v41_v10 = vld [vmem:[%s6094_s0] sm:$0xff] }
 0x21d   :  { %v1808_v36 = vsel %vm4959_vm14, %v1807_v33, %v1803_v2  ;;  %v1821_v35 = vand.u32 2147483648, %v4968_v13  ;;  %v3208_v52 = vmul.f32 -1.442695, %v1556_v22  ;;  %3302 = vrsqrt.f32 %v4987_v1  ;;  %v6300_v22 = vld [vmem:[#allocation11_spill] sm:$0xff] }
 0x21e   :  { %v3299_v40 = vpop.eup %3298  ;;  %v5001_v63 = vmul.f32 %v4917_v14, %v4917_v14  ;;  %v5004_v41 = vmul.f32 %v1793_v3, %v6293_v29  ;;  %v5007_v0 = vmul.f32 %v1793_v3, %v6295_v50  ;;  %v1559_v12 = vmul.f32 %v3297_v16, %v1558_v51 }
 0x21f   :  { %v5011_v46 = vmul.f32 %v4976_v5, %v4976_v5  ;;  %v5014_v24 = vmul.f32 %v1808_v36, %v4563_v28  ;;  %v5016_v33 = vadd.f32 1.0, %v3299_v40  ;;  %3304 = vpow2.f32 %v3208_v52  ;;  %v5031_v2 = vpop.f32.mrf.mxu1 }
 0x220   :  { %6294 = vst [vmem:[#allocation25_spill] sm:$0xff] %v5004_v41  ;;  %v3301_v6 = vpop.eup %3300  ;;  %vm1815_vm3 = vweird.f32 %v4968_v13  ;;  %v1560_v34 = vmul.f32 0.5, %v1559_v12  ;;  %vm1564_vm4 = vcmp.eq.f32.partialorder %v4937_v26, inf  ;;  %v1567_v3 = vand.u32 2147483648, %v4937_v26 }
 0x221   :  { %6296 = vst [vmem:[#allocation26_spill] sm:$0xff] %v5007_v0  ;;  %v1988_v17 = vadd.f32 %v1972_v21, %v1956_v8  ;;  %v1811_v27 = vmul.f32 %v3301_v6, %v4968_v13  ;;  %vm5022_vm5 = vcmp.eq.f32.partialorder %v1819_v59, 8.507059e+37  ;;  %v1822_v28 = vor.u32 1.1754944e-38, %v1821_v35  ;;  %v6301_v8 = vld [vmem:[#allocation41_spill] sm:$0xff]  ;;  %v42_v13 = vld [vmem:[%s6094_s0 + $0x8] sm:$0xff] }
 0x222   :  { %6297 = vst [vmem:[#allocation29_spill] sm:$0xff] %v5014_v24  ;;  %3306 = vrcp.f32 %v5016_v33  ;;  %vm1566_vm6 = vcmp.eq.f32.partialorder %v4937_v26, 0.0  ;;  %v5034_v51 = vmul.f32 %v1808_v36, %v6300_v22  ;;  %v5037_v21 = vmul.f32 %v1808_v36, %v6301_v8 }
 0x223   :  { %v1561_v59 = vsub.f32 1.5, %v1560_v34  ;;  %v2020_v52 = vadd.f32 %v4871_v20, %v1988_v17  ;;  %v5040_v35 = vpop.eup %3302  ;;  %v5044_v40 = vmul.f32 %v5014_v24, %v5014_v24  ;;  %v1812_v29 = vsub.f32 1.0, %v1811_v27 }
 0x224   :  { %vm1156_vm7 = vcmask 138240   ;;  %v999_v50 = vadd.f32 %v4942_v60, %v4910_v30  ;;  %v1570_v22 = vmul.f32 %v5040_v35, %v4987_v1  ;;  %v1957_v20 = vmul.f32 %v4905_v39, %v4905_v39 }
 0x225   :  { %v1562_v12 = vmul.f32 %v3297_v16, %v1561_v59  ;;  %3179 = vmatmul.msk.f32.vlgmr.msra.gmra.mxu3 %vm1156_vm7, %v41_v10  ;;  %v3305_v34 = vpop.eup %3304  ;;  %v1813_v17 = vmul.f32 %v3301_v6, %v1812_v29  ;;  %vm1816_vm8 = vweird.f32 %v3301_v6  ;;  %v2036_v8 = vmax.f32 %v2020_v52, 1e-08 }
 0x226   :  { %v1973_v27 = vmul.f32 %v4913_v62, %v4913_v62  ;;  %3163 = vmatmul.msk.f32.gmra.mxu2 %vm74_vm0, %v999_v50  ;;  %vm1830_vm9 = vweird.f32 %v5016_v33  ;;  %v1834_v30 = vand.u32 2147483647, %v5016_v33  ;;  %v5059_v16 = vadd.f32 1.0, %v3305_v34  ;;  %vm1817_vm10 = vmor %vm1815_vm3, %vm1816_vm8 }
 0x227   :  { %v1563_v10 = vmul.f32 %v1562_v12, %v4937_v26  ;;  %v1571_v59 = vmul.f32 %v5040_v35, %v1570_v22  ;;  %v1814_v24 = vadd.f32 %v3301_v6, %v1813_v17  ;;  %v1836_v29 = vand.u32 2147483648, %v5016_v33 }
 0x228   :  { %v3307_v36 = vpop.eup %3306  ;;  %v2067_v52 = vsel %vm2045_vm2, %v2036_v8, 0.0  ;;  %v1002_v5 = vadd.f32 %v4942_v60, %v4973_v48  ;;  %3308 = vrcp.f32 %v5059_v16  ;;  %v1989_v12 = vadd.f32 %v1973_v27, %v1957_v20  ;;  %v5083_v20 = vpop.f32.mrf.mxu1 }
 0x229   :  { %v1826_v50 = vmul.f32 %v3307_v36, %v5016_v33  ;;  %2068 = vadd.xlane.f32.xlu2 %v2067_v52  ;;  %v1958_v22 = vmul.f32 %v5004_v41, %v5004_v41  ;;  %v1818_v34 = vsel %vm1817_vm10, %v3301_v6, %v1814_v24  ;;  %v1851_v17 = vand.u32 2147483648, %v5059_v16  ;;  %v6304_v41 = vld [vmem:[#allocation14_spill] sm:$0xff] }
 0x22a   :  { %v1565_v8 = vsel %vm1564_vm4, %v4937_v26, %v1563_v10  ;;  %vm1576_vm11 = vcmp.eq.f32.partialorder %v4987_v1, inf  ;;  %v1974_v48 = vmul.f32 %v5007_v0, %v5007_v0  ;;  %v1823_v24 = vsel %vm5022_vm5, %v1822_v28, %v1818_v34  ;;  %v6305_v26 = vld [vmem:[#allocation42_spill] sm:$0xff] }
 0x22b   :  { %v1827_v6 = vsub.f32 1.0, %v1826_v50  ;;  %v1568_v27 = vsel %vm1566_vm6, %v1567_v3, %v1565_v8  ;;  %v1572_v52 = vmul.f32 0.5, %v1571_v59  ;;  %vm1578_vm12 = vcmp.eq.f32.partialorder %v4987_v1, 0.0 }
 0x22c   :  { %vm1831_vm13 = vweird.f32 %v3307_v36  ;;  %vm5090_vm14 = vcmp.eq.f32.partialorder %v1834_v30, 8.507059e+37  ;;  %v1837_v39 = vor.u32 1.1754944e-38, %v1836_v29  ;;  %v1849_v0 = vand.u32 2147483647, %v5059_v16 }
 0x22d   :  { %v5096_v14 = vmul.f32 %v1823_v24, %v6304_v41  ;;  %v1828_v47 = vmul.f32 %v3307_v36, %v1827_v6  ;;  %v3209_v28 = vmul.f32 -1.442695, %v1568_v27  ;;  %v1573_v50 = vsub.f32 1.5, %v1572_v52  ;;  %3180 = vmatmul.msk.f32.gmra.mxu3 %vm1156_vm7, %v42_v13  ;;  %vm1832_vm1 = vmor %vm1830_vm9, %vm1831_vm13  ;;  %v6306_v52 = vld [vmem:[#allocation17_spill] sm:$0xff] }
 0x22e   :  { %v5100_v3 = vmul.f32 %v1823_v24, %v6305_v26  ;;  %v5103_v59 = vmul.f32 %v1823_v24, %v4632_v38  ;;  %vm1845_vm15 = vweird.f32 %v5059_v16  ;;  %v2021_v30 = vadd.f32 %v5001_v63, %v1989_v12  ;;  %3164 = vmatmul.msk.f32.gmra.mxu2 %vm74_vm0, %v1002_v5  ;;  %v3309_v41 = vpop.eup %3308 }
 0x22f   :  { %v1990_v29 = vadd.f32 %v1974_v48, %v1958_v22  ;;  %v1829_v34 = vadd.f32 %v3307_v36, %v1828_v47  ;;  %v1852_v8 = vor.u32 1.1754944e-38, %v1851_v17  ;;  %3310 = vpow2.f32 %v3209_v28 }
 0x230   :  { %v1574_v6 = vmul.f32 %v5040_v35, %v1573_v50  ;;  %v1841_v38 = vmul.f32 %v3309_v41, %v5059_v16  ;;  %v2037_v13 = vmax.f32 %v2021_v30, 1e-08  ;;  %v1959_v63 = vmul.f32 %v5034_v51, %v5034_v51  ;;  %v6309_v16 = vld [vmem:[#allocation23_spill] sm:$0xff] }
 0x231   :  { %v2022_v24 = vadd.f32 %v5011_v46, %v1990_v29  ;;  %v1833_v12 = vsel %vm1832_vm1, %v3307_v36, %v1829_v34  ;;  %v1005_v22 = vadd.f32 %v4942_v60, %v5031_v2  ;;  %v1975_v35 = vmul.f32 %v5037_v21, %v5037_v21  ;;  %v43_v46 = vld [vmem:[%s6094_s0 + $0x10] sm:$0xff]  ;;  %v5127_v36 = vpop.f32.mrf.mxu1  ;;  %v6307_v2 = vld [vmem:[#allocation43_spill] sm:$0xff] }
 0x232   :  { %v1575_v5 = vmul.f32 %v1574_v6, %v4987_v1  ;;  %v1838_v33 = vsel %vm5090_vm14, %v1837_v39, %v1833_v12  ;;  %v1842_v17 = vsub.f32 1.0, %v1841_v38  ;;  %v2070_v48 = vsel %vm2045_vm2, %v2037_v13, 0.0 }
 0x233   :  { %v2038_v27 = vmax.f32 %v2022_v24, 1e-08  ;;  %v5130_v47 = vmul.f32 %v1838_v33, %v6306_v52  ;;  %v5133_v28 = vmul.f32 %v1838_v33, %v6307_v2  ;;  %vm1846_vm3 = vweird.f32 %v3309_v41  ;;  %2071 = vadd.xlane.f32.xlu0 %v2070_v48  ;;  %v6310_v52 = vld [vmem:[#allocation9_spill] sm:$0xff] }
 0x234   :  { %v1577_v39 = vsel %vm1576_vm11, %v4987_v1, %v1575_v5  ;;  %v1843_v10 = vmul.f32 %v3309_v41, %v1842_v17  ;;  %v6308_v50 = vand.u32 2147483648, %v4987_v1  ;;  %v1991_v29 = vadd.f32 %v1975_v35, %v1959_v63  ;;  %vm1847_vm4 = vmor %vm1845_vm15, %vm1846_vm3 }
 0x235   :  { %v2073_v30 = vsel %vm2045_vm2, %v2038_v27, 0.0  ;;  %v3311_v34 = vpop.eup %3310  ;;  %v2008_v6 = vmul.f32 %v5103_v59, %v5103_v59  ;;  %3181 = vmatmul.msk.f32.gmra.mxu3 %vm1156_vm7, %v43_v46  ;;  %v1960_v13 = vmul.f32 %v5096_v14, %v5096_v14  ;;  %v1976_v24 = vmul.f32 %v5100_v3, %v5100_v3 }
 0x236   :  { %v1580_v26 = vsel %vm1578_vm12, %v6308_v50, %v1577_v39  ;;  %2074 = vadd.xlane.f32.xlu1 %v2073_v30  ;;  %v5151_v1 = vmul.f32 %v1838_v33, %v4698_v44  ;;  %v1844_v12 = vadd.f32 %v3309_v41, %v1843_v10  ;;  %v5153_v5 = vadd.f32 1.0, %v3311_v34  ;;  %3165 = vmatmul.msk.f32.gmra.mxu2 %vm74_vm0, %v1005_v22  ;;  %v44_v39 = vld [vmem:[%s6094_s0 + $0x18] sm:$0xff] }
 0x237   :  { %v3210_v38 = vmul.f32 -1.442695, %v1580_v26  ;;  %v2023_v63 = vadd.f32 %v5044_v40, %v1991_v29  ;;  %v1992_v35 = vadd.f32 %v1976_v24, %v1960_v13  ;;  %v1961_v17 = vmul.f32 %v5130_v47, %v5130_v47 }
 0x238   :  { %v1977_v44 = vmul.f32 %v5133_v28, %v5133_v28  ;;  %v1848_v33 = vsel %vm1847_vm4, %v3309_v41, %v1844_v12  ;;  %vm1850_vm5 = vcmp.eq.f32.partialorder %v1849_v0, 8.507059e+37  ;;  %v2009_v22 = vmul.f32 %v5151_v1, %v5151_v1 }
 0x239   :  { %3312 = vpow2.f32 %v3210_v38  ;;  %v1853_v48 = vsel %vm1850_vm5, %v1852_v8, %v1848_v33  ;;  %v2039_v40 = vmax.f32 %v2023_v63, 1e-08  ;;  %v2024_v27 = vadd.f32 %v2008_v6, %v1992_v35  ;;  %v1013_v41 = vpop.f32.mrf.mxu1 }
 0x23a   :  { %3314 = vrcp.f32 %v5153_v5  ;;  %v5168_v46 = vmul.f32 %v1853_v48, %v6309_v16  ;;  %v5171_v2 = vmul.f32 %v1853_v48, %v6310_v52  ;;  %v1008_v0 = vadd.f32 %v4942_v60, %v5083_v20 }
 0x23b   :  { %v5179_v8 = vmul.f32 %v1853_v48, %v4762_v23  ;;  %v2076_v10 = vsel %vm2045_vm2, %v2039_v40, 0.0  ;;  %v2040_v50 = vmax.f32 %v2024_v27, 1e-08  ;;  %v1993_v26 = vadd.f32 %v1977_v44, %v1961_v17  ;;  %v45_v40 = vld [vmem:[%s6094_s0 + $0x20] sm:$0xff] }
 0x23c   :  { %2077 = vadd.xlane.f32.xlu2 %v2076_v10  ;;  %v1962_v30 = vmul.f32 %v5168_v46, %v5168_v46  ;;  %v1978_v29 = vmul.f32 %v5171_v2, %v5171_v2  ;;  %v3388_v24 = vmov 4.0   ;;  %v1866_v48 = vand.u32 2147483648, %v5153_v5 }
 0x23d   :  { %3182 = vmatmul.msk.f32.gmra.mxu3 %vm1156_vm7, %v44_v39  ;;  %v2079_v20 = vsel %vm2045_vm2, %v2040_v50, 0.0  ;;  %v2025_v6 = vadd.f32 %v2009_v22, %v1993_v26  ;;  %3316 = vrcp.f32 %v3388_v24  ;;  %v2010_v12 = vmul.f32 %v5179_v8, %v5179_v8 }
 0x23e   :  { %2080 = vadd.xlane.f32.xlu0 %v2079_v20  ;;  %3166 = vmatmul.msk.f32.gmra.mxu2 %vm74_vm0, %v1008_v0  ;;  %v1994_v13 = vadd.f32 %v1978_v29, %v1962_v30  ;;  %v1011_v27 = vadd.f32 %v4942_v60, %v5127_v36  ;;  %v1864_v52 = vand.u32 2147483647, %v5153_v5  ;;  %vm1860_vm8 = vweird.f32 %v5153_v5 }
 0x23f   :  { %v3313_v34 = vpop.eup %3312  ;;  %v2041_v35 = vmax.f32 %v2025_v6, 1e-08  ;;  %v1867_v29 = vor.u32 1.1754944e-38, %v1866_v48 }
 0x240   :  { %v3315_v38 = vpop.eup %3314  ;;  %v5188_v23 = vadd.f32 1.0, %v3313_v34  ;;  %v2026_v33 = vadd.f32 %v2010_v12, %v1994_v13  ;;  %vm1865_vm10 = vcmp.eq.f32.partialorder %v1864_v52, 8.507059e+37  ;;  %v6311_v13 = vld [vmem:[#allocation27_spill] sm:$0xff] }
 0x241   :  { %v1856_v63 = vmul.f32 %v3315_v38, %v5153_v5  ;;  %v2082_v44 = vsel %vm2045_vm2, %v2041_v35, 0.0  ;;  %v1016_v22 = vpop.f32.mrf.mxu1  ;;  %vm1861_vm6 = vweird.f32 %v3315_v38  ;;  %v6312_v5 = vld [vmem:[#allocation10_spill] sm:$0xff] }
 0x242   :  { %3318 = vrcp.f32 %v5188_v23  ;;  %2083 = vadd.xlane.f32.xlu1 %v2082_v44  ;;  %v2042_v39 = vmax.f32 %v2026_v33, 1e-08  ;;  %vm1862_vm9 = vmor %vm1860_vm8, %vm1861_vm6  ;;  %v1881_v44 = vand.u32 2147483648, %v5188_v23  ;;  %v1014_v33 = vadd.f32 %v4942_v60, %v1013_v41 }
 0x243   :  { %v1857_v17 = vsub.f32 1.0, %v1856_v63  ;;  %v3317_v0 = vpop.eup %3316  ;;  %vm1875_vm13 = vweird.f32 %v5188_v23 }
 0x244   :  { %v2085_v50 = vsel %vm2045_vm2, %v2042_v39, 0.0  ;;  %v2095_v26 = vmul.f32 4.0, %v3317_v0  ;;  %vm2099_vm12 = vweird.f32 %v3317_v0 }
 0x245   :  { %v1858_v16 = vmul.f32 %v3315_v38, %v1857_v17  ;;  %3183 = vmatmul.msk.f32.gmra.mxu3 %vm1156_vm7, %v45_v40  ;;  %2086 = vadd.xlane.f32.xlu2 %v2085_v50  ;;  %v1879_v17 = vand.u32 2147483647, %v5188_v23  ;;  %v1882_v50 = vor.u32 1.1754944e-38, %v1881_v44 }
 0x246   :  { %3167 = vmatmul.msk.f32.gmra.mxu2 %vm74_vm0, %v1011_v27  ;;  %v2096_v20 = vsub.f32 1.0, %v2095_v26 }
 0x247   :  { %v1859_v10 = vadd.f32 %v3315_v38, %v1858_v16  ;;  %vm1880_vm15 = vcmp.eq.f32.partialorder %v1879_v17, 8.507059e+37  ;;  %v1017_v17 = vadd.f32 %v4942_v60, %v1016_v22 }
 0x248   :  { %v3319_v30 = vpop.eup %3318  ;;  %v2097_v48 = vmul.f32 %v3317_v0, %v2096_v20 }
 0x249   :  { %v1863_v36 = vsel %vm1862_vm9, %v3315_v38, %v1859_v10  ;;  %v1871_v34 = vmul.f32 %v3319_v30, %v5188_v23  ;;  %v46_v38 = vld [vmem:[%s6094_s0 + $0x28] sm:$0xff]  ;;  %v1019_v40 = vpop.f32.mrf.mxu1  ;;  %vm1876_vm11 = vweird.f32 %v3319_v30 }
 0x24a   :  { %v1868_v6 = vsel %vm1865_vm10, %v1867_v29, %v1863_v36  ;;  %v2098_v52 = vadd.f32 %v3317_v0, %v2097_v48  ;;  %vm1877_vm14 = vmor %vm1875_vm13, %vm1876_vm11 }
 0x24b   :  { %v5209_v24 = vmul.f32 %v1868_v6, %v6311_v13  ;;  %v5212_v12 = vmul.f32 %v1868_v6, %v6312_v5  ;;  %v5215_v63 = vmul.f32 %v1868_v6, %v4867_v31  ;;  %v1872_v35 = vsub.f32 1.0, %v1871_v34  ;;  %v6313_v6 = vld [vmem:[#allocation31_spill] sm:$0xff]  ;;  %v6314_v5 = vld [vmem:[#allocation12_spill] sm:$0xff] }
 0x24c   :  { %v5232_v36 = vsel %vm2099_vm12, %v3317_v0, %v2098_v52 }
 0x24d   :  { %v1873_v27 = vmul.f32 %v3319_v30, %v1872_v35  ;;  %v1963_v16 = vmul.f32 %v5209_v24, %v5209_v24  ;;  %v1979_v31 = vmul.f32 %v5212_v12, %v5212_v12  ;;  %v2011_v39 = vmul.f32 %v5215_v63, %v5215_v63  ;;  %3184 = vmatmul.msk.f32.gmra.mxu3 %vm1156_vm7, %v46_v38  ;;  %v2048_v20 = vpop.xlane.xlu2 %2047 }
 0x24e   :  { %3168 = vmatmul.msk.f32.gmra.mxu2 %vm74_vm0, %v1014_v33  ;;  %v2101_v0 = vmul.f32 %v5232_v36, %v2048_v20 }
 0x24f   :  { %v1874_v10 = vadd.f32 %v3319_v30, %v1873_v27  ;;  %v1995_v41 = vadd.f32 %v1979_v31, %v1963_v16 }
 0x250   :  { %3320 = vrsqrt.f32 %v2101_v0 }
 0x251   :  { %v1878_v26 = vsel %vm1877_vm14, %v3319_v30, %v1874_v10  ;;  %v2027_v29 = vadd.f32 %v2011_v39, %v1995_v41  ;;  %v47_v30 = vld [vmem:[%s6094_s0 + $0x30] sm:$0xff]  ;;  %v1022_v27 = vpop.f32.mrf.mxu1  ;;  %v48_v39 = vld [vmem:[%s6094_s0 + $0x38] sm:$0xff]  ;;  %v1020_v10 = vadd.f32 %v4942_v60, %v1019_v40  ;;  %v49_v40 = vld [vmem:[%s6094_s0 + $0x40] sm:$0xff] }
 0x252   :  { %v1883_v34 = vsel %vm1880_vm15, %v1882_v50, %v1878_v26 }
 0x253   :  { %v5235_v13 = vmul.f32 %v1883_v34, %v6313_v6  ;;  %v5238_v35 = vmul.f32 %v1883_v34, %v6314_v5  ;;  %v5241_v23 = vmul.f32 %v1883_v34, %v4950_v45  ;;  %v2043_v38 = vmax.f32 %v2027_v29, 1e-08 }
 0x255   :  { %v2088_v44 = vsel %vm2045_vm2, %v2043_v38, 0.0  ;;  %v1964_v33 = vmul.f32 %v5235_v13, %v5235_v13  ;;  %v1980_v48 = vmul.f32 %v5238_v35, %v5238_v35  ;;  %v2012_v45 = vmul.f32 %v5241_v23, %v5241_v23  ;;  %3185 = vmatmul.msk.f32.gmra.mxu3 %vm1156_vm7, %v47_v30 }
 0x256   :  { %2089 = vadd.xlane.f32.xlu0 %v2088_v44  ;;  %3169 = vmatmul.msk.f32.gmra.mxu2 %vm74_vm0, %v1017_v17  ;;  %v3321_v52 = vpop.eup %3320  ;;  %v1023_v38 = vadd.f32 %v4942_v60, %v1022_v27 }
 0x257   :  { %v1996_v16 = vadd.f32 %v1980_v48, %v1964_v33  ;;  %v2118_v50 = vmul.f32 %v3321_v52, %v2101_v0  ;;  %vm2124_vm1 = vweird.f32 %v3321_v52 }
 0x258   :  { %v2051_v41 = vpop.xlane.xlu0 %2050 }
 0x259   :  { %v2028_v22 = vadd.f32 %v2012_v45, %v1996_v16  ;;  %v2102_v29 = vmul.f32 %v5232_v36, %v2051_v41  ;;  %v2119_v34 = vmul.f32 %v3321_v52, %v2118_v50  ;;  %v1025_v20 = vpop.f32.mrf.mxu1 }
 0x25b   :  { %v2044_v31 = vmax.f32 %v2028_v22, 1e-08  ;;  %3322 = vrsqrt.f32 %v2102_v29  ;;  %v2120_v6 = vmul.f32 0.5, %v2119_v34  ;;  %vm2133_vm5 = vweird.f32 %v2102_v29 }
 0x25d   :  { %v2091_v26 = vsel %vm2045_vm2, %v2044_v31, 0.0  ;;  %3186 = vmatmul.msk.f32.gmra.mxu3 %vm1156_vm7, %v48_v39  ;;  %v2121_v5 = vsub.f32 1.5, %v2120_v6  ;;  %vm2123_vm2 = vweird.f32 %v2101_v0 }
 0x25e   :  { %2092 = vadd.xlane.f32.xlu1 %v2091_v26  ;;  %3170 = vmatmul.msk.f32.gmra.mxu2 %vm74_vm0, %v1020_v10  ;;  %vm2125_vm3 = vmor %vm2123_vm2, %vm2124_vm1 }
 0x25f   :  { %v2122_v17 = vmul.f32 %v3321_v52, %v2121_v5 }
 0x261   :  { %v3323_v30 = vpop.eup %3322  ;;  %v2126_v33 = vsel %vm2125_vm3, %v3321_v52, %v2122_v17  ;;  %v1028_v22 = vpop.f32.mrf.mxu1  ;;  %v50_v52 = vld [vmem:[%s6094_s0 + $0x48] sm:$0xff] }
 0x262   :  { %v2128_v44 = vmul.f32 %v3323_v30, %v2102_v29  ;;  %v2309_v45 = vmul.f32 %v2126_v33, %v4400_v57  ;;  %v2293_v16 = vmul.f32 %v2126_v33, %v4391_v11  ;;  %vm2134_vm4 = vweird.f32 %v3323_v30  ;;  %v51_v29 = vld [vmem:[%s6094_s0 + $0x50] sm:$0xff] }
 0x263   :  { %v1026_v57 = vadd.f32 %v4942_v60, %v1025_v20  ;;  %vm2135_vm6 = vmor %vm2133_vm5, %vm2134_vm4  ;;  %v1029_v5 = vadd.f32 %v4942_v60, %v1028_v22 }
 0x264   :  { %v2129_v48 = vmul.f32 %v3323_v30, %v2128_v44  ;;  %2866 = vrot.lane.b32.xlu2 %v2309_v45, %s3389_s22 }
 0x265   :  { %3187 = vmatmul.msk.f32.gmra.mxu3 %vm1156_vm7, %v49_v40  ;;  %v2277_v40 = vmul.f32 %v2126_v33, %v4388_v4  ;;  %v52_v4 = vld [vmem:[%s6094_s0 + $0x58] sm:$0xff] }
 0x266   :  { %3171 = vmatmul.msk.f32.gmra.mxu2 %vm74_vm0, %v1023_v38  ;;  %v2130_v31 = vmul.f32 0.5, %v2129_v48  ;;  %v2054_v39 = vpop.xlane.xlu1 %2053 }
 0x267   :  { %v2103_v0 = vmul.f32 %v5232_v36, %v2054_v39 }
 0x268   :  { %v2131_v27 = vsub.f32 1.5, %v2130_v31 }
 0x269   :  { %3324 = vrsqrt.f32 %v2103_v0  ;;  %vm2143_vm9 = vweird.f32 %v2103_v0 }
 0x26a   :  { %2802 = vrot.lane.b32.xlu0 %v2293_v16, %s3390_s23  ;;  %v2132_v11 = vmul.f32 %v3323_v30, %v2131_v27 }
 0x26b   :  { %v1031_v6 = vpop.f32.mrf.mxu1 }
 0x26c   :  { %v2136_v10 = vsel %vm2135_vm6, %v3323_v30, %v2132_v11  ;;  %v1032_v33 = vadd.f32 %v4942_v60, %v1031_v6  ;;  %v53_v11 = vld [vmem:[%s6094_s0 + $0x60] sm:$0xff]  ;;  %v6316_v6 = vld [vmem:[#allocation13_spill] sm:$0xff] }
 0x26d   :  { %3188 = vmatmul.msk.f32.gmra.mxu3 %vm1156_vm7, %v50_v52  ;;  %v2278_v41 = vmul.f32 %v2136_v10, %v4487_v56  ;;  %v2294_v30 = vmul.f32 %v2136_v10, %v4490_v19  ;;  %v2310_v16 = vmul.f32 %v2136_v10, %v4463_v55 }
 0x26e   :  { %3172 = vmatmul.msk.f32.gmra.mxu2 %vm74_vm0, %v1026_v57  ;;  %v2057_v50 = vpop.xlane.xlu2 %2056 }
 0x26f   :  { %v3325_v26 = vpop.eup %3324  ;;  %v2104_v34 = vmul.f32 %v5232_v36, %v2057_v50  ;;  %2740 = vrot.lane.b32.xlu2 %v2278_v41, %s3391_s25  ;;  %v6315_v50 = vld [vmem:[#allocation15_spill] sm:$0xff] }
 0x270   :  { %v2138_v20 = vmul.f32 %v3325_v26, %v2103_v0  ;;  %vm2144_vm8 = vweird.f32 %v3325_v26 }
 0x271   :  { %3326 = vrsqrt.f32 %v2104_v34  ;;  %vm2145_vm10 = vmor %vm2143_vm9, %vm2144_vm8  ;;  %vm2153_vm12 = vweird.f32 %v2104_v34 }
 0x272   :  { %v2139_v38 = vmul.f32 %v3325_v26, %v2138_v20 }
 0x274   :  { %v2140_v56 = vmul.f32 0.5, %v2139_v38 }
 0x275   :  { %3189 = vmatmul.msk.f32.gmra.mxu3 %vm1156_vm7, %v51_v29 }
 0x276   :  { %3173 = vmatmul.msk.f32.gmra.mxu2 %vm74_vm0, %v1029_v5  ;;  %v2141_v17 = vsub.f32 1.5, %v2140_v56  ;;  %v54_v56 = vld [vmem:[%s6094_s0 + $0x68] sm:$0xff] }
 0x277   :  { %2738 = vrot.lane.b32.xlu1 %v2277_v40, %s3391_s25  ;;  %v3327_v44 = vpop.eup %3326  ;;  %2804 = vrot.lane.b32.xlu2 %v2294_v30, %s3390_s23  ;;  %v1034_v22 = vpop.f32.mrf.mxu1 }
 0x278   :  { %v2142_v48 = vmul.f32 %v3325_v26, %v2141_v17  ;;  %v2148_v45 = vmul.f32 %v3327_v44, %v2104_v34  ;;  %vm2154_vm11 = vweird.f32 %v3327_v44  ;;  %v1035_v10 = vadd.f32 %v4942_v60, %v1034_v22 }
 0x279   :  { %vm2155_vm13 = vmor %vm2153_vm12, %vm2154_vm11 }
 0x27a   :  { %v2149_v31 = vmul.f32 %v3327_v44, %v2148_v45  ;;  %v2146_v19 = vsel %vm2145_vm10, %v3325_v26, %v2142_v48 }
 0x27b   :  { %v2279_v39 = vmul.f32 %v2146_v19, %v4508_v53  ;;  %v2295_v53 = vmul.f32 %v2146_v19, %v4540_v37  ;;  %v2311_v20 = vmul.f32 %v2146_v19, %v6316_v6 }
 0x27c   :  { %v2150_v0 = vmul.f32 0.5, %v2149_v31 }
 0x27d   :  { %3190 = vmatmul.msk.f32.gmra.mxu3 %vm1156_vm7, %v52_v4  ;;  %v2060_v27 = vpop.xlane.xlu2 %2059  ;;  %2742 = vrot.lane.b32.xlu0 %v2279_v39, %s3391_s25 }
 0x27e   :  { %3174 = vmatmul.msk.f32.gmra.mxu2 %vm74_vm0, %v1032_v33  ;;  %v2105_v52 = vmul.f32 %v5232_v36, %v2060_v27  ;;  %v2151_v57 = vsub.f32 1.5, %v2150_v0 }
 0x27f   :  { %2868 = vrot.lane.b32.xlu1 %v2310_v16, %s3389_s22  ;;  %v1037_v29 = vpop.f32.mrf.mxu1 }
 0x280   :  { %3328 = vrsqrt.f32 %v2105_v52  ;;  %v2152_v55 = vmul.f32 %v3327_v44, %v2151_v57  ;;  %v1038_v30 = vadd.f32 %v4942_v60, %v1037_v29  ;;  %vm2163_vm15 = vweird.f32 %v2105_v52 }
 0x282   :  { %v2156_v41 = vsel %vm2155_vm13, %v3327_v44, %v2152_v55 }
 0x283   :  { %v2312_v26 = vmul.f32 %v2156_v41, %v6315_v50  ;;  %v2280_v17 = vmul.f32 %v2156_v41, %v4566_v18  ;;  %v2296_v48 = vmul.f32 %v2156_v41, %v4569_v42  ;;  %v55_v42 = vld [vmem:[%s6094_s0 + $0x70] sm:$0xff] }
 0x285   :  { %3191 = vmatmul.msk.f32.gmra.mxu3 %vm1156_vm7, %v53_v11  ;;  %2872 = vrot.lane.b32.xlu2 %v2312_v26, %s3389_s22 }
 0x286   :  { %3175 = vmatmul.msk.f32.gmra.mxu2 %vm74_vm0, %v1035_v10  ;;  %v3329_v34 = vpop.eup %3328  ;;  %2870 = vrot.lane.b32.xlu0 %v2311_v20, %s3389_s22 }
 0x287   :  { %2806 = vrot.lane.b32.xlu1 %v2295_v53, %s3390_s23  ;;  %v2158_v5 = vmul.f32 %v3329_v34, %v2105_v52  ;;  %v2063_v40 = vpop.xlane.xlu0 %2062  ;;  %vm2164_vm14 = vweird.f32 %v3329_v34 }
 0x288   :  { %v2106_v37 = vmul.f32 %v5232_v36, %v2063_v40  ;;  %vm2165_vm1 = vmor %vm2163_vm15, %vm2164_vm14 }
 0x289   :  { %v2159_v38 = vmul.f32 %v3329_v34, %v2158_v5 }
 0x28a   :  { %3330 = vrsqrt.f32 %v2106_v37  ;;  %vm2173_vm3 = vweird.f32 %v2106_v37 }
 0x28b   :  { %v2160_v44 = vmul.f32 0.5, %v2159_v38  ;;  %v1040_v4 = vpop.f32.mrf.mxu1 }
 0x28c   :  { %v1041_v39 = vadd.f32 %v4942_v60, %v1040_v4 }
 0x28d   :  { %3192 = vmatmul.msk.f32.gmra.mxu3 %vm1156_vm7, %v54_v56  ;;  %v2161_v45 = vsub.f32 1.5, %v2160_v44 }
 0x28e   :  { %3176 = vmatmul.msk.f32.gmra.mxu2 %vm74_vm0, %v1038_v30  ;;  %2808 = vrot.lane.b32.xlu0 %v2296_v48, %s3390_s23 }
 0x28f   :  { %2744 = vrot.lane.b32.xlu1 %v2280_v17, %s3391_s25  ;;  %v2162_v33 = vmul.f32 %v3329_v34, %v2161_v45  ;;  %v2066_v16 = vpop.xlane.xlu1 %2065 }
 0x290   :  { %v3331_v22 = vpop.eup %3330  ;;  %v2107_v18 = vmul.f32 %v5232_v36, %v2066_v16 }
 0x291   :  { %v2168_v31 = vmul.f32 %v3331_v22, %v2106_v37  ;;  %v2166_v19 = vsel %vm2165_vm1, %v3329_v34, %v2162_v33  ;;  %vm2174_vm2 = vweird.f32 %v3331_v22 }
 0x292   :  { %3332 = vrsqrt.f32 %v2107_v18  ;;  %v2297_v0 = vmul.f32 %v2166_v19, %v4689_v7  ;;  %v2313_v57 = vmul.f32 %v2166_v19, %v4662_v25  ;;  %v2281_v52 = vmul.f32 %v2166_v19, %v4682_v32  ;;  %v56_v25 = vld [vmem:[%s6094_s0 + $0x78] sm:$0xff]  ;;  %vm2175_vm4 = vmor %vm2173_vm3, %vm2174_vm2 }
 0x293   :  { %v2169_v27 = vmul.f32 %v3331_v22, %v2168_v31  ;;  %vm2183_vm6 = vweird.f32 %v2107_v18 }
 0x294   :  { %2810 = vrot.lane.b32.xlu2 %v2297_v0, %s3390_s23 }
 0x295   :  { %3193 = vmatmul.msk.f32.gmra.mxu3 %vm1156_vm7, %v55_v42  ;;  %v2170_v55 = vmul.f32 0.5, %v2169_v27  ;;  %v6318_v27 = vld [vmem:[#allocation18_spill] sm:$0xff] }
 0x296   :  { %3177 = vmatmul.msk.f32.gmra.mxu2 %vm74_vm0, %v1041_v39  ;;  %2746 = vrot.lane.b32.xlu0 %v2281_v52, %s3391_s25 }
 0x297   :  { %2874 = vrot.lane.b32.xlu1 %v2313_v57, %s3389_s22  ;;  %v2171_v60 = vsub.f32 1.5, %v2170_v55 }
 0x298   :  { %v3333_v11 = vpop.eup %3332 }
 0x299   :  { %v2172_v7 = vmul.f32 %v3331_v22, %v2171_v60  ;;  %v2178_v10 = vmul.f32 %v3333_v11, %v2107_v18  ;;  %vm2184_vm5 = vweird.f32 %v3333_v11 }
 0x29a   :  { %vm2185_vm8 = vmor %vm2183_vm6, %vm2184_vm5 }
 0x29b   :  { %v2179_v53 = vmul.f32 %v3333_v11, %v2178_v10  ;;  %v2176_v41 = vsel %vm2175_vm4, %v3331_v22, %v2172_v7 }
 0x29c   :  { %v2069_v32 = vpop.xlane.xlu2 %2068  ;;  %v2282_v26 = vmul.f32 %v2176_v41, %v4713_v54  ;;  %v2298_v6 = vmul.f32 %v2176_v41, %v4726_v9  ;;  %v2314_v29 = vmul.f32 %v2176_v41, %v4692_v61  ;;  %v5352_v34 = vpop.f32.mrf.mxu2  ;;  %v6317_v9 = vld [vmem:[#allocation16_spill] sm:$0xff] }
 0x29d   :  { %v2108_v50 = vmul.f32 %v5232_v36, %v2069_v32  ;;  %3194 = vmatmul.msk.f32.gmra.mxu3 %vm1156_vm7, %v56_v25  ;;  %v2180_v20 = vmul.f32 0.5, %v2179_v53 }
 0x29e   :  { %2748 = vrot.lane.b32.xlu2 %v2282_v26, %s3391_s25  ;;  %2876 = vrot.lane.b32.xlu0 %v2314_v29, %s3389_s22 }
 0x29f   :  { %3334 = vrsqrt.f32 %v2108_v50  ;;  %2812 = vrot.lane.b32.xlu1 %v2298_v6, %s3390_s23  ;;  %v2181_v5 = vsub.f32 1.5, %v2180_v20  ;;  %vm2193_vm9 = vweird.f32 %v2108_v50  ;;  %v6319_v6 = vld [vmem:[#allocation21_spill] sm:$0xff] }
 0x2a1   :  { %v2182_v40 = vmul.f32 %v3333_v11, %v2181_v5 }
 0x2a3   :  { %v2186_v54 = vsel %vm2185_vm8, %v3333_v11, %v2182_v40 }
 0x2a4   :  { %v2315_v38 = vmul.f32 %v2186_v54, %v6317_v9  ;;  %v2283_v61 = vmul.f32 %v2186_v54, %v4805_v58  ;;  %v2299_v17 = vmul.f32 %v2186_v54, %v4808_v43 }
 0x2a5   :  { %v3335_v37 = vpop.eup %3334 }
 0x2a6   :  { %v2188_v56 = vmul.f32 %v3335_v37, %v2108_v50  ;;  %v2072_v30 = vpop.xlane.xlu0 %2071  ;;  %2878 = vrot.lane.b32.xlu2 %v2315_v38, %s3389_s22  ;;  %2814 = vrot.lane.b32.xlu0 %v2299_v17, %s3390_s23  ;;  %vm2194_vm7 = vweird.f32 %v3335_v37 }
 0x2a7   :  { %v2109_v44 = vmul.f32 %v5232_v36, %v2072_v30  ;;  %2750 = vrot.lane.b32.xlu1 %v2283_v61, %s3391_s25  ;;  %vm2195_vm10 = vmor %vm2193_vm9, %vm2194_vm7 }
 0x2a8   :  { %v2189_v48 = vmul.f32 %v3335_v37, %v2188_v56  ;;  %v1226_v4 = vpop.f32.mrf.mxu3  ;;  %v5389_v56 = vld [vmem:[%s6095_s9] ss:$0 sm:$0xff] }
 0x2a9   :  { %v2075_v45 = vpop.xlane.xlu1 %2074  ;;  %3336 = vrsqrt.f32 %v2109_v44  ;;  %v1111_v16 = vpop.f32.mrf.mxu2  ;;  %vm2203_vm12 = vweird.f32 %v2109_v44  ;;  %v1227_v61 = vadd.f32 %v1226_v4, %v5352_v34 }
 0x2aa   :  { %v2110_v33 = vmul.f32 %v5232_v36, %v2075_v45  ;;  %v2190_v58 = vmul.f32 0.5, %v2189_v48 }
 0x2ac   :  { %3338 = vrsqrt.f32 %v2110_v33  ;;  %v2191_v22 = vsub.f32 1.5, %v2190_v58  ;;  %vm2213_vm15 = vweird.f32 %v2110_v33 }
 0x2ae   :  { %v2192_v43 = vmul.f32 %v3335_v37, %v2191_v22 }
 0x2af   :  { %v3337_v18 = vpop.eup %3336 }
 0x2b0   :  { %v2198_v31 = vmul.f32 %v3337_v18, %v2109_v44  ;;  %v2196_v19 = vsel %vm2195_vm10, %v3335_v37, %v2192_v43  ;;  %v1229_v42 = vpop.f32.mrf.mxu3  ;;  %vm2204_vm11 = vweird.f32 %v3337_v18  ;;  %v6320_v37 = vld [vmem:[#allocation25_spill] sm:$0xff]  ;;  %v5396_v44 = vadd.f32 %v5389_v56, %v1227_v61  ;;  %v6322_v61 = vld [vmem:[#allocation26_spill] sm:$0xff] }
 0x2b1   :  { %v2300_v0 = vmul.f32 %v2196_v19, %v4843_v49  ;;  %v2316_v57 = vmul.f32 %v2196_v19, %v6318_v27  ;;  %v1114_v52 = vpop.f32.mrf.mxu2  ;;  %v2284_v11 = vmul.f32 %v2196_v19, %v4840_v15  ;;  %vm2205_vm13 = vmor %vm2203_vm12, %vm2204_vm11  ;;  %v1230_v58 = vadd.f32 %v1229_v42, %v1111_v16 }
 0x2b2   :  { %v3339_v39 = vpop.eup %3338  ;;  %v2199_v55 = vmul.f32 %v3337_v18, %v2198_v31  ;;  %v6139_v48 = vmax.f32 %v5396_v44, 0.0  ;;  %v2081_v31 = vpop.xlane.xlu0 %2080 }
 0x2b3   :  { %v2208_v60 = vmul.f32 %v3339_v39, %v2110_v33  ;;  %2816 = vrot.lane.b32.xlu2 %v2300_v0, %s3390_s23  ;;  %2880 = vrot.lane.b32.xlu1 %v2316_v57, %s3389_s22  ;;  %vm2214_vm14 = vweird.f32 %v3339_v39  ;;  %v2078_v33 = vpop.xlane.xlu2 %2077  ;;  %v5408_v43 = vadd.f32 %v5389_v56, %v1230_v58  ;;  %v2112_v42 = vmul.f32 %v5232_v36, %v2081_v31  ;;  %v6323_v31 = vld [vmem:[#allocation22_spill] sm:$0xff] }
 0x2b4   :  { %v2200_v7 = vmul.f32 0.5, %v2199_v55  ;;  %2752 = vrot.lane.b32.xlu0 %v2284_v11, %s3391_s25  ;;  %vm2215_vm1 = vmor %vm2213_vm15, %vm2214_vm14  ;;  %v2325_v34 = vsel %vm74_vm0, %v6139_v48, 0.0  ;;  %v2111_v4 = vmul.f32 %v5232_v36, %v2078_v33 }
 0x2b5   :  { %v2209_v10 = vmul.f32 %v3339_v39, %v2208_v60  ;;  %vm2233_vm6 = vweird.f32 %v2112_v42 }
 0x2b6   :  { %v2201_v25 = vsub.f32 1.5, %v2200_v7  ;;  %3340 = vrsqrt.f32 %v2111_v4  ;;  %vm2223_vm3 = vweird.f32 %v2111_v4 }
 0x2b7   :  { %v2210_v53 = vmul.f32 0.5, %v2209_v10  ;;  %3342 = vrsqrt.f32 %v2112_v42 }
 0x2b8   :  { %v2202_v32 = vmul.f32 %v3337_v18, %v2201_v25  ;;  %v1232_v41 = vpop.f32.mrf.mxu3 }
 0x2b9   :  { %v2211_v49 = vsub.f32 1.5, %v2210_v53  ;;  %v5369_v50 = vpop.f32.mrf.mxu2  ;;  %v1233_v19 = vadd.f32 %v1232_v41, %v1114_v52  ;;  %v2084_v53 = vpop.xlane.xlu1 %2083 }
 0x2ba   :  { %v2206_v26 = vsel %vm2205_vm13, %v3337_v18, %v2202_v32 }
 0x2bb   :  { %v2301_v15 = vmul.f32 %v2206_v26, %v4913_v62  ;;  %v2317_v20 = vmul.f32 %v2206_v26, %v6319_v6  ;;  %v2212_v29 = vmul.f32 %v3339_v39, %v2211_v49  ;;  %v5417_v0 = vadd.f32 %v5389_v56, %v1233_v19 }
 0x2bc   :  { %v3341_v57 = vpop.eup %3340  ;;  %v2113_v6 = vmul.f32 %v5232_v36, %v2084_v53 }
 0x2bd   :  { %2818 = vrot.lane.b32.xlu1 %v2301_v15, %s3390_s23  ;;  %2882 = vrot.lane.b32.xlu0 %v2317_v20, %s3389_s22  ;;  %v2216_v40 = vsel %vm2215_vm1, %v3339_v39, %v2212_v29  ;;  %v6141_v39 = vmax.f32 %v5408_v43, 0.0  ;;  %v2218_v60 = vmul.f32 %v3341_v57, %v2111_v4  ;;  %v6137_v52 = vmax.f32 %v5417_v0, 0.0  ;;  %v3343_v25 = vpop.eup %3342  ;;  %v6321_v20 = vld [vmem:[#allocation19_spill] sm:$0xff] }
 0x2be   :  { %v2286_v9 = vmul.f32 %v2216_v40, %v6320_v37  ;;  %v2228_v15 = vmul.f32 %v3343_v25, %v2112_v42  ;;  %v2285_v29 = vmul.f32 %v2206_v26, %v6321_v20  ;;  %3344 = vrsqrt.f32 %v2113_v6 }
 0x2bf   :  { %v2328_v27 = vsel %vm74_vm0, %v6141_v39, 0.0  ;;  %v2219_v11 = vmul.f32 %v3341_v57, %v2218_v60  ;;  %v2331_v7 = vsel %vm74_vm0, %v6137_v52, 0.0  ;;  %v2302_v33 = vmul.f32 %v2216_v40, %v6322_v61 }
 0x2c0   :  { %v5375_v5 = vpop.f32.mrf.mxu3  ;;  %vm2224_vm2 = vweird.f32 %v3341_v57  ;;  %v2318_v19 = vmul.f32 %v2216_v40, %v6323_v31  ;;  %vm2234_vm5 = vweird.f32 %v3343_v25  ;;  %v6324_v40 = vld [vmem:[#allocation29_spill] sm:$0xff]  ;;  %vm2243_vm9 = vweird.f32 %v2113_v6 }
 0x2c1   :  { %v5377_v54 = vpop.f32.mrf.mxu2  ;;  %v2220_v41 = vmul.f32 0.5, %v2219_v11  ;;  %vm2225_vm4 = vmor %vm2223_vm3, %vm2224_vm2 }
 0x2c2   :  { %vm2235_vm8 = vmor %vm2233_vm6, %vm2234_vm5 }
 0x2c3   :  { %v2221_v37 = vsub.f32 1.5, %v2220_v41 }
 0x2c5   :  { %2756 = vrot.lane.b32.xlu1 %v2286_v9, %s3391_s25  ;;  %v2229_v9 = vmul.f32 %v3343_v25, %v2228_v15  ;;  %v2222_v58 = vmul.f32 %v3341_v57, %v2221_v37 }
 0x2c7   :  { %v2226_v60 = vsel %vm2225_vm4, %v3341_v57, %v2222_v58 }
 0x2c8   :  { %v5381_v62 = vpop.f32.mrf.mxu3  ;;  %v2303_v53 = vmul.f32 %v2226_v60, %v5037_v21  ;;  %v2319_v4 = vmul.f32 %v2226_v60, %v6324_v40 }
 0x2c9   :  { %v5383_v38 = vpop.f32.mrf.mxu2  ;;  %v2090_v37 = vpop.xlane.xlu0 %2089 }
 0x2ca   :  { %v2115_v58 = vmul.f32 %v5232_v36, %v2090_v37 }
 0x2cc   :  { %vm2263_vm15 = vweird.f32 %v2115_v58 }
 0x2d0   :  { %v5391_v30 = vpop.f32.mrf.mxu3 }
 0x2d1   :  { %v5393_v17 = vpop.f32.mrf.mxu2 }
 0x2d8   :  { %v5399_v45 = vpop.f32.mrf.mxu3 }
 0x2d9   :  { %v5401_v22 = vpop.f32.mrf.mxu2 }
 0x2dc   :  { %2326 = vadd.xlane.f32.xlu2 %v2325_v34  ;;  %v2230_v34 = vmul.f32 0.5, %v2229_v9  ;;  %v2087_v9 = vpop.xlane.xlu2 %2086 }
 0x2de   :  { %v2231_v26 = vsub.f32 1.5, %v2230_v34  ;;  %v1242_v34 = vadd.f32 %v5391_v30, %v5383_v38 }
 0x2e0   :  { %v5410_v18 = vpop.f32.mrf.mxu3 }
 0x2e1   :  { %v5413_v16 = vpop.f32.mrf.mxu2 }
 0x2e4   :  { %v5496_v37 = vpop.permute.xlu2 %2866 }
 0x2e7   :  { %2329 = vadd.xlane.f32.xlu0 %v2328_v27  ;;  %v3345_v27 = vpop.eup %3344 }
 0x2e8   :  { %v5422_v55 = vpop.f32.mrf.mxu3  ;;  %v2238_v11 = vmul.f32 %v3345_v27, %v2113_v6  ;;  %vm2244_vm7 = vweird.f32 %v3345_v27  ;;  %v2114_v6 = vmul.f32 %v5232_v36, %v2087_v9 }
 0x2e9   :  { %v1135_v10 = vpop.f32.mrf.mxu2  ;;  %vm2245_vm10 = vmor %vm2243_vm9, %vm2244_vm7  ;;  %vm2930_vm9 = vcmask 97280  }
 0x2ea   :  { %3346 = vrsqrt.f32 %v2114_v6  ;;  %vm2253_vm12 = vweird.f32 %v2114_v6 }
 0x2eb   :  { %3348 = vrsqrt.f32 %v2115_v58 }
 0x2ef   :  { %2332 = vadd.xlane.f32.xlu1 %v2331_v7  ;;  %v2287_v7 = vmul.f32 %v2226_v60, %v5034_v51 }
 0x2f0   :  { %v1253_v32 = vpop.f32.mrf.mxu3 }
 0x2f1   :  { %v5428_v49 = vadd.f32 %v1253_v32, %v1135_v10  ;;  %v2232_v10 = vmul.f32 %v3343_v25, %v2231_v26  ;;  %v2239_v32 = vmul.f32 %v3345_v27, %v2238_v11  ;;  %v2093_v26 = vpop.xlane.xlu1 %2092 }
 0x2f2   :  { %v2116_v11 = vmul.f32 %v5232_v36, %v2093_v26 }
 0x2f3   :  { %v2236_v41 = vsel %vm2235_vm8, %v3343_v25, %v2232_v10  ;;  %v2240_v15 = vmul.f32 0.5, %v2239_v32  ;;  %v1236_v25 = vadd.f32 %v5375_v5, %v5369_v50  ;;  %v5464_v50 = vpop.permute.xlu0 %2802 }
 0x2f4   :  { %2754 = vrot.lane.b32.xlu2 %v2285_v29, %s3391_s25  ;;  %v2320_v57 = vmul.f32 %v2236_v41, %v5103_v59  ;;  %v2304_v21 = vmul.f32 %v2236_v41, %v5100_v3  ;;  %v1239_v3 = vadd.f32 %v5381_v62, %v5377_v54  ;;  %v3347_v62 = vpop.eup %3346  ;;  %3350 = vrsqrt.f32 %v2116_v11 }
 0x2f5   :  { %v2241_v51 = vsub.f32 1.5, %v2240_v15  ;;  %v5452_v59 = vadd.f32 %v5389_v56, %v1236_v25  ;;  %v3349_v10 = vpop.eup %3348  ;;  %v2288_v40 = vmul.f32 %v2236_v41, %v5096_v14  ;;  %vm2254_vm11 = vweird.f32 %v3347_v62 }
 0x2f6   :  { %v2258_v30 = vmul.f32 %v3349_v10, %v2115_v58  ;;  %vm2255_vm13 = vmor %vm2253_vm12, %vm2254_vm11  ;;  %vm2264_vm14 = vweird.f32 %v3349_v10  ;;  %vm2273_vm3 = vweird.f32 %v2116_v11  ;;  %vm2964_vm11 = vcmask 162816  }
 0x2f7   :  { %v2242_v20 = vmul.f32 %v3345_v27, %v2241_v51  ;;  %v6138_v61 = vmax.f32 %v5452_v59, 0.0  ;;  %vm2265_vm1 = vmor %vm2263_vm15, %vm2264_vm14 }
 0x2f8   :  { %v2259_v15 = vmul.f32 %v3349_v10, %v2258_v30 }
 0x2f9   :  { %v2246_v42 = vsel %vm2245_vm10, %v3345_v27, %v2242_v20  ;;  %v5476_v27 = vadd.f32 %v5389_v56, %v1242_v34  ;;  %vm2947_vm10 = vcmask 130048  }
 0x2fa   :  { %v2289_v29 = vmul.f32 %v2246_v42, %v5130_v47  ;;  %v2334_v47 = vsel %vm74_vm0, %v6138_v61, 0.0  ;;  %v3351_v36 = vpop.eup %3350  ;;  %v2260_v20 = vmul.f32 0.5, %v2259_v15  ;;  %v2321_v14 = vmul.f32 %v2246_v42, %v5151_v1 }
 0x2fb   :  { %2820 = vrot.lane.b32.xlu0 %v2302_v33, %s3390_s23  ;;  %v5459_v33 = vadd.f32 %v5389_v56, %v1239_v3  ;;  %v5473_v31 = vpop.permute.xlu0 %2742  ;;  %vm2274_vm2 = vweird.f32 %v3351_v36 }
 0x2fc   :  { %2884 = vrot.lane.b32.xlu2 %v2318_v19, %s3389_s22  ;;  %v2248_v19 = vmul.f32 %v3347_v62, %v2114_v6  ;;  %vm2275_vm4 = vmor %vm2273_vm3, %vm2274_vm2 }
 0x2fd   :  { %v6140_v5 = vmax.f32 %v5459_v33, 0.0 }
 0x2fe   :  { %v2249_v60 = vmul.f32 %v3347_v62, %v2248_v19 }
 0x2ff   :  { %v2337_v54 = vsel %vm74_vm0, %v6140_v5, 0.0 }
 0x303   :  { %2758 = vrot.lane.b32.xlu0 %v2287_v7, %s3391_s25  ;;  %v6135_v7 = vmax.f32 %v5476_v27, 0.0  ;;  %v5480_v32 = vpop.permute.xlu0 %2870 }
 0x304   :  { %2822 = vrot.lane.b32.xlu2 %v2303_v53, %s3390_s23  ;;  %v2250_v53 = vmul.f32 0.5, %v2249_v60 }
 0x305   :  { %v2340_v38 = vsel %vm74_vm0, %v6135_v7, 0.0 }
 0x308   :  { %2886 = vrot.lane.b32.xlu1 %v2319_v4, %s3389_s22  ;;  %v2251_v4 = vsub.f32 1.5, %v2250_v53 }
 0x30a   :  { %v2252_v51 = vmul.f32 %v3347_v62, %v2251_v4  ;;  %v1248_v4 = vadd.f32 %v5410_v18, %v5401_v22 }
 0x30b   :  { %2888 = vrot.lane.b32.xlu0 %v2320_v57, %s3389_s22  ;;  %v2305_v57 = vmul.f32 %v2246_v42, %v5133_v28  ;;  %v5491_v25 = vpop.permute.xlu0 %2808  ;;  %v2261_v28 = vsub.f32 1.5, %v2260_v20 }
 0x30c   :  { %v5494_v41 = vsel %vm2255_vm13, %v3347_v62, %v2252_v51  ;;  %v5544_v51 = vadd.f32 %v5389_v56, %v1248_v4  ;;  %vm2981_vm13 = vcmask 171008  }
 0x30d   :  { %v2290_v3 = vmul.f32 %v5494_v41, %v5168_v46  ;;  %v2262_v6 = vmul.f32 %v3349_v10, %v2261_v28  ;;  %v2306_v1 = vmul.f32 %v5494_v41, %v5171_v2  ;;  %v5511_v46 = vpop.permute.xlu2 %2740 }
 0x30e   :  { %v6134_v28 = vmax.f32 %v5544_v51, 0.0 }
 0x30f   :  { %v5509_v34 = vsel %vm2265_vm1, %v3349_v10, %v2262_v6 }
 0x310   :  { %2824 = vrot.lane.b32.xlu1 %v2304_v21, %s3390_s23  ;;  %v5488_v21 = vpop.permute.xlu1 %2738  ;;  %v2307_v19 = vmul.f32 %v5509_v34, %v5212_v12  ;;  %v5527_v12 = vpop.f32.mrf.mxu2 }
 0x313   :  { %v5506_v42 = vpop.permute.xlu0 %2746 }
 0x315   :  { %v5522_v53 = vpop.permute.xlu2 %2804 }
 0x318   :  { %2762 = vrot.lane.b32.xlu1 %v2289_v29, %s3391_s25  ;;  %v2268_v29 = vmul.f32 %v3351_v36, %v2116_v11  ;;  %v1141_v15 = vpop.f32.mrf.mxu2 }
 0x31a   :  { %v2269_v9 = vmul.f32 %v3351_v36, %v2268_v29 }
 0x31b   :  { %v5518_v58 = vpop.permute.xlu0 %2876 }
 0x320   :  { %v5554_v22 = vpop.f32.mrf.mxu2 }
 0x323   :  { %v5533_v11 = vpop.permute.xlu0 %2814 }
 0x32b   :  { %v5546_v20 = vpop.permute.xlu0 %2752 }
 0x32d   :  { %2335 = vadd.xlane.f32.xlu2 %v2334_v47  ;;  %v2270_v47 = vmul.f32 0.5, %v2269_v9 }
 0x32f   :  { %v2271_v62 = vsub.f32 1.5, %v2270_v47  ;;  %v3392_v47 = vmov 8.0  }
 0x330   :  { %3352 = vrcp.f32 %v3392_v47 }
 0x331   :  { %v2272_v26 = vmul.f32 %v3351_v36, %v2271_v62  ;;  %v1251_v62 = vadd.f32 %v5422_v55, %v5413_v16 }
 0x333   :  { %v5520_v60 = vsel %vm2275_vm4, %v3351_v36, %v2272_v26  ;;  %v5574_v4 = vadd.f32 %v5389_v56, %v1251_v62 }
 0x334   :  { %v2292_v10 = vmul.f32 %v5520_v60, %v5235_v13  ;;  %v1245_v13 = vadd.f32 %v5399_v45, %v5393_v17  ;;  %v2346_v45 = vsel %vm74_vm0, %v6134_v28, 0.0 }
 0x335   :  { %2338 = vadd.xlane.f32.xlu0 %v2337_v54  ;;  %v5502_v54 = vpop.permute.xlu1 %2868 }
 0x336   :  { %v5549_v29 = vadd.f32 %v5389_v56, %v1245_v13 }
 0x338   :  { %v6136_v17 = vmax.f32 %v5549_v29, 0.0 }
 0x33a   :  { %v2343_v6 = vsel %vm74_vm0, %v6136_v17, 0.0  ;;  %v6142_v17 = vmax.f32 %v5574_v4, 0.0 }
 0x33c   :  { %v2349_v55 = vsel %vm74_vm0, %v6142_v17, 0.0 }
 0x33d   :  { %v5516_v2 = vpop.permute.xlu1 %2806 }
 0x342   :  { %2341 = vadd.xlane.f32.xlu1 %v2340_v38  ;;  %v5529_v38 = vpop.f32.mrf.mxu3 }
 0x345   :  { %2760 = vrot.lane.b32.xlu2 %v2288_v40, %s3391_s25  ;;  %v5531_v30 = vpop.permute.xlu1 %2744  ;;  %v5535_v40 = vpop.permute.xlu2 %2872 }
 0x349   :  { %2826 = vrot.lane.b32.xlu0 %v2305_v57, %s3390_s23 }
 0x34a   :  { %v1259_v36 = vpop.f32.mrf.mxu3 }
 0x34b   :  { %v1260_v7 = vadd.f32 %v1259_v36, %v1141_v15  ;;  %v2308_v15 = vmul.f32 %v5520_v60, %v5238_v35 }
 0x34d   :  { %2890 = vrot.lane.b32.xlu2 %v2321_v14, %s3389_s22  ;;  %v5541_v57 = vpop.permute.xlu1 %2874  ;;  %v5551_v14 = vpop.permute.xlu2 %2810  ;;  %v5582_v52 = vadd.f32 %v5389_v56, %v1260_v7 }
 0x34f   :  { %v6143_v7 = vmax.f32 %v5582_v52, 0.0 }
 0x351   :  { %2764 = vrot.lane.b32.xlu0 %v2290_v3, %s3391_s25  ;;  %v5564_v3 = vpop.permute.xlu0 %2882  ;;  %v2358_v35 = vsel %vm74_vm0, %v6143_v7, 0.0 }
 0x352   :  { %v5556_v18 = vpop.f32.mrf.mxu3  ;;  %6325 = vst [vmem:[#allocation30_spill] sm:$0xff] %v5564_v3 }
 0x355   :  { %2828 = vrot.lane.b32.xlu2 %v2306_v1, %s3390_s23  ;;  %v5562_v9 = vpop.permute.xlu1 %2812  ;;  %v5569_v1 = vpop.permute.xlu2 %2748 }
 0x35a   :  { %v1265_v26 = vpop.f32.mrf.mxu3  ;;  %v2330_v13 = vpop.xlane.xlu0 %2329 }
 0x35b   :  { %2830 = vrot.lane.b32.xlu1 %v2307_v19, %s3390_s23  ;;  %v1147_v19 = vpop.f32.mrf.mxu2 }
 0x35c   :  { %v1266_v3 = vadd.f32 %v1265_v26, %v1147_v19 }
 0x35d   :  { %v5579_v47 = vpop.permute.xlu2 %2878 }
 0x362   :  { %v1268_v61 = vpop.f32.mrf.mxu3 }
 0x363   :  { %2768 = vrot.lane.b32.xlu1 %v2292_v10, %s3391_s25  ;;  %v3353_v10 = vpop.eup %3352  ;;  %v1150_v62 = vpop.f32.mrf.mxu2 }
 0x364   :  { %v2374_v28 = vmul.f32 8.0, %v3353_v10  ;;  %vm2378_vm5 = vweird.f32 %v3353_v10 }
 0x365   :  { %v5595_v5 = vpop.permute.xlu2 %2816 }
 0x36d   :  { %v5584_v16 = vpop.permute.xlu0 %2820 }
 0x36e   :  { %6326 = vst [vmem:[#allocation32_spill] sm:$0xff] %v5584_v16 }
 0x37b   :  { %2347 = vadd.xlane.f32.xlu0 %v2346_v45  ;;  %v5576_v45 = vpop.permute.xlu1 %2750 }
 0x37e   :  { %2344 = vadd.xlane.f32.xlu2 %v2343_v6  ;;  %v2375_v6 = vsub.f32 1.0, %v2374_v28  ;;  %v1269_v28 = vadd.f32 %v1268_v61, %v1150_v62 }
 0x380   :  { %v2376_v48 = vmul.f32 %v3353_v10, %v2375_v6  ;;  %v5598_v16 = vadd.f32 %v5389_v56, %v1269_v28  ;;  %v5605_v6 = vpop.permute.xlu0 %2758  ;;  %v2327_v28 = vpop.xlane.xlu2 %2326 }
 0x381   :  { %6327 = vst [vmem:[#allocation34_spill] sm:$0xff] %v5605_v6  ;;  %v6331_v6 = vmax.f32 %v5459_v33, 0.0 }
 0x382   :  { %v2377_v39 = vadd.f32 %v3353_v10, %v2376_v48  ;;  %v6144_v62 = vmax.f32 %v5598_v16, 0.0 }
 0x383   :  { %v5591_v36 = vpop.permute.xlu1 %2880 }
 0x384   :  { %v5608_v61 = vsel %vm2378_vm5, %v3353_v10, %v2377_v39 }
 0x385   :  { %v2381_v48 = vmul.f32 %v5608_v61, %v2330_v13  ;;  %v2380_v26 = vmul.f32 %v5608_v61, %v2327_v28 }
 0x388   :  { %v5621_v7 = vpop.permute.xlu0 %2888 }
 0x389   :  { %6329 = vst [vmem:[#allocation35_spill] sm:$0xff] %v5621_v7 }
 0x38d   :  { %2350 = vadd.xlane.f32.xlu1 %v2349_v55  ;;  %v2291_v55 = vmul.f32 %v5509_v34, %v5209_v24  ;;  %v6328_v24 = vmax.f32 %v5408_v43, 0.0 }
 0x38f   :  { %2832 = vrot.lane.b32.xlu0 %v2308_v15, %s3390_s23  ;;  %v5612_v15 = vpop.permute.xlu1 %2818  ;;  %v5616_v17 = vsub.f32 %v6328_v24, %v2381_v48 }
 0x391   :  { %v2413_v39 = vmul.f32 %v5616_v17, %v5616_v17 }
 0x393   :  { %v2431_v13 = vsel %vm74_vm0, %v2413_v39, 0.0 }
 0x395   :  { %2359 = vadd.xlane.f32.xlu1 %v2358_v35  ;;  %v2367_v35 = vsel %vm74_vm0, %v6144_v62, 0.0 }
 0x396   :  { %2766 = vrot.lane.b32.xlu2 %v2291_v55, %s3391_s25  ;;  %v5628_v55 = vpop.permute.xlu2 %2754 }
 0x397   :  { %v5625_v10 = vpop.permute.xlu1 %2756 }
 0x398   :  { %6330 = vst [vmem:[#allocation36_spill] sm:$0xff] %v5625_v10 }
 0x39d   :  { %2368 = vadd.xlane.f32.xlu1 %v2367_v35  ;;  %v1257_v35 = vadd.f32 %v5529_v38, %v5527_v12  ;;  %v5653_v12 = vadd.f32 %v5389_v56, %v1266_v3 }
 0x39e   :  { %v5639_v10 = vpop.permute.xlu2 %2884 }
 0x39f   :  { %v2333_v24 = vpop.xlane.xlu1 %2332  ;;  %6332 = vst [vmem:[#allocation38_spill] sm:$0xff] %v5639_v10 }
 0x3a5   :  { %2432 = vadd.xlane.f32.xlu1 %v2431_v13  ;;  %v5643_v13 = vadd.f32 %v5389_v56, %v1257_v35 }
 0x3a7   :  { %v6145_v33 = vmax.f32 %v5643_v13, 0.0 }
 0x3a8   :  { %v2339_v43 = vpop.xlane.xlu0 %2338 }
 0x3a9   :  { %v2384_v48 = vmul.f32 %v5608_v61, %v2339_v43  ;;  %v5645_v43 = vpop.permute.xlu1 %2886  ;;  %v2355_v38 = vsel %vm74_vm0, %v6145_v33, 0.0  ;;  %v1153_v33 = vpop.f32.mrf.mxu2 }
 0x3aa   :  { %6333 = vst [vmem:[#allocation39_spill] sm:$0xff] %v5645_v43 }
 0x3ab   :  { %v5633_v62 = vsub.f32 %v6331_v6, %v2384_v48  ;;  %v5650_v6 = vadd.f32 %v5389_v56, %v5428_v49  ;;  %v1263_v48 = vadd.f32 %v5556_v18, %v5554_v22  ;;  %v6149_v49 = vmax.f32 %v5653_v12, 0.0 }
 0x3ac   :  { %v6336_v22 = vmax.f32 %v5396_v44, 0.0 }
 0x3ad   :  { %v2416_v7 = vmul.f32 %v5633_v62, %v5633_v62  ;;  %v6146_v19 = vmax.f32 %v5650_v6, 0.0  ;;  %v5668_v3 = vadd.f32 %v5389_v56, %v1263_v48  ;;  %v2364_v28 = vsel %vm74_vm0, %v6149_v49, 0.0 }
 0x3ae   :  { %v5675_v18 = vsub.f32 %v6336_v22, %v2380_v26  ;;  %v6338_v22 = vmax.f32 %v5452_v59, 0.0 }
 0x3af   :  { %v2440_v39 = vsel %vm74_vm0, %v2416_v7, 0.0  ;;  %v5658_v7 = vpop.permute.xlu2 %2822  ;;  %v6147_v48 = vmax.f32 %v5668_v3, 0.0 }
 0x3b0   :  { %2441 = vadd.xlane.f32.xlu1 %v2440_v39  ;;  %6334 = vst [vmem:[#allocation7_spill] sm:$0xff] %v5658_v7  ;;  %v2352_v39 = vsel %vm74_vm0, %v6146_v19, 0.0  ;;  %v2412_v19 = vmul.f32 %v5675_v18, %v5675_v18 }
 0x3b1   :  { %v5665_v35 = vpop.permute.xlu1 %2824  ;;  %v2361_v44 = vsel %vm74_vm0, %v6147_v48, 0.0 }
 0x3b2   :  { %6335 = vst [vmem:[#allocation2_spill] sm:$0xff] %v5665_v35 }
 0x3b7   :  { %v2336_v10 = vpop.xlane.xlu2 %2335 }
 0x3b8   :  { %v2383_v7 = vmul.f32 %v5608_v61, %v2336_v10  ;;  %v2382_v10 = vmul.f32 %v5608_v61, %v2333_v24 }
 0x3b9   :  { %2356 = vadd.xlane.f32.xlu0 %v2355_v38  ;;  %v1271_v38 = vpop.f32.mrf.mxu3  ;;  %v5690_v26 = vpop.permute.xlu1 %2762 }
 0x3ba   :  { %v1272_v43 = vadd.f32 %v1271_v38, %v1153_v33  ;;  %6337 = vst [vmem:[#allocation20_spill] sm:$0xff] %v5690_v26  ;;  %v5694_v33 = vsub.f32 %v6338_v22, %v2383_v7  ;;  %v2428_v38 = vsel %vm74_vm0, %v2412_v19, 0.0 }
 0x3bf   :  { %2353 = vadd.xlane.f32.xlu2 %v2352_v39  ;;  %v5685_v39 = vadd.f32 %v5389_v56, %v1272_v43  ;;  %v2415_v56 = vmul.f32 %v5694_v33, %v5694_v33  ;;  %v6339_v43 = vmax.f32 %v5417_v0, 0.0  ;;  %v5712_v22 = vpop.permute.xlu2 %2760  ;;  %v6340_v0 = vmax.f32 %v5476_v27, 0.0 }
 0x3c1   :  { %2365 = vadd.xlane.f32.xlu0 %v2364_v28  ;;  %v6148_v28 = vmax.f32 %v5685_v39, 0.0  ;;  %v5703_v48 = vsub.f32 %v6339_v43, %v2382_v10  ;;  %v2342_v7 = vpop.xlane.xlu1 %2341  ;;  %v2437_v19 = vsel %vm74_vm0, %v2415_v56, 0.0 }
 0x3c2   :  { %v2385_v24 = vmul.f32 %v5608_v61, %v2342_v7 }
 0x3c3   :  { %v2370_v59 = vsel %vm74_vm0, %v6148_v28, 0.0 }
 0x3c7   :  { %2362 = vadd.xlane.f32.xlu2 %v2361_v44  ;;  %v2414_v44 = vmul.f32 %v5703_v48, %v5703_v48  ;;  %v5724_v7 = vpop.permute.xlu2 %2890 }
 0x3c8   :  { %6342 = vst [vmem:[#allocation24_spill] sm:$0xff] %v5724_v7 }
 0x3c9   :  { %2429 = vadd.xlane.f32.xlu0 %v2428_v38  ;;  %v5716_v38 = vsub.f32 %v6340_v0, %v2385_v24  ;;  %v2434_v10 = vsel %vm74_vm0, %v2414_v44, 0.0 }
 0x3cb   :  { %v2417_v43 = vmul.f32 %v5716_v38, %v5716_v38 }
 0x3cd   :  { %v2443_v56 = vsel %vm74_vm0, %v2417_v43, 0.0  ;;  %v5730_v27 = vpop.permute.xlu1 %2830 }
 0x3ce   :  { %6345 = vst [vmem:[#allocation5_spill] sm:$0xff] %v5730_v27 }
 0x3cf   :  { %2371 = vadd.xlane.f32.xlu2 %v2370_v59  ;;  %v5721_v59 = vpop.permute.xlu0 %2826  ;;  %v5728_v28 = vpop.permute.xlu2 %2828 }
 0x3d0   :  { %6341 = vst [vmem:[#allocation3_spill] sm:$0xff] %v5721_v59 }
 0x3d1   :  { %2438 = vadd.xlane.f32.xlu0 %v2437_v19  ;;  %6344 = vst [vmem:[#allocation28_spill] sm:$0xff] %v5728_v28 }
 0x3d7   :  { %2435 = vadd.xlane.f32.xlu2 %v2434_v10  ;;  %v5726_v19 = vpop.permute.xlu0 %2764  ;;  %v6346_v10 = vmax.f32 %v5544_v51, 0.0 }
 0x3d8   :  { %6343 = vst [vmem:[#allocation4_spill] sm:$0xff] %v5726_v19 }
 0x3df   :  { %2444 = vadd.xlane.f32.xlu2 %v2443_v56  ;;  %v6347_v56 = vmax.f32 %v5549_v29, 0.0 }
 0x3ee   :  { %v2348_v24 = vpop.xlane.xlu0 %2347 }
 0x3ef   :  { %v2387_v44 = vmul.f32 %v5608_v61, %v2348_v24  ;;  %v5747_v24 = vpop.permute.xlu1 %2768 }
 0x3f0   :  { %6348 = vst [vmem:[#allocation33_spill] sm:$0xff] %v5747_v24 }
 0x3f1   :  { %v2345_v0 = vpop.xlane.xlu2 %2344  ;;  %v5735_v49 = vsub.f32 %v6346_v10, %v2387_v44  ;;  %v6349_v10 = vmax.f32 %v5574_v4, 0.0 }
 0x3f2   :  { %v2386_v59 = vmul.f32 %v5608_v61, %v2345_v0 }
 0x3f3   :  { %v2419_v43 = vmul.f32 %v5735_v49, %v5735_v49 }
 0x3f4   :  { %v5742_v7 = vsub.f32 %v6347_v56, %v2386_v59  ;;  %v6350_v56 = vmax.f32 %v5582_v52, 0.0 }
 0x3f5   :  { %v2449_v26 = vsel %vm74_vm0, %v2419_v43, 0.0 }
 0x3f6   :  { %v2418_v27 = vmul.f32 %v5742_v7, %v5742_v7  ;;  %2450 = vadd.xlane.f32.xlu1 %v2449_v26 }
 0x3f8   :  { %v2446_v51 = vsel %vm74_vm0, %v2418_v27, 0.0 }
 0x3f9   :  { %2447 = vadd.xlane.f32.xlu0 %v2446_v51 }
 0x400   :  { %v2351_v44 = vpop.xlane.xlu1 %2350 }
 0x401   :  { %v2388_v0 = vmul.f32 %v5608_v61, %v2351_v44 }
 0x403   :  { %v5753_v28 = vsub.f32 %v6349_v10, %v2388_v0  ;;  %v6351_v10 = vmax.f32 %v5598_v16, 0.0 }
 0x405   :  { %v2420_v29 = vmul.f32 %v5753_v28, %v5753_v28 }
 0x407   :  { %v2452_v59 = vsel %vm74_vm0, %v2420_v29, 0.0 }
 0x408   :  { %v2360_v43 = vpop.xlane.xlu1 %2359  ;;  %2453 = vadd.xlane.f32.xlu2 %v2452_v59 }
 0x409   :  { %v2391_v26 = vmul.f32 %v5608_v61, %v2360_v43 }
 0x40b   :  { %v5761_v27 = vsub.f32 %v6350_v56, %v2391_v26 }
 0x40d   :  { %v2423_v51 = vmul.f32 %v5761_v27, %v5761_v27 }
 0x40f   :  { %v2461_v4 = vsel %vm74_vm0, %v2423_v51, 0.0 }
 0x410   :  { %v2369_v44 = vpop.xlane.xlu1 %2368  ;;  %2462 = vadd.xlane.f32.xlu2 %v2461_v4  ;;  %v5775_v4 = vpop.permute.xlu0 %2832 }
 0x411   :  { %v2394_v0 = vmul.f32 %v5608_v61, %v2369_v44  ;;  %6353 = vst [vmem:[#allocation37_spill] sm:$0xff] %v5775_v4 }
 0x413   :  { %v5769_v29 = vsub.f32 %v6351_v10, %v2394_v0 }
 0x415   :  { %6352 = vst [vmem:[#allocation6_spill] sm:$0xff] %v5769_v29  ;;  %v2426_v59 = vmul.f32 %v5769_v29, %v5769_v29  ;;  %v5778_v29 = vpop.permute.xlu2 %2766 }
 0x416   :  { %6354 = vst [vmem:[#allocation8_spill] sm:$0xff] %v5778_v29 }
 0x417   :  { %v2470_v52 = vsel %vm74_vm0, %v2426_v59, 0.0 }
 0x418   :  { %v2433_v43 = vpop.xlane.xlu1 %2432  ;;  %2471 = vadd.xlane.f32.xlu2 %v2470_v52 }
 0x419   :  { %v2477_v26 = vmul.f32 %v2433_v43, %v5608_v61 }
 0x41b   :  { %v2493_v56 = vadd.f32 1e-05, %v2477_v26  ;;  %v5783_v26 = vld [vmem:[%s6096_s10] ss:$0 sm:$0xff] }
 0x41d   :  { %3354 = vrsqrt.f32 %v2493_v56  ;;  %vm2524_vm8 = vweird.f32 %v2493_v56 }
 0x423   :  { %v3355_v51 = vpop.eup %3354  ;;  %v2442_v24 = vpop.xlane.xlu1 %2441 }
 0x424   :  { %v2519_v44 = vmul.f32 %v3355_v51, %v2493_v56  ;;  %v2480_v16 = vmul.f32 %v2442_v24, %v5608_v61  ;;  %vm2525_vm6 = vweird.f32 %v3355_v51 }
 0x425   :  { %vm2526_vm7 = vmor %vm2524_vm8, %vm2525_vm6 }
 0x426   :  { %v2520_v0 = vmul.f32 %v3355_v51, %v2519_v44  ;;  %v2496_v10 = vadd.f32 1e-05, %v2480_v16  ;;  %v2324_v16 = vmul.f32 %v5520_v60, %v5241_v23 }
 0x428   :  { %v2521_v19 = vmul.f32 0.5, %v2520_v0  ;;  %3356 = vrsqrt.f32 %v2496_v10  ;;  %vm2554_vm14 = vweird.f32 %v2496_v10 }
 0x42a   :  { %v2522_v59 = vsub.f32 1.5, %v2521_v19  ;;  %v5791_v19 = vld [vmem:[%s6097_s11] ss:$0 sm:$0xff] }
 0x42c   :  { %v2523_v52 = vmul.f32 %v3355_v51, %v2522_v59  ;;  %v2357_v43 = vpop.xlane.xlu0 %2356  ;;  %v6355_v59 = vmax.f32 %v5643_v13, 0.0 }
 0x42d   :  { %v2390_v4 = vmul.f32 %v5608_v61, %v2357_v43 }
 0x42e   :  { %v3357_v24 = vpop.eup %3356  ;;  %v2527_v44 = vsel %vm2526_vm7, %v3355_v51, %v2523_v52 }
 0x42f   :  { %v2669_v56 = vmul.f32 %v2527_v44, %v5616_v17  ;;  %v2549_v0 = vmul.f32 %v3357_v24, %v2496_v10  ;;  %v5796_v29 = vsub.f32 %v6355_v59, %v2390_v4  ;;  %vm2555_vm12 = vweird.f32 %v3357_v24 }
 0x430   :  { %2896 = vrot.lane.b32.xlu2 %v2324_v16, %s3389_s22  ;;  %vm2556_vm15 = vmor %vm2554_vm14, %vm2555_vm12 }
 0x431   :  { %v2688_v43 = vmul.f32 %v5783_v26, %v2669_v56  ;;  %v2550_v51 = vmul.f32 %v3357_v24, %v2549_v0  ;;  %v2422_v23 = vmul.f32 %v5796_v29, %v5796_v29  ;;  %v6356_v56 = vmax.f32 %v5650_v6, 0.0 }
 0x432   :  { %v2354_v60 = vpop.xlane.xlu2 %2353 }
 0x433   :  { %v2707_v52 = vadd.f32 %v5791_v19, %v2688_v43  ;;  %v2551_v35 = vmul.f32 0.5, %v2550_v51  ;;  %v2389_v17 = vmul.f32 %v5608_v61, %v2354_v60  ;;  %v2458_v44 = vsel %vm74_vm0, %v2422_v23, 0.0 }
 0x434   :  { %2459 = vadd.xlane.f32.xlu1 %v2458_v44  ;;  %v2366_v13 = vpop.xlane.xlu0 %2365  ;;  %v6357_v60 = vmax.f32 %v5653_v12, 0.0 }
 0x435   :  { %v2915_v4 = vsel %vm74_vm0, %v2707_v52, %v5511_v46  ;;  %v2552_v16 = vsub.f32 1.5, %v2551_v35  ;;  %v5809_v0 = vsub.f32 %v6356_v56, %v2389_v17  ;;  %v2393_v59 = vmul.f32 %v5608_v61, %v2366_v13 }
 0x436   :  { %v2932_v43 = vsel %vm2930_vm9, %v2915_v4, %v5522_v53 }
 0x437   :  { %v2949_v51 = vsel %vm2947_vm10, %v2932_v43, %v5502_v54  ;;  %v2553_v23 = vmul.f32 %v3357_v24, %v2552_v16  ;;  %v5818_v44 = vsub.f32 %v6357_v60, %v2393_v59  ;;  %v2421_v46 = vmul.f32 %v5809_v0, %v5809_v0 }
 0x438   :  { %v2966_v6 = vsel %vm2964_vm11, %v2949_v51, 1.0  ;;  %v6358_v16 = vmax.f32 %v5668_v3, 0.0 }
 0x439   :  { %2983 = vst.msk [vmem:[%s6098_s12 + $0x8] sm:$0xff] %vm2981_vm13, %v2966_v6  ;;  %v2557_v53 = vsel %vm2556_vm15, %v3357_v24, %v2553_v23  ;;  %v2455_v54 = vsel %vm74_vm0, %v2421_v46, 0.0  ;;  %v2425_v12 = vmul.f32 %v5818_v44, %v5818_v44 }
 0x43a   :  { %v2672_v35 = vmul.f32 %v2557_v53, %v5633_v62  ;;  %2456 = vadd.xlane.f32.xlu0 %v2455_v54  ;;  %v2363_v10 = vpop.xlane.xlu2 %2362 }
 0x43b   :  { %v2392_v52 = vmul.f32 %v5608_v61, %v2363_v10  ;;  %v2467_v17 = vsel %vm74_vm0, %v2425_v12, 0.0 }
 0x43c   :  { %v2691_v13 = vmul.f32 %v5783_v26, %v2672_v35  ;;  %2468 = vadd.xlane.f32.xlu1 %v2467_v17  ;;  %v2430_v4 = vpop.xlane.xlu0 %2429 }
 0x43d   :  { %v5837_v24 = vsub.f32 %v6358_v16, %v2392_v52  ;;  %v2476_v56 = vmul.f32 %v2430_v4, %v5608_v61 }
 0x43e   :  { %v2710_v59 = vadd.f32 %v5791_v19, %v2691_v13 }
 0x43f   :  { %v2492_v43 = vadd.f32 1e-05, %v2476_v56  ;;  %v2424_v62 = vmul.f32 %v5837_v24, %v5837_v24 }
 0x440   :  { %v2918_v51 = vsel %vm74_vm0, %v2710_v59, %v5506_v42 }
 0x441   :  { %v2935_v23 = vsel %vm2930_vm9, %v2918_v51, %v5551_v14  ;;  %3358 = vrsqrt.f32 %v2492_v43  ;;  %v2464_v60 = vsel %vm74_vm0, %v2424_v62, 0.0  ;;  %v6359_v14 = vmax.f32 %v5685_v39, 0.0 }
 0x442   :  { %v2952_v3 = vsel %vm2947_vm10, %v2935_v23, %v5541_v57  ;;  %2465 = vadd.xlane.f32.xlu0 %v2464_v60  ;;  %v2372_v46 = vpop.xlane.xlu2 %2371  ;;  %vm2514_vm2 = vweird.f32 %v2492_v43 }
 0x443   :  { %v2969_v6 = vsel %vm2964_vm11, %v2952_v3, 1.0  ;;  %v2395_v53 = vmul.f32 %v5608_v61, %v2372_v46 }
 0x444   :  { %2986 = vst.msk [vmem:[%s6098_s12 + $0x20] sm:$0xff] %vm2981_vm13, %v2969_v6  ;;  %v2439_v42 = vpop.xlane.xlu0 %2438 }
 0x445   :  { %v5858_v54 = vsub.f32 %v6359_v14, %v2395_v53  ;;  %v2479_v12 = vmul.f32 %v2439_v42, %v5608_v61  ;;  %v2322_v42 = vmul.f32 %v5494_v41, %v5179_v8 }
 0x447   :  { %v3359_v35 = vpop.eup %3358  ;;  %v2495_v57 = vadd.f32 1e-05, %v2479_v12  ;;  %v2427_v10 = vmul.f32 %v5858_v54, %v5858_v54 }
 0x448   :  { %v2509_v52 = vmul.f32 %v3359_v35, %v2492_v43  ;;  %vm2515_vm1 = vweird.f32 %v3359_v35 }
 0x449   :  { %3360 = vrsqrt.f32 %v2495_v57  ;;  %v2473_v17 = vsel %vm74_vm0, %v2427_v10, 0.0  ;;  %vm2516_vm3 = vmor %vm2514_vm2, %vm2515_vm1  ;;  %vm2544_vm5 = vweird.f32 %v2495_v57 }
 0x44a   :  { %v2510_v13 = vmul.f32 %v3359_v35, %v2509_v52  ;;  %2474 = vadd.xlane.f32.xlu0 %v2473_v17  ;;  %v2436_v4 = vpop.xlane.xlu2 %2435 }
 0x44b   :  { %v2478_v16 = vmul.f32 %v2436_v4, %v5608_v61 }
 0x44c   :  { %v2511_v56 = vmul.f32 0.5, %v2510_v13 }
 0x44d   :  { %v2494_v39 = vadd.f32 1e-05, %v2478_v16 }
 0x44e   :  { %v2512_v59 = vsub.f32 1.5, %v2511_v56 }
 0x44f   :  { %v3361_v62 = vpop.eup %3360  ;;  %3362 = vrsqrt.f32 %v2494_v39  ;;  %vm2534_vm7 = vweird.f32 %v2494_v39 }
 0x450   :  { %v2513_v51 = vmul.f32 %v3359_v35, %v2512_v59  ;;  %v2539_v23 = vmul.f32 %v3361_v62, %v2495_v57  ;;  %vm2545_vm4 = vweird.f32 %v3361_v62  ;;  %v2323_v57 = vmul.f32 %v5509_v34, %v5215_v63 }
 0x451   :  { %vm2546_vm6 = vmor %vm2544_vm5, %vm2545_vm4 }
 0x452   :  { %v2517_v60 = vsel %vm2516_vm3, %v3359_v35, %v2513_v51  ;;  %v2540_v3 = vmul.f32 %v3361_v62, %v2539_v23  ;;  %v2445_v46 = vpop.xlane.xlu2 %2444 }
 0x453   :  { %v2668_v6 = vmul.f32 %v2517_v60, %v5675_v18  ;;  %v2481_v53 = vmul.f32 %v2445_v46, %v5608_v61 }
 0x454   :  { %v2541_v14 = vmul.f32 0.5, %v2540_v3 }
 0x455   :  { %v3363_v12 = vpop.eup %3362  ;;  %v2687_v10 = vmul.f32 %v5783_v26, %v2668_v6  ;;  %v2497_v52 = vadd.f32 1e-05, %v2481_v53  ;;  %2892 = vrot.lane.b32.xlu1 %v2322_v42, %s3389_s22 }
 0x456   :  { %v2542_v43 = vsub.f32 1.5, %v2541_v14  ;;  %v2529_v17 = vmul.f32 %v3363_v12, %v2494_v39  ;;  %vm2535_vm8 = vweird.f32 %v3363_v12 }
 0x457   :  { %v2706_v35 = vadd.f32 %v5791_v19, %v2687_v10  ;;  %3364 = vrsqrt.f32 %v2497_v52  ;;  %vm2536_vm12 = vmor %vm2534_vm7, %vm2535_vm8  ;;  %vm2564_vm15 = vweird.f32 %v2497_v52 }
 0x458   :  { %v2543_v13 = vmul.f32 %v3361_v62, %v2542_v43  ;;  %v2530_v18 = vmul.f32 %v3363_v12, %v2529_v17 }
 0x459   :  { %v2914_v4 = vsel %vm74_vm0, %v2706_v35, %v5488_v21 }
 0x45a   :  { %v2931_v8 = vsel %vm2930_vm9, %v2914_v4, %v5464_v50  ;;  %v2547_v41 = vsel %vm2546_vm6, %v3361_v62, %v2543_v13  ;;  %v2531_v16 = vmul.f32 0.5, %v2530_v18 }
 0x45b   :  { %v2948_v56 = vsel %vm2947_vm10, %v2931_v8, %v5496_v37  ;;  %v2671_v59 = vmul.f32 %v2547_v41, %v5694_v33 }
 0x45c   :  { %v2965_v51 = vsel %vm2964_vm11, %v2948_v56, 1.0  ;;  %v2532_v23 = vsub.f32 1.5, %v2531_v16 }
 0x45d   :  { %v3365_v60 = vpop.eup %3364  ;;  %2982 = vst.msk [vmem:[%s6098_s12] sm:$0xff] %vm2981_vm13, %v2965_v51  ;;  %v2690_v50 = vmul.f32 %v5783_v26, %v2671_v59 }
 0x45e   :  { %v2533_v21 = vmul.f32 %v3363_v12, %v2532_v23  ;;  %v2559_v37 = vmul.f32 %v3365_v60, %v2497_v52  ;;  %2894 = vrot.lane.b32.xlu0 %v2323_v57, %s3389_s22  ;;  %vm2565_vm14 = vweird.f32 %v3365_v60 }
 0x45f   :  { %v2709_v33 = vadd.f32 %v5791_v19, %v2690_v50  ;;  %vm2566_vm1 = vmor %vm2564_vm15, %vm2565_vm14 }
 0x460   :  { %v2537_v62 = vsel %vm2536_vm12, %v3363_v12, %v2533_v21  ;;  %v2560_v3 = vmul.f32 %v3365_v60, %v2559_v37 }
 0x461   :  { %v2917_v63 = vsel %vm74_vm0, %v2709_v33, %v5531_v30  ;;  %v2670_v34 = vmul.f32 %v2537_v62, %v5703_v48 }
 0x462   :  { %v2934_v46 = vsel %vm2930_vm9, %v2917_v63, %v5491_v25  ;;  %v2561_v6 = vmul.f32 0.5, %v2560_v3 }
 0x463   :  { %v2951_v39 = vsel %vm2947_vm10, %v2934_v46, %v5535_v40  ;;  %v2689_v53 = vmul.f32 %v5783_v26, %v2670_v34 }
 0x464   :  { %v2968_v42 = vsel %vm2964_vm11, %v2951_v39, 1.0  ;;  %v2562_v14 = vsub.f32 1.5, %v2561_v6 }
 0x465   :  { %2985 = vst.msk [vmem:[%s6098_s12 + $0x18] sm:$0xff] %vm2981_vm13, %v2968_v42  ;;  %v2708_v30 = vadd.f32 %v5791_v19, %v2689_v53 }
 0x466   :  { %v2563_v48 = vmul.f32 %v3365_v60, %v2562_v14 }
 0x467   :  { %v2916_v25 = vsel %vm74_vm0, %v2708_v30, %v5473_v31 }
 0x468   :  { %v2933_v40 = vsel %vm2930_vm9, %v2916_v25, %v5516_v2  ;;  %v2567_v12 = vsel %vm2566_vm1, %v3365_v60, %v2563_v48 }
 0x469   :  { %v2950_v10 = vsel %vm2947_vm10, %v2933_v40, %v5480_v32  ;;  %v2673_v43 = vmul.f32 %v2567_v12, %v5716_v38  ;;  %v2451_v17 = vpop.xlane.xlu1 %2450 }
 0x46a   :  { %v2967_v35 = vsel %vm2964_vm11, %v2950_v10, 1.0  ;;  %v2483_v13 = vmul.f32 %v2451_v17, %v5608_v61 }
 0x46b   :  { %2984 = vst.msk [vmem:[%s6098_s12 + $0x10] sm:$0xff] %vm2981_vm13, %v2967_v35  ;;  %v2692_v31 = vmul.f32 %v5783_v26, %v2673_v43 }
 0x46c   :  { %v2448_v52 = vpop.xlane.xlu0 %2447  ;;  %v2499_v2 = vadd.f32 1e-05, %v2483_v13 }
 0x46d   :  { %v2711_v18 = vadd.f32 %v5791_v19, %v2692_v31  ;;  %v2482_v32 = vmul.f32 %v2448_v52, %v5608_v61 }
 0x46e   :  { %3366 = vrsqrt.f32 %v2499_v2  ;;  %vm2584_vm3 = vweird.f32 %v2499_v2 }
 0x46f   :  { %v2919_v38 = vsel %vm74_vm0, %v2711_v18, %v5569_v1  ;;  %v2498_v4 = vadd.f32 1e-05, %v2482_v32 }
 0x470   :  { %v2936_v8 = vsel %vm2930_vm9, %v2919_v38, %v5562_v9 }
 0x471   :  { %v2953_v41 = vsel %vm2947_vm10, %v2936_v8, %v5518_v58  ;;  %3368 = vrsqrt.f32 %v2498_v4  ;;  %vm2574_vm6 = vweird.f32 %v2498_v4 }
 0x472   :  { %v2970_v16 = vsel %vm2964_vm11, %v2953_v41, 1.0 }
 0x473   :  { %2987 = vst.msk [vmem:[%s6098_s12 + $0x28] sm:$0xff] %vm2981_vm13, %v2970_v16 }
 0x474   :  { %v3367_v56 = vpop.eup %3366 }
 0x475   :  { %v2579_v59 = vmul.f32 %v3367_v56, %v2499_v2  ;;  %vm2585_vm2 = vweird.f32 %v3367_v56 }
 0x476   :  { %vm2586_vm5 = vmor %vm2584_vm3, %vm2585_vm2 }
 0x477   :  { %v3369_v51 = vpop.eup %3368  ;;  %v2580_v23 = vmul.f32 %v3367_v56, %v2579_v59 }
 0x478   :  { %v2569_v1 = vmul.f32 %v3369_v51, %v2498_v4  ;;  %vm2575_vm4 = vweird.f32 %v3369_v51 }
 0x479   :  { %v2581_v57 = vmul.f32 0.5, %v2580_v23  ;;  %vm2576_vm8 = vmor %vm2574_vm6, %vm2575_vm4  ;;  %v6360_v23 = vld [vmem:[#allocation30_spill] sm:$0xff] }
 0x47a   :  { %v2570_v60 = vmul.f32 %v3369_v51, %v2569_v1 }
 0x47b   :  { %v2582_v50 = vsub.f32 1.5, %v2581_v57  ;;  %v2454_v9 = vpop.xlane.xlu2 %2453 }
 0x47c   :  { %v2571_v21 = vmul.f32 0.5, %v2570_v60  ;;  %v2484_v58 = vmul.f32 %v2454_v9, %v5608_v61 }
 0x47d   :  { %v2583_v37 = vmul.f32 %v3367_v56, %v2582_v50 }
 0x47e   :  { %v2572_v33 = vsub.f32 1.5, %v2571_v21  ;;  %v2500_v62 = vadd.f32 1e-05, %v2484_v58  ;;  %v6361_v21 = vld [vmem:[#allocation2_spill] sm:$0xff] }
 0x47f   :  { %v2587_v3 = vsel %vm2586_vm5, %v3367_v56, %v2583_v37 }
 0x480   :  { %v2573_v63 = vmul.f32 %v3369_v51, %v2572_v33  ;;  %v2675_v34 = vmul.f32 %v2587_v3, %v5735_v49  ;;  %3370 = vrsqrt.f32 %v2500_v62  ;;  %vm2594_vm12 = vweird.f32 %v2500_v62 }
 0x482   :  { %v2577_v46 = vsel %vm2576_vm8, %v3369_v51, %v2573_v63  ;;  %v2694_v6 = vmul.f32 %v5783_v26, %v2675_v34 }
 0x483   :  { %v2674_v39 = vmul.f32 %v2577_v46, %v5742_v7  ;;  %v2463_v53 = vpop.xlane.xlu2 %2462 }
 0x484   :  { %v2713_v42 = vadd.f32 %v5791_v19, %v2694_v6  ;;  %v2487_v14 = vmul.f32 %v2463_v53, %v5608_v61 }
 0x485   :  { %v2693_v30 = vmul.f32 %v5783_v26, %v2674_v39 }
 0x486   :  { %v3371_v48 = vpop.eup %3370  ;;  %v2921_v25 = vsel %vm74_vm0, %v2713_v42, %v5546_v20  ;;  %v2503_v40 = vadd.f32 1e-05, %v2487_v14 }
 0x487   :  { %v2712_v49 = vadd.f32 %v5791_v19, %v2693_v30  ;;  %v2938_v12 = vsel %vm2930_vm9, %v2921_v25, %v5595_v5  ;;  %v2589_v10 = vmul.f32 %v3371_v48, %v2500_v62  ;;  %vm2595_vm7 = vweird.f32 %v3371_v48 }
 0x488   :  { %v2955_v7 = vsel %vm2947_vm10, %v2938_v12, %v5591_v36  ;;  %3372 = vrsqrt.f32 %v2503_v40  ;;  %vm2596_vm14 = vmor %vm2594_vm12, %vm2595_vm7  ;;  %vm2624_vm1 = vweird.f32 %v2503_v40 }
 0x489   :  { %v2920_v43 = vsel %vm74_vm0, %v2712_v49, %v5576_v45  ;;  %v2972_v17 = vsel %vm2964_vm11, %v2955_v7, 1.0  ;;  %v2590_v35 = vmul.f32 %v3371_v48, %v2589_v10 }
 0x48a   :  { %v2937_v20 = vsel %vm2930_vm9, %v2920_v43, %v5533_v11  ;;  %2989 = vst.msk [vmem:[%s6098_s12 + $0x38] sm:$0xff] %vm2981_vm13, %v2972_v17 }
 0x48b   :  { %v2954_v5 = vsel %vm2947_vm10, %v2937_v20, %v5579_v47  ;;  %v2591_v13 = vmul.f32 0.5, %v2590_v35  ;;  %v2472_v8 = vpop.xlane.xlu2 %2471 }
 0x48c   :  { %v2971_v36 = vsel %vm2964_vm11, %v2954_v5, 1.0  ;;  %v2490_v59 = vmul.f32 %v2472_v8, %v5608_v61 }
 0x48d   :  { %2988 = vst.msk [vmem:[%s6098_s12 + $0x30] sm:$0xff] %vm2981_vm13, %v2971_v36  ;;  %v2592_v45 = vsub.f32 1.5, %v2591_v13 }
 0x48e   :  { %v3373_v31 = vpop.eup %3372  ;;  %v2506_v50 = vadd.f32 1e-05, %v2490_v59  ;;  %v6365_v59 = vld [vmem:[#allocation6_spill] sm:$0xff] }
 0x48f   :  { %v2593_v11 = vmul.f32 %v3371_v48, %v2592_v45  ;;  %v2619_v52 = vmul.f32 %v3373_v31, %v2503_v40  ;;  %vm2625_vm15 = vweird.f32 %v3373_v31  ;;  %v6373_v45 = vld [vmem:[#allocation28_spill] sm:$0xff] }
 0x490   :  { %vm2626_vm2 = vmor %vm2624_vm1, %vm2625_vm15  ;;  %3374 = vrsqrt.f32 %v2506_v50  ;;  %vm2654_vm5 = vweird.f32 %v2506_v50 }
 0x491   :  { %v2597_v2 = vsel %vm2596_vm14, %v3371_v48, %v2593_v11  ;;  %v2620_v18 = vmul.f32 %v3373_v31, %v2619_v52 }
 0x492   :  { %v2676_v32 = vmul.f32 %v2597_v2, %v5753_v28 }
 0x493   :  { %v2621_v47 = vmul.f32 0.5, %v2620_v18 }
 0x494   :  { %v2695_v38 = vmul.f32 %v5783_v26, %v2676_v32 }
 0x495   :  { %v2622_v4 = vsub.f32 1.5, %v2621_v47 }
 0x496   :  { %v2714_v41 = vadd.f32 %v5791_v19, %v2695_v38  ;;  %v3375_v62 = vpop.eup %3374 }
 0x497   :  { %v2623_v16 = vmul.f32 %v3373_v31, %v2622_v4  ;;  %v2649_v34 = vmul.f32 %v3375_v62, %v2506_v50  ;;  %vm2655_vm3 = vweird.f32 %v3375_v62 }
 0x498   :  { %v2922_v56 = vsel %vm74_vm0, %v2714_v41, %v5628_v55  ;;  %vm5996_vm6 = vmor %vm2654_vm5, %vm2655_vm3 }
 0x499   :  { %v2939_v51 = vsel %vm2930_vm9, %v2922_v56, %v5612_v15  ;;  %v2627_v28 = vsel %vm2626_vm2, %v3373_v31, %v2623_v16  ;;  %v2650_v46 = vmul.f32 %v3375_v62, %v2649_v34 }
 0x49a   :  { %v2956_v1 = vsel %vm2947_vm10, %v2939_v51, %v6360_v23  ;;  %v2679_v57 = vmul.f32 %v2627_v28, %v5761_v27  ;;  %v6362_v27 = vld [vmem:[#allocation35_spill] sm:$0xff] }
 0x49b   :  { %v2973_v60 = vsel %vm2964_vm11, %v2956_v1, 1.0  ;;  %v2651_v30 = vmul.f32 0.5, %v2650_v46 }
 0x49c   :  { %2990 = vst.msk [vmem:[%s6098_s12 + $0x40] sm:$0xff] %vm2981_vm13, %v2973_v60  ;;  %v2698_v55 = vmul.f32 %v5783_v26, %v2679_v57 }
 0x49d   :  { %v2652_v49 = vsub.f32 1.5, %v2651_v30  ;;  %v6369_v30 = vld [vmem:[#allocation36_spill] sm:$0xff] }
 0x49e   :  { %v2717_v9 = vadd.f32 %v5791_v19, %v2698_v55 }
 0x49f   :  { %v2653_v20 = vmul.f32 %v3375_v62, %v2652_v49 }
 0x4a0   :  { %v2925_v15 = vsel %vm74_vm0, %v2717_v9, %v5712_v22  ;;  %v6366_v9 = vld [vmem:[#allocation34_spill] sm:$0xff] }
 0x4a1   :  { %v2942_v58 = vsel %vm2930_vm9, %v2925_v15, %v6361_v21  ;;  %v2657_v2 = vsel %vm5996_vm6, %v3375_v62, %v2653_v20 }
 0x4a2   :  { %v2959_v37 = vsel %vm2947_vm10, %v2942_v58, %v6362_v27  ;;  %v2682_v51 = vmul.f32 %v2657_v2, %v6365_v59  ;;  %v6367_v27 = vld [vmem:[#allocation7_spill] sm:$0xff] }
 0x4a3   :  { %v2976_v33 = vsel %vm2964_vm11, %v2959_v37, 1.0 }
 0x4a4   :  { %2993 = vst.msk [vmem:[%s6098_s12 + $0x58] sm:$0xff] %vm2981_vm13, %v2976_v33  ;;  %v2701_v58 = vmul.f32 %v5783_v26, %v2682_v51 }
 0x4a7   :  { %v2460_v3 = vpop.xlane.xlu1 %2459 }
 0x4a8   :  { %v2486_v63 = vmul.f32 %v2460_v3, %v5608_v61  ;;  %v6368_v3 = vld [vmem:[#allocation39_spill] sm:$0xff] }
 0x4aa   :  { %v2502_v22 = vadd.f32 1e-05, %v2486_v63 }
 0x4ac   :  { %3376 = vrsqrt.f32 %v2502_v22  ;;  %vm2614_vm8 = vweird.f32 %v2502_v22 }
 0x4ad   :  { %v2457_v6 = vpop.xlane.xlu0 %2456 }
 0x4ae   :  { %v2485_v39 = vmul.f32 %v2457_v6, %v5608_v61 }
 0x4af   :  { %v2469_v53 = vpop.xlane.xlu1 %2468 }
 0x4b0   :  { %v2501_v42 = vadd.f32 1e-05, %v2485_v39  ;;  %v2489_v14 = vmul.f32 %v2469_v53, %v5608_v61 }
 0x4b2   :  { %v3377_v48 = vpop.eup %3376  ;;  %3378 = vrsqrt.f32 %v2501_v42  ;;  %v2505_v25 = vadd.f32 1e-05, %v2489_v14  ;;  %vm2604_vm14 = vweird.f32 %v2501_v42 }
 0x4b3   :  { %v2609_v40 = vmul.f32 %v3377_v48, %v2502_v22  ;;  %vm2615_vm4 = vweird.f32 %v3377_v48 }
 0x4b4   :  { %3380 = vrsqrt.f32 %v2505_v25  ;;  %vm2616_vm7 = vmor %vm2614_vm8, %vm2615_vm4  ;;  %vm2644_vm2 = vweird.f32 %v2505_v25 }
 0x4b5   :  { %v2610_v12 = vmul.f32 %v3377_v48, %v2609_v40  ;;  %v2466_v10 = vpop.xlane.xlu0 %2465  ;;  %v6370_v40 = vld [vmem:[#allocation32_spill] sm:$0xff] }
 0x4b6   :  { %v2488_v7 = vmul.f32 %v2466_v10, %v5608_v61 }
 0x4b7   :  { %v2611_v43 = vmul.f32 0.5, %v2610_v12 }
 0x4b8   :  { %v3379_v17 = vpop.eup %3378  ;;  %v5993_v35 = vadd.f32 1e-05, %v2488_v7  ;;  %v6371_v7 = vld [vmem:[#allocation38_spill] sm:$0xff] }
 0x4b9   :  { %v2612_v5 = vsub.f32 1.5, %v2611_v43  ;;  %v2599_v13 = vmul.f32 %v3379_v17, %v2501_v42  ;;  %vm2605_vm12 = vweird.f32 %v3379_v17 }
 0x4ba   :  { %v3381_v36 = vpop.eup %3380  ;;  %3382 = vrsqrt.f32 %v5993_v35  ;;  %vm2606_vm1 = vmor %vm2604_vm14, %vm2605_vm12  ;;  %vm2634_vm5 = vweird.f32 %v5993_v35 }
 0x4bb   :  { %v2613_v31 = vmul.f32 %v3377_v48, %v2612_v5  ;;  %v2600_v11 = vmul.f32 %v3379_v17, %v2599_v13  ;;  %v2639_v52 = vmul.f32 %v3381_v36, %v2505_v25  ;;  %vm2645_vm15 = vweird.f32 %v3381_v36 }
 0x4bc   :  { %vm2646_vm3 = vmor %vm2644_vm2, %vm2645_vm15 }
 0x4bd   :  { %v2617_v18 = vsel %vm2616_vm7, %v3377_v48, %v2613_v31  ;;  %v2601_v32 = vmul.f32 0.5, %v2600_v11  ;;  %v2640_v47 = vmul.f32 %v3381_v36, %v2639_v52  ;;  %v2475_v38 = vpop.xlane.xlu0 %2474  ;;  %v6374_v11 = vld [vmem:[#allocation8_spill] sm:$0xff] }
 0x4be   :  { %v2678_v4 = vmul.f32 %v2617_v18, %v5796_v29  ;;  %v2491_v8 = vmul.f32 %v2475_v38, %v5608_v61 }
 0x4bf   :  { %v2602_v41 = vsub.f32 1.5, %v2601_v32  ;;  %v2641_v16 = vmul.f32 0.5, %v2640_v47 }
 0x4c0   :  { %v3383_v56 = vpop.eup %3382  ;;  %v2697_v28 = vmul.f32 %v5783_v26, %v2678_v4  ;;  %v2507_v23 = vadd.f32 1e-05, %v2491_v8  ;;  %v6375_v4 = vld [vmem:[#allocation5_spill] sm:$0xff] }
 0x4c1   :  { %v2603_v1 = vmul.f32 %v3379_v17, %v2602_v41  ;;  %v2642_v57 = vsub.f32 1.5, %v2641_v16  ;;  %v2629_v60 = vmul.f32 %v3383_v56, %v5993_v35  ;;  %vm2635_vm4 = vweird.f32 %v3383_v56  ;;  %v6372_v35 = vld [vmem:[#allocation4_spill] sm:$0xff] }
 0x4c2   :  { %v2716_v55 = vadd.f32 %v5791_v19, %v2697_v28  ;;  %3384 = vrsqrt.f32 %v2507_v23  ;;  %vm2636_vm6 = vmor %vm2634_vm5, %vm2635_vm4  ;;  %vm2664_vm7 = vweird.f32 %v2507_v23  ;;  %v6377_v28 = vld [vmem:[#allocation3_spill] sm:$0xff] }
 0x4c3   :  { %v2607_v61 = vsel %vm2606_vm1, %v3379_v17, %v2603_v1  ;;  %v2643_v29 = vmul.f32 %v3381_v36, %v2642_v57  ;;  %v2630_v50 = vmul.f32 %v3383_v56, %v2629_v60  ;;  %v6378_v60 = vld [vmem:[#allocation24_spill] sm:$0xff] }
 0x4c4   :  { %v2924_v15 = vsel %vm74_vm0, %v2716_v55, %v6366_v9  ;;  %v2677_v21 = vmul.f32 %v2607_v61, %v5809_v0  ;;  %v6379_v9 = vld [vmem:[#allocation33_spill] sm:$0xff] }
 0x4c5   :  { %v2941_v37 = vsel %vm2930_vm9, %v2924_v15, %v6367_v27  ;;  %v2647_v33 = vsel %vm2646_vm3, %v3381_v36, %v2643_v29  ;;  %v2631_v62 = vmul.f32 0.5, %v2630_v50 }
 0x4c6   :  { %v2958_v63 = vsel %vm2947_vm10, %v2941_v37, %v6368_v3  ;;  %v2696_v34 = vmul.f32 %v5783_v26, %v2677_v21  ;;  %v2681_v22 = vmul.f32 %v2647_v33, %v5818_v44  ;;  %v2720_v44 = vadd.f32 %v5791_v19, %v2701_v58  ;;  %v2897_v21 = vpop.permute.xlu2 %2896  ;;  %v6380_v58 = vld [vmem:[#allocation37_spill] sm:$0xff] }
 0x4c7   :  { %v2975_v46 = vsel %vm2964_vm11, %v2958_v63, 1.0  ;;  %v2632_v6 = vsub.f32 1.5, %v2631_v62  ;;  %v2893_v36 = vpop.permute.xlu1 %2892 }
 0x4c8   :  { %v3385_v0 = vpop.eup %3384  ;;  %2992 = vst.msk [vmem:[%s6098_s12 + $0x50] sm:$0xff] %vm2981_vm13, %v2975_v46  ;;  %v2715_v39 = vadd.f32 %v5791_v19, %v2696_v34  ;;  %v2700_v53 = vmul.f32 %v5783_v26, %v2681_v22  ;;  %v2928_v52 = vsel %vm74_vm0, %v2720_v44, %v6374_v11 }
 0x4c9   :  { %v2633_v42 = vmul.f32 %v3383_v56, %v2632_v6  ;;  %v2659_v14 = vmul.f32 %v3385_v0, %v2507_v23  ;;  %vm2665_vm8 = vweird.f32 %v3385_v0  ;;  %v2945_v8 = vsel %vm2930_vm9, %v2928_v52, %v6375_v4 }
 0x4ca   :  { %v2923_v48 = vsel %vm74_vm0, %v2715_v39, %v6369_v30  ;;  %v2719_v25 = vadd.f32 %v5791_v19, %v2700_v53  ;;  %vm2666_vm12 = vmor %vm2664_vm7, %vm2665_vm8 }
 0x4cb   :  { %v2940_v49 = vsel %vm2930_vm9, %v2923_v48, %v6370_v40  ;;  %v2637_v12 = vsel %vm2636_vm6, %v3383_v56, %v2633_v42  ;;  %v2660_v10 = vmul.f32 %v3385_v0, %v2659_v14  ;;  %v6376_v56 = vld [vmem:[#allocation20_spill] sm:$0xff] }
 0x4cc   :  { %v2957_v43 = vsel %vm2947_vm10, %v2940_v49, %v6371_v7  ;;  %v2680_v17 = vmul.f32 %v2637_v12, %v5837_v24  ;;  %v2927_v20 = vsel %vm74_vm0, %v2719_v25, %v6372_v35 }
 0x4cd   :  { %v2974_v5 = vsel %vm2964_vm11, %v2957_v43, 1.0  ;;  %v2661_v13 = vmul.f32 0.5, %v2660_v10  ;;  %v2944_v31 = vsel %vm2930_vm9, %v2927_v20, %v6373_v45 }
 0x4ce   :  { %2991 = vst.msk [vmem:[%s6098_s12 + $0x48] sm:$0xff] %vm2981_vm13, %v2974_v5  ;;  %v2699_v24 = vmul.f32 %v5783_v26, %v2680_v17  ;;  %v2961_v2 = vsel %vm2947_vm10, %v2944_v31, %v2893_v36 }
 0x4cf   :  { %v2662_v18 = vsub.f32 1.5, %v2661_v13  ;;  %v2978_v32 = vsel %vm2964_vm11, %v2961_v2, 1.0 }
 0x4d0   :  { %v2718_v47 = vadd.f32 %v5791_v19, %v2699_v24  ;;  %2995 = vst.msk [vmem:[%s6098_s12 + $0x68] sm:$0xff] %vm2981_vm13, %v2978_v32  ;;  %v2895_v38 = vpop.permute.xlu0 %2894 }
 0x4d1   :  { %v2663_v41 = vmul.f32 %v3385_v0, %v2662_v18  ;;  %v2962_v16 = vsel %vm2947_vm10, %v2945_v8, %v2895_v38 }
 0x4d2   :  { %v2926_v59 = vsel %vm74_vm0, %v2718_v47, %v6376_v56  ;;  %v2979_v51 = vsel %vm2964_vm11, %v2962_v16, 1.0 }
 0x4d3   :  { %v2943_v1 = vsel %vm2930_vm9, %v2926_v59, %v6377_v28  ;;  %v2667_v57 = vsel %vm2666_vm12, %v3385_v0, %v2663_v41  ;;  %2996 = vst.msk [vmem:[%s6098_s12 + $0x70] sm:$0xff] %vm2981_vm13, %v2979_v51 }
 0x4d4   :  { %v2960_v23 = vsel %vm2947_vm10, %v2943_v1, %v6378_v60  ;;  %v2683_v55 = vmul.f32 %v2667_v57, %v5858_v54 }
 0x4d5   :  { %v2977_v61 = vsel %vm2964_vm11, %v2960_v23, 1.0 }
 0x4d6   :  { %2994 = vst.msk [vmem:[%s6098_s12 + $0x60] sm:$0xff] %vm2981_vm13, %v2977_v61  ;;  %v2702_v29 = vmul.f32 %v5783_v26, %v2683_v55 }
 0x4d8   :  { %v2721_v50 = vadd.f32 %v5791_v19, %v2702_v29 }
 0x4da   :  { %v2929_v15 = vsel %vm74_vm0, %v2721_v50, %v6379_v9 }
 0x4db   :  { %v2946_v27 = vsel %vm2930_vm9, %v2929_v15, %v6380_v58 }
 0x4dc   :  { %v2963_v54 = vsel %vm2947_vm10, %v2946_v27, %v2897_v21 }
 0x4dd   :  { %v2980_v37 = vsel %vm2964_vm11, %v2963_v54, 1.0 }
 0x4de   :  { %2997 = vst.msk [vmem:[%s6098_s12 + $0x78] sm:$0xff] %vm2981_vm13, %v2980_v37 }

</bundles_post_ra>
